<compile_context>
chip_gen: v5e
topology: v5e:2x2
jax: 0.10.0
libtpu: 0.0.40
codegen_flags: <defaults>
</compile_context>

<pallas_src>
import functools

import jax
import jax.numpy as jnp
import numpy as np
from jax.experimental import pallas as pl
from jax.experimental.pallas import tpu as pltpu

LANE = 128


def _round_up(n, m):
    return ((n + m - 1) // m) * m


def _se_bottleneck_kernel(H, W, block_n, flat,
                          x_ref, w1_ref, b1_ref, w2_ref, b2_ref,
                          w3_ref, b3_ref, sew1_ref, sew2_ref,
                          out_ref, pad_ref):
    f32 = jnp.float32
    bf16 = jnp.bfloat16
    P = H * W
    M = block_n * P
    cpad = x_ref.shape[-1]          # padded Cin == padded Cout (identity add)
    wpad = w1_ref.shape[-1]         # padded bottleneck width

    def mm(a3, w):
        """(block_n, P, K) @ (K, Nc) -> (block_n, P, Nc), f32 accumulation."""
        if flat:  # P is 8-sublane aligned -> merging (bn, P) is a free reshape
            r = jnp.dot(a3.reshape(M, a3.shape[-1]).astype(bf16), w,
                        preferred_element_type=f32)
            return r.reshape(block_n, P, w.shape[-1])
        # P not 8-aligned: keep the batched layout, avoid a re-tiling copy.
        return jnp.einsum("bpk,kn->bpn", a3.astype(bf16), w,
                          preferred_element_type=f32)

    x = x_ref[...]                                        # (bn, P, cpad) bf16

    # ---- conv1 (1x1) + BN1 (scale folded into w1) + ReLU ------------------ #
    h1 = jnp.maximum(mm(x, w1_ref[...]) + b1_ref[...], 0.0)   # (bn,P,wpad) f32

    # ---- conv2 (3x3, stride=1, pad=1) + BN2 + ReLU ------------------------ #
    # Zero only the halo ring (interior is fully overwritten below).  Done
    # every step: with a megacore-parallel grid each core owns its own scratch
    # and its first global program_id may be nonzero, so pid==0 gating is
    # unsound.  Ring cost is ~15x smaller than zeroing the full buffer.
    pad_ref[:, 0:1, :, :] = jnp.zeros((block_n, 1, W + 2, wpad), bf16)
    pad_ref[:, H + 1:H + 2, :, :] = jnp.zeros((block_n, 1, W + 2, wpad), bf16)
    pad_ref[:, :, 0:1, :] = jnp.zeros((block_n, H + 2, 1, wpad), bf16)
    pad_ref[:, :, W + 1:W + 2, :] = jnp.zeros((block_n, H + 2, 1, wpad), bf16)
    pad_ref[:, 1:H + 1, 1:W + 1, :] = (
        h1.reshape(block_n, H, W, wpad).astype(bf16))

    # 9 accumulating bf16 matmuls (no (M, 9*wpad) patches materialization).
    h2 = None
    for kh in range(3):
        for kw in range(3):
            tap = pad_ref[:, kh:kh + H, kw:kw + W, :].reshape(block_n, P, wpad)
            part = mm(tap, w2_ref[kh * 3 + kw])
            h2 = part if h2 is None else h2 + part
    h2 = jnp.maximum(h2 + b2_ref[...], 0.0)                    # (bn, P, wpad)

    # ---- conv3 (1x1) + BN3 (scale folded, no ReLU yet) --------------------- #
    h3 = mm(h2, w3_ref[...]) + b3_ref[...]                     # (bn, P, cpad)

    # ---- SE: per-image GAP -> FC -> ReLU -> FC -> sigmoid -> scale --------- #
    pooled = jnp.mean(h3, axis=1)                              # (bn, cpad)
    se = jnp.maximum(jnp.dot(pooled.astype(bf16), sew1_ref[...],
                             preferred_element_type=f32), 0.0)
    gate = jax.nn.sigmoid(jnp.dot(se.astype(bf16), sew2_ref[...],
                                  preferred_element_type=f32))  # (bn, cpad)
    gated = h3 * gate[:, None, :]

    # ---- residual add + final ReLU (downsample=None -> identity = x) ------- #
    out_ref[...] = jnp.maximum(gated + x.astype(f32), 0.0).astype(out_ref.dtype)


def _vmem_bytes(block_n, P, H, W, cpad, wpad, rpad):
    """Rough per-step VMEM working-set estimate (bytes)."""
    M = block_n * P
    b = 0
    b += 2 * (block_n * P * cpad * 2) * 2            # x + out (bf16), double-buffered
    b += block_n * (H + 2) * (W + 2) * wpad * 2      # padded h1 scratch (bf16)
    b += 2 * M * wpad * 4                            # h1 + conv2 accumulator (f32)
    b += 2 * M * cpad * 4                            # h3 + gated (f32)
    b += M * wpad * 2                                # one live tap copy (bf16)
    b += (cpad * wpad + 9 * wpad * wpad + wpad * cpad
          + cpad * rpad + rpad * cpad) * 2           # bf16 weights (single-buffered)
    b += 8 * (2 * wpad + cpad) * 4                   # biases (f32, sublane-padded)
    return b


def se_bottleneck(x_nchw, params, H, W, block_n=None,
                  vmem_budget=28 * 1024 * 1024):
    """SEBottleneck forward.  x_nchw: (N, Cin, H, W) float32, PyTorch NCHW."""
    N, Cin, Hx, Wx = x_nchw.shape
    assert (Hx, Wx) == (H, W)
    P = H * W
    width = params["w1"].shape[-1]
    Cout = params["w3"].shape[-1]
    Cred = params["sew1"].shape[-1]
    assert Cin == Cout, "identity residual (downsample=None) needs Cin == Cout"

    cpad = _round_up(Cout, LANE)
    wpad = _round_up(width, LANE)
    rpad = _round_up(Cred, LANE)
    bf16 = jnp.bfloat16

    # ---- fold BN scales into the matmul weights (constant transform) ------- #
    w1_f = params["w1"] * params["s1"]               # (Cin, width)
    w2_f = params["w2"] * params["s2"][0]            # (3,3,width,width)
    w3_f = params["w3"] * params["s3"]               # (width, Cout)

    def pad2(a, r, c):
        return jnp.pad(a, ((0, r - a.shape[0]), (0, c - a.shape[1])))

    w1 = pad2(w1_f, cpad, wpad).astype(bf16)                       # (cpad, wpad)
    w2 = jnp.pad(w2_f, ((0, 0), (0, 0),
                        (0, wpad - width), (0, wpad - width)))
    w2 = w2.reshape(9, wpad, wpad).astype(bf16)                    # per-tap weights
    w3 = pad2(w3_f, wpad, cpad).astype(bf16)                       # (wpad, cpad)
    sew1 = pad2(params["sew1"], cpad, rpad).astype(bf16)           # (cpad, rpad)
    sew2 = pad2(params["sew2"], rpad, cpad).astype(bf16)           # (rpad, cpad)
    b1 = pad2(params["b1"], 1, wpad)
    b2 = pad2(params["b2"], 1, wpad)
    b3 = pad2(params["b3"], 1, cpad)

    # ---- activations: NCHW -> (N, P, cpad) bf16, channels lane-dense ------- #
    # TODO(synk): for true C << 128, consider keeping the HBM last dim at C and
    # padding inside VMEM (masked stores vs 4x byte reduction); real ResNet
    # channel counts are already lane-dense.
    x = jnp.transpose(x_nchw, (0, 2, 3, 1)).reshape(N, P, Cin)
    x = jnp.pad(x, ((0, 0), (0, 0), (0, cpad - Cin))).astype(bf16)

    # ---- images per grid step: VMEM-budgeted, M<=4096, grid >= 2 steps ----- #
    if block_n is None:
        divisors = [d for d in range(1, N + 1) if N % d == 0]
        multi = [d for d in divisors if N // d >= 2]   # keep both v7x TCs busy
        if multi:
            divisors = multi
        block_n = 1
        for d in divisors:
            if (d * P <= 4096 and
                    _vmem_bytes(d, P, H, W, cpad, wpad, rpad) <= vmem_budget):
                block_n = max(block_n, d)
    assert N % block_n == 0
    flat = (P % 8 == 0)

    est = _vmem_bytes(block_n, P, H, W, cpad, wpad, rpad)
    vmem_limit = int(min(64 * 1024 * 1024, max(32 * 1024 * 1024, 2 * est)))

    packed = (w1, b1, w2, b2, w3, b3, sew1, sew2)

    def const_spec(a, single_buffer):
        nd = a.ndim
        idx = lambda n, _nd=nd: (0,) * _nd
        if single_buffer:
            # grid-invariant operand: no benefit from double-buffering
            return pl.BlockSpec(a.shape, idx,
                                pipeline_mode=pl.Buffered(buffer_count=1))
        return pl.BlockSpec(a.shape, idx)

    def build(single_buffer_weights):
        in_specs = [pl.BlockSpec((block_n, P, cpad), lambda n: (n, 0, 0))]
        in_specs += [const_spec(a, single_buffer_weights) for a in packed]
        return pl.pallas_call(
            functools.partial(_se_bottleneck_kernel, H, W, block_n, flat),
            out_shape=jax.ShapeDtypeStruct((N, P, cpad), bf16),
            grid=(N // block_n,),
            in_specs=in_specs,
            out_specs=pl.BlockSpec((block_n, P, cpad), lambda n: (n, 0, 0)),
            scratch_shapes=[pltpu.VMEM((block_n, H + 2, W + 2, wpad), bf16)],
            compiler_params=pltpu.CompilerParams(
                dimension_semantics=("parallel",),
                vmem_limit_bytes=vmem_limit),
        )

    try:
        out = build(True)(x, *packed)
    except Exception:
        # Fallback if single-buffering via pl.Buffered(1) is unsupported.
        out = build(False)(x, *packed)

    out = out[:, :, :Cout].astype(x_nchw.dtype)
    return jnp.transpose(out.reshape(N, H, W, Cout), (0, 3, 1, 2))


def init_params(key, inplanes, planes, base_width=64, groups=1,
                reduction=16, expansion=4, eps=1e-5):
    width = int(planes * (base_width / 64.0)) * groups
    cout = planes * expansion
    cred = cout // reduction
    ks = jax.random.split(key, 17)

    def conv_w(k, shape, fan_in):
        return jax.random.normal(k, shape, jnp.float32) / jnp.sqrt(float(fan_in))

    # conv1: torch weight (width, inplanes, 1, 1) -> matmul (inplanes, width)
    w1 = conv_w(ks[0], (inplanes, width), inplanes)
    # conv2: torch weight (width, width, 3, 3) -> (kh, kw, cin, cout)
    w2_torch = conv_w(ks[1], (width, width, 3, 3), width * 9)
    w2 = jnp.transpose(w2_torch, (2, 3, 1, 0))
    # conv3: torch weight (cout, width, 1, 1) -> matmul (width, cout)
    w3 = conv_w(ks[2], (width, cout), width)
    # SE fully connected layers (bias=False), stored pre-transposed for x @ W
    sew1 = conv_w(ks[3], (cout, cred), cout)
    sew2 = conv_w(ks[4], (cred, cout), cred)

    def bn(kg, kb, km, kv, c):
        gamma = 1.0 + 0.1 * jax.random.normal(kg, (c,), jnp.float32)
        beta = 0.1 * jax.random.normal(kb, (c,), jnp.float32)
        mean = 0.1 * jax.random.normal(km, (c,), jnp.float32)
        var = jnp.abs(jax.random.normal(kv, (c,), jnp.float32)) + 0.5
        scale = gamma / jnp.sqrt(var + eps)
        bias = beta - mean * scale
        return scale.reshape(1, c), bias.reshape(1, c)

    s1, b1 = bn(ks[5], ks[6], ks[7], ks[8], width)
    s2, b2 = bn(ks[9], ks[10], ks[11], ks[12], width)
    s3, b3 = bn(ks[13], ks[14], ks[15], ks[16], cout)

    return dict(w1=w1, s1=s1, b1=b1, w2=w2, s2=s2, b2=b2,
                w3=w3, s3=s3, b3=b3, sew1=sew1, sew2=sew2)


def reference(x_nchw, params, H, W):
    """Plain-JAX reference mirroring the kernel's bf16-I/O / bf16-matmul /
    f32-accumulate precision (scale folded into weights, identical math;
    only reduction order may differ)."""
    f32, bf16 = jnp.float32, jnp.bfloat16

    def dot16(a, b):
        return jnp.dot(a.astype(bf16), b.astype(bf16), preferred_element_type=f32)

    x = jnp.transpose(x_nchw, (0, 2, 3, 1)).astype(bf16).astype(f32)
    N, _, _, Cin = x.shape
    width = params["w1"].shape[-1]

    w1 = params["w1"] * params["s1"]
    w2 = params["w2"] * params["s2"][0]
    w3 = params["w3"] * params["s3"]

    h = dot16(x.reshape(-1, Cin), w1).reshape(N, H, W, width)
    h = jnp.maximum(h + params["b1"][0], 0.0)

    padded = jnp.pad(h, ((0, 0), (1, 1), (1, 1), (0, 0)))
    h2 = None
    for kh in range(3):
        for kw in range(3):
            tap = padded[:, kh:kh + H, kw:kw + W, :].reshape(-1, width)
            part = dot16(tap, w2[kh, kw])
            h2 = part if h2 is None else h2 + part
    h2 = jnp.maximum(h2 + params["b2"][0], 0.0)

    h3 = dot16(h2, w3).reshape(N, H, W, -1) + params["b3"][0]

    pooled = jnp.mean(h3, axis=(1, 2))
    se = jnp.maximum(dot16(pooled, params["sew1"]), 0.0)
    gate = jax.nn.sigmoid(dot16(se, params["sew2"]))[:, None, None, :]
    out = jnp.maximum(h3 * gate + x, 0.0).astype(bf16).astype(f32)
    return jnp.transpose(out, (0, 3, 1, 2))


if __name__ == "__main__":
    key = jax.random.PRNGKey(0)
    # planes=8 -> width=8, out channels = planes*4 = 32 = inplanes, so the
    # identity residual add is valid with downsample=None, stride=1.
    N, inplanes_, planes_, H, W = 2, 32, 8, 8, 8
    kx, kp = jax.random.split(key)
    x = jax.random.normal(kx, (N, inplanes_, H, W), jnp.float32)
    params = init_params(kp, inplanes_, planes_)

    out = jax.block_until_ready(se_bottleneck(x, params, H, W))
    assert out.shape == (N, planes_ * 4, H, W)

    ref = jax.block_until_ready(reference(x, params, H, W))
    np.testing.assert_allclose(np.asarray(out), np.asarray(ref),
                               rtol=2e-2, atol=2e-2)
    print("KERNEL_OK")
</pallas_src>

<mosaic_0001>
module attributes {stable_mosaic.version = 11 : i64} {
  func.func @_se_bottleneck_kernel(%arg0: i32, %arg1: memref<1x64x128xbf16, #tpu.memory_space<vmem>>, %arg2: memref<128x128xbf16, #tpu.memory_space<vmem>>, %arg3: memref<1x128xf32, #tpu.memory_space<vmem>>, %arg4: memref<9x128x128xbf16, #tpu.memory_space<vmem>>, %arg5: memref<1x128xf32, #tpu.memory_space<vmem>>, %arg6: memref<128x128xbf16, #tpu.memory_space<vmem>>, %arg7: memref<1x128xf32, #tpu.memory_space<vmem>>, %arg8: memref<128x128xbf16, #tpu.memory_space<vmem>>, %arg9: memref<128x128xbf16, #tpu.memory_space<vmem>>, %arg10: memref<1x64x128xbf16, #tpu.memory_space<vmem>>, %arg11: memref<1x10x10x128xbf16, #tpu.memory_space<vmem>>) attributes {dimension_semantics = [#tpu.dimension_semantics<parallel>], iteration_bounds = array<i64: 2>, scalar_prefetch = 0 : i64, scratch_operands = 1 : i64, tpu.core_type = #tpu.core_type<tc>, window_params = [{transform_indices = @transform_0, window_bounds = array<i64: 1, 64, 128>}, {pipeline_mode = #tpu.pipeline_mode<synchronous>, transform_indices = @transform_1, window_bounds = array<i64: 128, 128>}, {pipeline_mode = #tpu.pipeline_mode<synchronous>, transform_indices = @transform_2, window_bounds = array<i64: 1, 128>}, {pipeline_mode = #tpu.pipeline_mode<synchronous>, transform_indices = @transform_3, window_bounds = array<i64: 9, 128, 128>}, {pipeline_mode = #tpu.pipeline_mode<synchronous>, transform_indices = @transform_4, window_bounds = array<i64: 1, 128>}, {pipeline_mode = #tpu.pipeline_mode<synchronous>, transform_indices = @transform_5, window_bounds = array<i64: 128, 128>}, {pipeline_mode = #tpu.pipeline_mode<synchronous>, transform_indices = @transform_6, window_bounds = array<i64: 1, 128>}, {pipeline_mode = #tpu.pipeline_mode<synchronous>, transform_indices = @transform_7, window_bounds = array<i64: 128, 128>}, {pipeline_mode = #tpu.pipeline_mode<synchronous>, transform_indices = @transform_8, window_bounds = array<i64: 128, 128>}, {transform_indices = @transform_9, window_bounds = array<i64: 1, 64, 128>}]} {
    %c0 = arith.constant 0 : index
    %c0_0 = arith.constant 0 : index
    %c0_1 = arith.constant 0 : index
    %0 = vector.load %arg1[%c0, %c0_0, %c0_1] : memref<1x64x128xbf16, #tpu.memory_space<vmem>>, vector<1x64x128xbf16>
    %c0_2 = arith.constant 0 : index
    %c0_3 = arith.constant 0 : index
    %1 = vector.load %arg2[%c0_2, %c0_3] : memref<128x128xbf16, #tpu.memory_space<vmem>>, vector<128x128xbf16>
    %2 = vector.shape_cast %0 : vector<1x64x128xbf16> to vector<64x128xbf16>
    %cst = arith.constant dense<0.000000e+00> : vector<64x128xf32>
    %3 = tpu.matmul %2, %1, %cst {dimension_numbers = #tpu.dot_dimension_numbers<[1], [0], [0], [1], [0, 0, 1, 1], [], []>} : vector<64x128xbf16>, vector<128x128xbf16>, vector<64x128xf32> -> vector<64x128xf32>
    %4 = vector.shape_cast %3 : vector<64x128xf32> to vector<1x64x128xf32>
    %c0_4 = arith.constant 0 : index
    %c0_5 = arith.constant 0 : index
    %5 = vector.load %arg3[%c0_4, %c0_5] : memref<1x128xf32, #tpu.memory_space<vmem>>, vector<1x128xf32>
    %6 = vector.shape_cast %5 : vector<1x128xf32> to vector<1x1x128xf32>
    %7 = vector.broadcast %6 : vector<1x1x128xf32> to vector<1x64x128xf32>
    %8 = arith.addf %4, %7 : vector<1x64x128xf32>
    %cst_6 = arith.constant 0.000000e+00 : f32
    %9 = vector.broadcast %cst_6 : f32 to vector<1x64x128xf32>
    %10 = arith.maximumf %8, %9 : vector<1x64x128xf32>
    %cst_7 = arith.constant 0.000000e+00 : bf16
    %11 = vector.broadcast %cst_7 : bf16 to vector<1x1x10x128xbf16>
    %c0_8 = arith.constant 0 : index
    %c0_9 = arith.constant 0 : index
    %c0_10 = arith.constant 0 : index
    %c0_11 = arith.constant 0 : index
    %12 = vector.load %arg11[%c0_8, %c0_9, %c0_10, %c0_11] : memref<1x10x10x128xbf16, #tpu.memory_space<vmem>>, vector<1x1x10x128xbf16>
    tpu.vector_store %arg11[%c0_8, %c0_9, %c0_10, %c0_11], %11 {strides = array<i32>} : memref<1x10x10x128xbf16, #tpu.memory_space<vmem>>, vector<1x1x10x128xbf16>,
    %cst_12 = arith.constant 0.000000e+00 : bf16
    %13 = vector.broadcast %cst_12 : bf16 to vector<1x1x10x128xbf16>
    %c0_13 = arith.constant 0 : index
    %c9 = arith.constant 9 : index
    %c0_14 = arith.constant 0 : index
    %c0_15 = arith.constant 0 : index
    %14 = vector.load %arg11[%c0_13, %c9, %c0_14, %c0_15] : memref<1x10x10x128xbf16, #tpu.memory_space<vmem>>, vector<1x1x10x128xbf16>
    tpu.vector_store %arg11[%c0_13, %c9, %c0_14, %c0_15], %13 {strides = array<i32>} : memref<1x10x10x128xbf16, #tpu.memory_space<vmem>>, vector<1x1x10x128xbf16>,
    %cst_16 = arith.constant 0.000000e+00 : bf16
    %15 = vector.broadcast %cst_16 : bf16 to vector<1x10x1x128xbf16>
    %c0_17 = arith.constant 0 : index
    %c0_18 = arith.constant 0 : index
    %c0_19 = arith.constant 0 : index
    %c0_20 = arith.constant 0 : index
    %16 = vector.load %arg11[%c0_17, %c0_18, %c0_19, %c0_20] : memref<1x10x10x128xbf16, #tpu.memory_space<vmem>>, vector<1x10x1x128xbf16>
    tpu.vector_store %arg11[%c0_17, %c0_18, %c0_19, %c0_20], %15 {strides = array<i32>} : memref<1x10x10x128xbf16, #tpu.memory_space<vmem>>, vector<1x10x1x128xbf16>,
    %cst_21 = arith.constant 0.000000e+00 : bf16
    %17 = vector.broadcast %cst_21 : bf16 to vector<1x10x1x128xbf16>
    %c0_22 = arith.constant 0 : index
    %c0_23 = arith.constant 0 : index
    %c9_24 = arith.constant 9 : index
    %c0_25 = arith.constant 0 : index
    %18 = vector.load %arg11[%c0_22, %c0_23, %c9_24, %c0_25] : memref<1x10x10x128xbf16, #tpu.memory_space<vmem>>, vector<1x10x1x128xbf16>
    tpu.vector_store %arg11[%c0_22, %c0_23, %c9_24, %c0_25], %17 {strides = array<i32>} : memref<1x10x10x128xbf16, #tpu.memory_space<vmem>>, vector<1x10x1x128xbf16>,
    %19 = vector.shape_cast %10 : vector<1x64x128xf32> to vector<1x8x8x128xf32>
    %20 = arith.truncf %19 : vector<1x8x8x128xf32> to vector<1x8x8x128xbf16>
    %c0_26 = arith.constant 0 : index
    %c1 = arith.constant 1 : index
    %c1_27 = arith.constant 1 : index
    %c0_28 = arith.constant 0 : index
    %21 = vector.load %arg11[%c0_26, %c1, %c1_27, %c0_28] : memref<1x10x10x128xbf16, #tpu.memory_space<vmem>>, vector<1x8x8x128xbf16>
    tpu.vector_store %arg11[%c0_26, %c1, %c1_27, %c0_28], %20 {strides = array<i32>} : memref<1x10x10x128xbf16, #tpu.memory_space<vmem>>, vector<1x8x8x128xbf16>,
    %c0_29 = arith.constant 0 : index
    %c0_30 = arith.constant 0 : index
    %c0_31 = arith.constant 0 : index
    %c0_32 = arith.constant 0 : index
    %22 = vector.load %arg11[%c0_29, %c0_30, %c0_31, %c0_32] : memref<1x10x10x128xbf16, #tpu.memory_space<vmem>>, vector<1x8x8x128xbf16>
    %23 = vector.shape_cast %22 : vector<1x8x8x128xbf16> to vector<1x64x128xbf16>
    %c0_33 = arith.constant 0 : index
    %c0_34 = arith.constant 0 : index
    %c0_35 = arith.constant 0 : index
    %24 = vector.load %arg4[%c0_33, %c0_34, %c0_35] : memref<9x128x128xbf16, #tpu.memory_space<vmem>>, vector<1x128x128xbf16>
    %25 = vector.shape_cast %24 : vector<1x128x128xbf16> to vector<128x128xbf16>
    %26 = vector.shape_cast %23 : vector<1x64x128xbf16> to vector<64x128xbf16>
    %cst_36 = arith.constant dense<0.000000e+00> : vector<64x128xf32>
    %27 = tpu.matmul %26, %25, %cst_36 {dimension_numbers = #tpu.dot_dimension_numbers<[1], [0], [0], [1], [0, 0, 1, 1], [], []>} : vector<64x128xbf16>, vector<128x128xbf16>, vector<64x128xf32> -> vector<64x128xf32>
    %28 = vector.shape_cast %27 : vector<64x128xf32> to vector<1x64x128xf32>
    %c0_37 = arith.constant 0 : index
    %c0_38 = arith.constant 0 : index
    %c1_39 = arith.constant 1 : index
    %c0_40 = arith.constant 0 : index
    %29 = vector.load %arg11[%c0_37, %c0_38, %c1_39, %c0_40] : memref<1x10x10x128xbf16, #tpu.memory_space<vmem>>, vector<1x8x8x128xbf16>
    %30 = vector.shape_cast %29 : vector<1x8x8x128xbf16> to vector<1x64x128xbf16>
    %c1_41 = arith.constant 1 : index
    %c0_42 = arith.constant 0 : index
    %c0_43 = arith.constant 0 : index
    %31 = vector.load %arg4[%c1_41, %c0_42, %c0_43] : memref<9x128x128xbf16, #tpu.memory_space<vmem>>, vector<1x128x128xbf16>
    %32 = vector.shape_cast %31 : vector<1x128x128xbf16> to vector<128x128xbf16>
    %33 = vector.shape_cast %30 : vector<1x64x128xbf16> to vector<64x128xbf16>
    %cst_44 = arith.constant dense<0.000000e+00> : vector<64x128xf32>
    %34 = tpu.matmul %33, %32, %cst_44 {dimension_numbers = #tpu.dot_dimension_numbers<[1], [0], [0], [1], [0, 0, 1, 1], [], []>} : vector<64x128xbf16>, vector<128x128xbf16>, vector<64x128xf32> -> vector<64x128xf32>
    %35 = vector.shape_cast %34 : vector<64x128xf32> to vector<1x64x128xf32>
    %36 = arith.addf %28, %35 : vector<1x64x128xf32>
    %c0_45 = arith.constant 0 : index
    %c0_46 = arith.constant 0 : index
    %c2 = arith.constant 2 : index
    %c0_47 = arith.constant 0 : index
    %37 = vector.load %arg11[%c0_45, %c0_46, %c2, %c0_47] : memref<1x10x10x128xbf16, #tpu.memory_space<vmem>>, vector<1x8x8x128xbf16>
    %38 = vector.shape_cast %37 : vector<1x8x8x128xbf16> to vector<1x64x128xbf16>
    %c2_48 = arith.constant 2 : index
    %c0_49 = arith.constant 0 : index
    %c0_50 = arith.constant 0 : index
    %39 = vector.load %arg4[%c2_48, %c0_49, %c0_50] : memref<9x128x128xbf16, #tpu.memory_space<vmem>>, vector<1x128x128xbf16>
    %40 = vector.shape_cast %39 : vector<1x128x128xbf16> to vector<128x128xbf16>
    %41 = vector.shape_cast %38 : vector<1x64x128xbf16> to vector<64x128xbf16>
    %cst_51 = arith.constant dense<0.000000e+00> : vector<64x128xf32>
    %42 = tpu.matmul %41, %40, %cst_51 {dimension_numbers = #tpu.dot_dimension_numbers<[1], [0], [0], [1], [0, 0, 1, 1], [], []>} : vector<64x128xbf16>, vector<128x128xbf16>, vector<64x128xf32> -> vector<64x128xf32>
    %43 = vector.shape_cast %42 : vector<64x128xf32> to vector<1x64x128xf32>
    %44 = arith.addf %36, %43 : vector<1x64x128xf32>
    %c0_52 = arith.constant 0 : index
    %c1_53 = arith.constant 1 : index
    %c0_54 = arith.constant 0 : index
    %c0_55 = arith.constant 0 : index
    %45 = vector.load %arg11[%c0_52, %c1_53, %c0_54, %c0_55] : memref<1x10x10x128xbf16, #tpu.memory_space<vmem>>, vector<1x8x8x128xbf16>
    %46 = vector.shape_cast %45 : vector<1x8x8x128xbf16> to vector<1x64x128xbf16>
    %c3 = arith.constant 3 : index
    %c0_56 = arith.constant 0 : index
    %c0_57 = arith.constant 0 : index
    %47 = vector.load %arg4[%c3, %c0_56, %c0_57] : memref<9x128x128xbf16, #tpu.memory_space<vmem>>, vector<1x128x128xbf16>
    %48 = vector.shape_cast %47 : vector<1x128x128xbf16> to vector<128x128xbf16>
    %49 = vector.shape_cast %46 : vector<1x64x128xbf16> to vector<64x128xbf16>
    %cst_58 = arith.constant dense<0.000000e+00> : vector<64x128xf32>
    %50 = tpu.matmul %49, %48, %cst_58 {dimension_numbers = #tpu.dot_dimension_numbers<[1], [0], [0], [1], [0, 0, 1, 1], [], []>} : vector<64x128xbf16>, vector<128x128xbf16>, vector<64x128xf32> -> vector<64x128xf32>
    %51 = vector.shape_cast %50 : vector<64x128xf32> to vector<1x64x128xf32>
    %52 = arith.addf %44, %51 : vector<1x64x128xf32>
    %c0_59 = arith.constant 0 : index
    %c1_60 = arith.constant 1 : index
    %c1_61 = arith.constant 1 : index
    %c0_62 = arith.constant 0 : index
    %53 = vector.load %arg11[%c0_59, %c1_60, %c1_61, %c0_62] : memref<1x10x10x128xbf16, #tpu.memory_space<vmem>>, vector<1x8x8x128xbf16>
    %54 = vector.shape_cast %53 : vector<1x8x8x128xbf16> to vector<1x64x128xbf16>
    %c4 = arith.constant 4 : index
    %c0_63 = arith.constant 0 : index
    %c0_64 = arith.constant 0 : index
    %55 = vector.load %arg4[%c4, %c0_63, %c0_64] : memref<9x128x128xbf16, #tpu.memory_space<vmem>>, vector<1x128x128xbf16>
    %56 = vector.shape_cast %55 : vector<1x128x128xbf16> to vector<128x128xbf16>
    %57 = vector.shape_cast %54 : vector<1x64x128xbf16> to vector<64x128xbf16>
    %cst_65 = arith.constant dense<0.000000e+00> : vector<64x128xf32>
    %58 = tpu.matmul %57, %56, %cst_65 {dimension_numbers = #tpu.dot_dimension_numbers<[1], [0], [0], [1], [0, 0, 1, 1], [], []>} : vector<64x128xbf16>, vector<128x128xbf16>, vector<64x128xf32> -> vector<64x128xf32>
    %59 = vector.shape_cast %58 : vector<64x128xf32> to vector<1x64x128xf32>
    %60 = arith.addf %52, %59 : vector<1x64x128xf32>
    %c0_66 = arith.constant 0 : index
    %c1_67 = arith.constant 1 : index
    %c2_68 = arith.constant 2 : index
    %c0_69 = arith.constant 0 : index
    %61 = vector.load %arg11[%c0_66, %c1_67, %c2_68, %c0_69] : memref<1x10x10x128xbf16, #tpu.memory_space<vmem>>, vector<1x8x8x128xbf16>
    %62 = vector.shape_cast %61 : vector<1x8x8x128xbf16> to vector<1x64x128xbf16>
    %c5 = arith.constant 5 : index
    %c0_70 = arith.constant 0 : index
    %c0_71 = arith.constant 0 : index
    %63 = vector.load %arg4[%c5, %c0_70, %c0_71] : memref<9x128x128xbf16, #tpu.memory_space<vmem>>, vector<1x128x128xbf16>
    %64 = vector.shape_cast %63 : vector<1x128x128xbf16> to vector<128x128xbf16>
    %65 = vector.shape_cast %62 : vector<1x64x128xbf16> to vector<64x128xbf16>
    %cst_72 = arith.constant dense<0.000000e+00> : vector<64x128xf32>
    %66 = tpu.matmul %65, %64, %cst_72 {dimension_numbers = #tpu.dot_dimension_numbers<[1], [0], [0], [1], [0, 0, 1, 1], [], []>} : vector<64x128xbf16>, vector<128x128xbf16>, vector<64x128xf32> -> vector<64x128xf32>
    %67 = vector.shape_cast %66 : vector<64x128xf32> to vector<1x64x128xf32>
    %68 = arith.addf %60, %67 : vector<1x64x128xf32>
    %c0_73 = arith.constant 0 : index
    %c2_74 = arith.constant 2 : index
    %c0_75 = arith.constant 0 : index
    %c0_76 = arith.constant 0 : index
    %69 = vector.load %arg11[%c0_73, %c2_74, %c0_75, %c0_76] : memref<1x10x10x128xbf16, #tpu.memory_space<vmem>>, vector<1x8x8x128xbf16>
    %70 = vector.shape_cast %69 : vector<1x8x8x128xbf16> to vector<1x64x128xbf16>
    %c6 = arith.constant 6 : index
    %c0_77 = arith.constant 0 : index
    %c0_78 = arith.constant 0 : index
    %71 = vector.load %arg4[%c6, %c0_77, %c0_78] : memref<9x128x128xbf16, #tpu.memory_space<vmem>>, vector<1x128x128xbf16>
    %72 = vector.shape_cast %71 : vector<1x128x128xbf16> to vector<128x128xbf16>
    %73 = vector.shape_cast %70 : vector<1x64x128xbf16> to vector<64x128xbf16>
    %cst_79 = arith.constant dense<0.000000e+00> : vector<64x128xf32>
    %74 = tpu.matmul %73, %72, %cst_79 {dimension_numbers = #tpu.dot_dimension_numbers<[1], [0], [0], [1], [0, 0, 1, 1], [], []>} : vector<64x128xbf16>, vector<128x128xbf16>, vector<64x128xf32> -> vector<64x128xf32>
    %75 = vector.shape_cast %74 : vector<64x128xf32> to vector<1x64x128xf32>
    %76 = arith.addf %68, %75 : vector<1x64x128xf32>
    %c0_80 = arith.constant 0 : index
    %c2_81 = arith.constant 2 : index
    %c1_82 = arith.constant 1 : index
    %c0_83 = arith.constant 0 : index
    %77 = vector.load %arg11[%c0_80, %c2_81, %c1_82, %c0_83] : memref<1x10x10x128xbf16, #tpu.memory_space<vmem>>, vector<1x8x8x128xbf16>
    %78 = vector.shape_cast %77 : vector<1x8x8x128xbf16> to vector<1x64x128xbf16>
    %c7 = arith.constant 7 : index
    %c0_84 = arith.constant 0 : index
    %c0_85 = arith.constant 0 : index
    %79 = vector.load %arg4[%c7, %c0_84, %c0_85] : memref<9x128x128xbf16, #tpu.memory_space<vmem>>, vector<1x128x128xbf16>
    %80 = vector.shape_cast %79 : vector<1x128x128xbf16> to vector<128x128xbf16>
    %81 = vector.shape_cast %78 : vector<1x64x128xbf16> to vector<64x128xbf16>
    %cst_86 = arith.constant dense<0.000000e+00> : vector<64x128xf32>
    %82 = tpu.matmul %81, %80, %cst_86 {dimension_numbers = #tpu.dot_dimension_numbers<[1], [0], [0], [1], [0, 0, 1, 1], [], []>} : vector<64x128xbf16>, vector<128x128xbf16>, vector<64x128xf32> -> vector<64x128xf32>
    %83 = vector.shape_cast %82 : vector<64x128xf32> to vector<1x64x128xf32>
    %84 = arith.addf %76, %83 : vector<1x64x128xf32>
    %c0_87 = arith.constant 0 : index
    %c2_88 = arith.constant 2 : index
    %c2_89 = arith.constant 2 : index
    %c0_90 = arith.constant 0 : index
    %85 = vector.load %arg11[%c0_87, %c2_88, %c2_89, %c0_90] : memref<1x10x10x128xbf16, #tpu.memory_space<vmem>>, vector<1x8x8x128xbf16>
    %86 = vector.shape_cast %85 : vector<1x8x8x128xbf16> to vector<1x64x128xbf16>
    %c8 = arith.constant 8 : index
    %c0_91 = arith.constant 0 : index
    %c0_92 = arith.constant 0 : index
    %87 = vector.load %arg4[%c8, %c0_91, %c0_92] : memref<9x128x128xbf16, #tpu.memory_space<vmem>>, vector<1x128x128xbf16>
    %88 = vector.shape_cast %87 : vector<1x128x128xbf16> to vector<128x128xbf16>
    %89 = vector.shape_cast %86 : vector<1x64x128xbf16> to vector<64x128xbf16>
    %cst_93 = arith.constant dense<0.000000e+00> : vector<64x128xf32>
    %90 = tpu.matmul %89, %88, %cst_93 {dimension_numbers = #tpu.dot_dimension_numbers<[1], [0], [0], [1], [0, 0, 1, 1], [], []>} : vector<64x128xbf16>, vector<128x128xbf16>, vector<64x128xf32> -> vector<64x128xf32>
    %91 = vector.shape_cast %90 : vector<64x128xf32> to vector<1x64x128xf32>
    %92 = arith.addf %84, %91 : vector<1x64x128xf32>
    %c0_94 = arith.constant 0 : index
    %c0_95 = arith.constant 0 : index
    %93 = vector.load %arg5[%c0_94, %c0_95] : memref<1x128xf32, #tpu.memory_space<vmem>>, vector<1x128xf32>
    %94 = vector.shape_cast %93 : vector<1x128xf32> to vector<1x1x128xf32>
    %95 = vector.broadcast %94 : vector<1x1x128xf32> to vector<1x64x128xf32>
    %96 = arith.addf %92, %95 : vector<1x64x128xf32>
    %cst_96 = arith.constant 0.000000e+00 : f32
    %97 = vector.broadcast %cst_96 : f32 to vector<1x64x128xf32>
    %98 = arith.maximumf %96, %97 : vector<1x64x128xf32>
    %c0_97 = arith.constant 0 : index
    %c0_98 = arith.constant 0 : index
    %99 = vector.load %arg6[%c0_97, %c0_98] : memref<128x128xbf16, #tpu.memory_space<vmem>>, vector<128x128xbf16>
    %100 = vector.shape_cast %98 : vector<1x64x128xf32> to vector<64x128xf32>
    %101 = arith.truncf %100 : vector<64x128xf32> to vector<64x128xbf16>
    %cst_99 = arith.constant dense<0.000000e+00> : vector<64x128xf32>
    %102 = tpu.matmul %101, %99, %cst_99 {dimension_numbers = #tpu.dot_dimension_numbers<[1], [0], [0], [1], [0, 0, 1, 1], [], []>} : vector<64x128xbf16>, vector<128x128xbf16>, vector<64x128xf32> -> vector<64x128xf32>
    %103 = vector.shape_cast %102 : vector<64x128xf32> to vector<1x64x128xf32>
    %c0_100 = arith.constant 0 : index
    %c0_101 = arith.constant 0 : index
    %104 = vector.load %arg7[%c0_100, %c0_101] : memref<1x128xf32, #tpu.memory_space<vmem>>, vector<1x128xf32>
    %105 = vector.shape_cast %104 : vector<1x128xf32> to vector<1x1x128xf32>
    %106 = vector.broadcast %105 : vector<1x1x128xf32> to vector<1x64x128xf32>
    %107 = arith.addf %103, %106 : vector<1x64x128xf32>
    %cst_102 = arith.constant dense<0.000000e+00> : vector<1x128xf32>
    %108 = vector.multi_reduction <add>, %107, %cst_102 [1] : vector<1x64x128xf32> to vector<1x128xf32>
    %cst_103 = arith.constant 6.400000e+01 : f32
    %109 = vector.broadcast %cst_103 : f32 to vector<1x128xf32>
    %110 = arith.divf %108, %109 : vector<1x128xf32>
    %111 = arith.truncf %110 : vector<1x128xf32> to vector<1x128xbf16>
    %c0_104 = arith.constant 0 : index
    %c0_105 = arith.constant 0 : index
    %112 = vector.load %arg8[%c0_104, %c0_105] : memref<128x128xbf16, #tpu.memory_space<vmem>>, vector<128x128xbf16>
    %cst_106 = arith.constant dense<0.000000e+00> : vector<1x128xf32>
    %113 = tpu.matmul %111, %112, %cst_106 {dimension_numbers = #tpu.dot_dimension_numbers<[1], [0], [0], [1], [0, 0, 1, 1], [], []>} : vector<1x128xbf16>, vector<128x128xbf16>, vector<1x128xf32> -> vector<1x128xf32>
    %cst_107 = arith.constant 0.000000e+00 : f32
    %114 = vector.broadcast %cst_107 : f32 to vector<1x128xf32>
    %115 = arith.maximumf %113, %114 : vector<1x128xf32>
    %116 = arith.truncf %115 : vector<1x128xf32> to vector<1x128xbf16>
    %c0_108 = arith.constant 0 : index
    %c0_109 = arith.constant 0 : index
    %117 = vector.load %arg9[%c0_108, %c0_109] : memref<128x128xbf16, #tpu.memory_space<vmem>>, vector<128x128xbf16>
    %cst_110 = arith.constant dense<0.000000e+00> : vector<1x128xf32>
    %118 = tpu.matmul %116, %117, %cst_110 {dimension_numbers = #tpu.dot_dimension_numbers<[1], [0], [0], [1], [0, 0, 1, 1], [], []>} : vector<1x128xbf16>, vector<128x128xbf16>, vector<1x128xf32> -> vector<1x128xf32>
    %119 = arith.negf %118 : vector<1x128xf32>
    %120 = math.exp %119 : vector<1x128xf32>
    %cst_111 = arith.constant 1.000000e+00 : f32
    %121 = vector.broadcast %cst_111 : f32 to vector<1x128xf32>
    %122 = arith.addf %121, %120 : vector<1x128xf32>
    %123 = arith.divf %121, %122 : vector<1x128xf32>
    %124 = vector.shape_cast %123 : vector<1x128xf32> to vector<1x1x128xf32>
    %125 = vector.broadcast %124 : vector<1x1x128xf32> to vector<1x64x128xf32>
    %126 = arith.mulf %107, %125 : vector<1x64x128xf32>
    %127 = arith.extf %0 : vector<1x64x128xbf16> to vector<1x64x128xf32>
    %128 = arith.addf %126, %127 : vector<1x64x128xf32>
    %cst_112 = arith.constant 0.000000e+00 : f32
    %129 = vector.broadcast %cst_112 : f32 to vector<1x64x128xf32>
    %130 = arith.maximumf %128, %129 : vector<1x64x128xf32>
    %131 = arith.truncf %130 : vector<1x64x128xf32> to vector<1x64x128xbf16>
    %c0_113 = arith.constant 0 : index
    %c0_114 = arith.constant 0 : index
    %c0_115 = arith.constant 0 : index
    %132 = vector.load %arg10[%c0_113, %c0_114, %c0_115] : memref<1x64x128xbf16, #tpu.memory_space<vmem>>, vector<1x64x128xbf16>
    tpu.vector_store %arg10[%c0_113, %c0_114, %c0_115], %131 {strides = array<i32>} : memref<1x64x128xbf16, #tpu.memory_space<vmem>>, vector<1x64x128xbf16>,
    return
  }
  func.func @transform_0(%arg0: i32) -> (i32, i32, i32) {
    %c0_i32 = arith.constant 0 : i32
    %c0_i32_0 = arith.constant 0 : i32
    %c0_i32_1 = arith.constant 0 : i32
    return %arg0, %c0_i32, %c0_i32_0 : i32, i32, i32
  }
  func.func @transform_1(%arg0: i32) -> (i32, i32) {
    %c0_i32 = arith.constant 0 : i32
    %c0_i32_0 = arith.constant 0 : i32
    %c0_i32_1 = arith.constant 0 : i32
    return %c0_i32, %c0_i32_0 : i32, i32
  }
  func.func @transform_2(%arg0: i32) -> (i32, i32) {
    %c0_i32 = arith.constant 0 : i32
    %c0_i32_0 = arith.constant 0 : i32
    %c0_i32_1 = arith.constant 0 : i32
    return %c0_i32, %c0_i32_0 : i32, i32
  }
  func.func @transform_3(%arg0: i32) -> (i32, i32, i32) {
    %c0_i32 = arith.constant 0 : i32
    %c0_i32_0 = arith.constant 0 : i32
    %c0_i32_1 = arith.constant 0 : i32
    %c0_i32_2 = arith.constant 0 : i32
    return %c0_i32, %c0_i32_0, %c0_i32_1 : i32, i32, i32
  }
  func.func @transform_4(%arg0: i32) -> (i32, i32) {
    %c0_i32 = arith.constant 0 : i32
    %c0_i32_0 = arith.constant 0 : i32
    %c0_i32_1 = arith.constant 0 : i32
    return %c0_i32, %c0_i32_0 : i32, i32
  }
  func.func @transform_5(%arg0: i32) -> (i32, i32) {
    %c0_i32 = arith.constant 0 : i32
    %c0_i32_0 = arith.constant 0 : i32
    %c0_i32_1 = arith.constant 0 : i32
    return %c0_i32, %c0_i32_0 : i32, i32
  }
  func.func @transform_6(%arg0: i32) -> (i32, i32) {
    %c0_i32 = arith.constant 0 : i32
    %c0_i32_0 = arith.constant 0 : i32
    %c0_i32_1 = arith.constant 0 : i32
    return %c0_i32, %c0_i32_0 : i32, i32
  }
  func.func @transform_7(%arg0: i32) -> (i32, i32) {
    %c0_i32 = arith.constant 0 : i32
    %c0_i32_0 = arith.constant 0 : i32
    %c0_i32_1 = arith.constant 0 : i32
    return %c0_i32, %c0_i32_0 : i32, i32
  }
  func.func @transform_8(%arg0: i32) -> (i32, i32) {
    %c0_i32 = arith.constant 0 : i32
    %c0_i32_0 = arith.constant 0 : i32
    %c0_i32_1 = arith.constant 0 : i32
    return %c0_i32, %c0_i32_0 : i32, i32
  }
  func.func @transform_9(%arg0: i32) -> (i32, i32, i32) {
    %c0_i32 = arith.constant 0 : i32
    %c0_i32_0 = arith.constant 0 : i32
    %c0_i32_1 = arith.constant 0 : i32
    return %arg0, %c0_i32, %c0_i32_0 : i32, i32, i32
  }
}

module attributes {stable_mosaic.version = 11 : i64} {
  func.func @_se_bottleneck_kernel(%arg0: i32, %arg1: memref<1x64x128xbf16, #tpu.memory_space<vmem>>, %arg2: memref<128x128xbf16, #tpu.memory_space<vmem>>, %arg3: memref<1x128xf32, #tpu.memory_space<vmem>>, %arg4: memref<9x128x128xbf16, #tpu.memory_space<vmem>>, %arg5: memref<1x128xf32, #tpu.memory_space<vmem>>, %arg6: memref<128x128xbf16, #tpu.memory_space<vmem>>, %arg7: memref<1x128xf32, #tpu.memory_space<vmem>>, %arg8: memref<128x128xbf16, #tpu.memory_space<vmem>>, %arg9: memref<128x128xbf16, #tpu.memory_space<vmem>>, %arg10: memref<1x64x128xbf16, #tpu.memory_space<vmem>>, %arg11: memref<1x10x10x128xbf16, #tpu.memory_space<vmem>>) attributes {dimension_semantics = [#tpu.dimension_semantics<parallel>], iteration_bounds = array<i64: 2>, scalar_prefetch = 0 : i64, scratch_operands = 1 : i64, tpu.core_type = #tpu.core_type<tc>, window_params = [{transform_indices = @transform_0, window_bounds = array<i64: 1, 64, 128>}, {pipeline_mode = #tpu.pipeline_mode<synchronous>, transform_indices = @transform_1, window_bounds = array<i64: 128, 128>}, {pipeline_mode = #tpu.pipeline_mode<synchronous>, transform_indices = @transform_2, window_bounds = array<i64: 1, 128>}, {pipeline_mode = #tpu.pipeline_mode<synchronous>, transform_indices = @transform_3, window_bounds = array<i64: 9, 128, 128>}, {pipeline_mode = #tpu.pipeline_mode<synchronous>, transform_indices = @transform_4, window_bounds = array<i64: 1, 128>}, {pipeline_mode = #tpu.pipeline_mode<synchronous>, transform_indices = @transform_5, window_bounds = array<i64: 128, 128>}, {pipeline_mode = #tpu.pipeline_mode<synchronous>, transform_indices = @transform_6, window_bounds = array<i64: 1, 128>}, {pipeline_mode = #tpu.pipeline_mode<synchronous>, transform_indices = @transform_7, window_bounds = array<i64: 128, 128>}, {pipeline_mode = #tpu.pipeline_mode<synchronous>, transform_indices = @transform_8, window_bounds = array<i64: 128, 128>}, {transform_indices = @transform_9, window_bounds = array<i64: 1, 64, 128>}]} {
    %c0 = arith.constant 0 : index
    %c0_0 = arith.constant 0 : index
    %c0_1 = arith.constant 0 : index
    %0 = vector.load %arg1[%c0, %c0_0, %c0_1] : memref<1x64x128xbf16, #tpu.memory_space<vmem>>, vector<1x64x128xbf16>
    %c0_2 = arith.constant 0 : index
    %c0_3 = arith.constant 0 : index
    %1 = vector.load %arg2[%c0_2, %c0_3] : memref<128x128xbf16, #tpu.memory_space<vmem>>, vector<128x128xbf16>
    %2 = vector.shape_cast %0 : vector<1x64x128xbf16> to vector<64x128xbf16>
    %cst = arith.constant dense<0.000000e+00> : vector<64x128xf32>
    %3 = tpu.matmul %2, %1, %cst {dimension_numbers = #tpu.dot_dimension_numbers<[1], [0], [0], [1], [0, 0, 1, 1], [], []>} : vector<64x128xbf16>, vector<128x128xbf16>, vector<64x128xf32> -> vector<64x128xf32>
    %4 = vector.shape_cast %3 : vector<64x128xf32> to vector<1x64x128xf32>
    %c0_4 = arith.constant 0 : index
    %c0_5 = arith.constant 0 : index
    %5 = vector.load %arg3[%c0_4, %c0_5] : memref<1x128xf32, #tpu.memory_space<vmem>>, vector<1x128xf32>
    %6 = vector.shape_cast %5 : vector<1x128xf32> to vector<1x1x128xf32>
    %7 = vector.broadcast %6 : vector<1x1x128xf32> to vector<1x64x128xf32>
    %8 = arith.addf %4, %7 : vector<1x64x128xf32>
    %cst_6 = arith.constant 0.000000e+00 : f32
    %9 = vector.broadcast %cst_6 : f32 to vector<1x64x128xf32>
    %10 = arith.maximumf %8, %9 : vector<1x64x128xf32>
    %cst_7 = arith.constant 0.000000e+00 : bf16
    %11 = vector.broadcast %cst_7 : bf16 to vector<1x1x10x128xbf16>
    %c0_8 = arith.constant 0 : index
    %c0_9 = arith.constant 0 : index
    %c0_10 = arith.constant 0 : index
    %c0_11 = arith.constant 0 : index
    %12 = vector.load %arg11[%c0_8, %c0_9, %c0_10, %c0_11] : memref<1x10x10x128xbf16, #tpu.memory_space<vmem>>, vector<1x1x10x128xbf16>
    tpu.vector_store %arg11[%c0_8, %c0_9, %c0_10, %c0_11], %11 {strides = array<i32>} : memref<1x10x10x128xbf16, #tpu.memory_space<vmem>>, vector<1x1x10x128xbf16>,
    %cst_12 = arith.constant 0.000000e+00 : bf16
    %13 = vector.broadcast %cst_12 : bf16 to vector<1x1x10x128xbf16>
    %c0_13 = arith.constant 0 : index
    %c9 = arith.constant 9 : index
    %c0_14 = arith.constant 0 : index
    %c0_15 = arith.constant 0 : index
    %14 = vector.load %arg11[%c0_13, %c9, %c0_14, %c0_15] : memref<1x10x10x128xbf16, #tpu.memory_space<vmem>>, vector<1x1x10x128xbf16>
    tpu.vector_store %arg11[%c0_13, %c9, %c0_14, %c0_15], %13 {strides = array<i32>} : memref<1x10x10x128xbf16, #tpu.memory_space<vmem>>, vector<1x1x10x128xbf16>,
    %cst_16 = arith.constant 0.000000e+00 : bf16
    %15 = vector.broadcast %cst_16 : bf16 to vector<1x10x1x128xbf16>
    %c0_17 = arith.constant 0 : index
    %c0_18 = arith.constant 0 : index
    %c0_19 = arith.constant 0 : index
    %c0_20 = arith.constant 0 : index
    %16 = vector.load %arg11[%c0_17, %c0_18, %c0_19, %c0_20] : memref<1x10x10x128xbf16, #tpu.memory_space<vmem>>, vector<1x10x1x128xbf16>
    tpu.vector_store %arg11[%c0_17, %c0_18, %c0_19, %c0_20], %15 {strides = array<i32>} : memref<1x10x10x128xbf16, #tpu.memory_space<vmem>>, vector<1x10x1x128xbf16>,
    %cst_21 = arith.constant 0.000000e+00 : bf16
    %17 = vector.broadcast %cst_21 : bf16 to vector<1x10x1x128xbf16>
    %c0_22 = arith.constant 0 : index
    %c0_23 = arith.constant 0 : index
    %c9_24 = arith.constant 9 : index
    %c0_25 = arith.constant 0 : index
    %18 = vector.load %arg11[%c0_22, %c0_23, %c9_24, %c0_25] : memref<1x10x10x128xbf16, #tpu.memory_space<vmem>>, vector<1x10x1x128xbf16>
    tpu.vector_store %arg11[%c0_22, %c0_23, %c9_24, %c0_25], %17 {strides = array<i32>} : memref<1x10x10x128xbf16, #tpu.memory_space<vmem>>, vector<1x10x1x128xbf16>,
    %19 = vector.shape_cast %10 : vector<1x64x128xf32> to vector<1x8x8x128xf32>
    %20 = arith.truncf %19 : vector<1x8x8x128xf32> to vector<1x8x8x128xbf16>
    %c0_26 = arith.constant 0 : index
    %c1 = arith.constant 1 : index
    %c1_27 = arith.constant 1 : index
    %c0_28 = arith.constant 0 : index
    %21 = vector.load %arg11[%c0_26, %c1, %c1_27, %c0_28] : memref<1x10x10x128xbf16, #tpu.memory_space<vmem>>, vector<1x8x8x128xbf16>
    tpu.vector_store %arg11[%c0_26, %c1, %c1_27, %c0_28], %20 {strides = array<i32>} : memref<1x10x10x128xbf16, #tpu.memory_space<vmem>>, vector<1x8x8x128xbf16>,
    %c0_29 = arith.constant 0 : index
    %c0_30 = arith.constant 0 : index
    %c0_31 = arith.constant 0 : index
    %c0_32 = arith.constant 0 : index
    %22 = vector.load %arg11[%c0_29, %c0_30, %c0_31, %c0_32] : memref<1x10x10x128xbf16, #tpu.memory_space<vmem>>, vector<1x8x8x128xbf16>
    %23 = vector.shape_cast %22 : vector<1x8x8x128xbf16> to vector<1x64x128xbf16>
    %c0_33 = arith.constant 0 : index
    %c0_34 = arith.constant 0 : index
    %c0_35 = arith.constant 0 : index
    %24 = vector.load %arg4[%c0_33, %c0_34, %c0_35] : memref<9x128x128xbf16, #tpu.memory_space<vmem>>, vector<1x128x128xbf16>
    %25 = vector.shape_cast %24 : vector<1x128x128xbf16> to vector<128x128xbf16>
    %26 = vector.shape_cast %23 : vector<1x64x128xbf16> to vector<64x128xbf16>
    %cst_36 = arith.constant dense<0.000000e+00> : vector<64x128xf32>
    %27 = tpu.matmul %26, %25, %cst_36 {dimension_numbers = #tpu.dot_dimension_numbers<[1], [0], [0], [1], [0, 0, 1, 1], [], []>} : vector<64x128xbf16>, vector<128x128xbf16>, vector<64x128xf32> -> vector<64x128xf32>
    %28 = vector.shape_cast %27 : vector<64x128xf32> to vector<1x64x128xf32>
    %c0_37 = arith.constant 0 : index
    %c0_38 = arith.constant 0 : index
    %c1_39 = arith.constant 1 : index
    %c0_40 = arith.constant 0 : index
    %29 = vector.load %arg11[%c0_37, %c0_38, %c1_39, %c0_40] : memref<1x10x10x128xbf16, #tpu.memory_space<vmem>>, vector<1x8x8x128xbf16>
    %30 = vector.shape_cast %29 : vector<1x8x8x128xbf16> to vector<1x64x128xbf16>
    %c1_41 = arith.constant 1 : index
    %c0_42 = arith.constant 0 : index
    %c0_43 = arith.constant 0 : index
    %31 = vector.load %arg4[%c1_41, %c0_42, %c0_43] : memref<9x128x128xbf16, #tpu.memory_space<vmem>>, vector<1x128x128xbf16>
    %32 = vector.shape_cast %31 : vector<1x128x128xbf16> to vector<128x128xbf16>
    %33 = vector.shape_cast %30 : vector<1x64x128xbf16> to vector<64x128xbf16>
    %cst_44 = arith.constant dense<0.000000e+00> : vector<64x128xf32>
    %34 = tpu.matmul %33, %32, %cst_44 {dimension_numbers = #tpu.dot_dimension_numbers<[1], [0], [0], [1], [0, 0, 1, 1], [], []>} : vector<64x128xbf16>, vector<128x128xbf16>, vector<64x128xf32> -> vector<64x128xf32>
    %35 = vector.shape_cast %34 : vector<64x128xf32> to vector<1x64x128xf32>
    %36 = arith.addf %28, %35 : vector<1x64x128xf32>
    %c0_45 = arith.constant 0 : index
    %c0_46 = arith.constant 0 : index
    %c2 = arith.constant 2 : index
    %c0_47 = arith.constant 0 : index
    %37 = vector.load %arg11[%c0_45, %c0_46, %c2, %c0_47] : memref<1x10x10x128xbf16, #tpu.memory_space<vmem>>, vector<1x8x8x128xbf16>
    %38 = vector.shape_cast %37 : vector<1x8x8x128xbf16> to vector<1x64x128xbf16>
    %c2_48 = arith.constant 2 : index
    %c0_49 = arith.constant 0 : index
    %c0_50 = arith.constant 0 : index
    %39 = vector.load %arg4[%c2_48, %c0_49, %c0_50] : memref<9x128x128xbf16, #tpu.memory_space<vmem>>, vector<1x128x128xbf16>
    %40 = vector.shape_cast %39 : vector<1x128x128xbf16> to vector<128x128xbf16>
    %41 = vector.shape_cast %38 : vector<1x64x128xbf16> to vector<64x128xbf16>
    %cst_51 = arith.constant dense<0.000000e+00> : vector<64x128xf32>
    %42 = tpu.matmul %41, %40, %cst_51 {dimension_numbers = #tpu.dot_dimension_numbers<[1], [0], [0], [1], [0, 0, 1, 1], [], []>} : vector<64x128xbf16>, vector<128x128xbf16>, vector<64x128xf32> -> vector<64x128xf32>
    %43 = vector.shape_cast %42 : vector<64x128xf32> to vector<1x64x128xf32>
    %44 = arith.addf %36, %43 : vector<1x64x128xf32>
    %c0_52 = arith.constant 0 : index
    %c1_53 = arith.constant 1 : index
    %c0_54 = arith.constant 0 : index
    %c0_55 = arith.constant 0 : index
    %45 = vector.load %arg11[%c0_52, %c1_53, %c0_54, %c0_55] : memref<1x10x10x128xbf16, #tpu.memory_space<vmem>>, vector<1x8x8x128xbf16>
    %46 = vector.shape_cast %45 : vector<1x8x8x128xbf16> to vector<1x64x128xbf16>
    %c3 = arith.constant 3 : index
    %c0_56 = arith.constant 0 : index
    %c0_57 = arith.constant 0 : index
    %47 = vector.load %arg4[%c3, %c0_56, %c0_57] : memref<9x128x128xbf16, #tpu.memory_space<vmem>>, vector<1x128x128xbf16>
    %48 = vector.shape_cast %47 : vector<1x128x128xbf16> to vector<128x128xbf16>
    %49 = vector.shape_cast %46 : vector<1x64x128xbf16> to vector<64x128xbf16>
    %cst_58 = arith.constant dense<0.000000e+00> : vector<64x128xf32>
    %50 = tpu.matmul %49, %48, %cst_58 {dimension_numbers = #tpu.dot_dimension_numbers<[1], [0], [0], [1], [0, 0, 1, 1], [], []>} : vector<64x128xbf16>, vector<128x128xbf16>, vector<64x128xf32> -> vector<64x128xf32>
    %51 = vector.shape_cast %50 : vector<64x128xf32> to vector<1x64x128xf32>
    %52 = arith.addf %44, %51 : vector<1x64x128xf32>
    %c0_59 = arith.constant 0 : index
    %c1_60 = arith.constant 1 : index
    %c1_61 = arith.constant 1 : index
    %c0_62 = arith.constant 0 : index
    %53 = vector.load %arg11[%c0_59, %c1_60, %c1_61, %c0_62] : memref<1x10x10x128xbf16, #tpu.memory_space<vmem>>, vector<1x8x8x128xbf16>
    %54 = vector.shape_cast %53 : vector<1x8x8x128xbf16> to vector<1x64x128xbf16>
    %c4 = arith.constant 4 : index
    %c0_63 = arith.constant 0 : index
    %c0_64 = arith.constant 0 : index
    %55 = vector.load %arg4[%c4, %c0_63, %c0_64] : memref<9x128x128xbf16, #tpu.memory_space<vmem>>, vector<1x128x128xbf16>
    %56 = vector.shape_cast %55 : vector<1x128x128xbf16> to vector<128x128xbf16>
    %57 = vector.shape_cast %54 : vector<1x64x128xbf16> to vector<64x128xbf16>
    %cst_65 = arith.constant dense<0.000000e+00> : vector<64x128xf32>
    %58 = tpu.matmul %57, %56, %cst_65 {dimension_numbers = #tpu.dot_dimension_numbers<[1], [0], [0], [1], [0, 0, 1, 1], [], []>} : vector<64x128xbf16>, vector<128x128xbf16>, vector<64x128xf32> -> vector<64x128xf32>
    %59 = vector.shape_cast %58 : vector<64x128xf32> to vector<1x64x128xf32>
    %60 = arith.addf %52, %59 : vector<1x64x128xf32>
    %c0_66 = arith.constant 0 : index
    %c1_67 = arith.constant 1 : index
    %c2_68 = arith.constant 2 : index
    %c0_69 = arith.constant 0 : index
    %61 = vector.load %arg11[%c0_66, %c1_67, %c2_68, %c0_69] : memref<1x10x10x128xbf16, #tpu.memory_space<vmem>>, vector<1x8x8x128xbf16>
    %62 = vector.shape_cast %61 : vector<1x8x8x128xbf16> to vector<1x64x128xbf16>
    %c5 = arith.constant 5 : index
    %c0_70 = arith.constant 0 : index
    %c0_71 = arith.constant 0 : index
    %63 = vector.load %arg4[%c5, %c0_70, %c0_71] : memref<9x128x128xbf16, #tpu.memory_space<vmem>>, vector<1x128x128xbf16>
    %64 = vector.shape_cast %63 : vector<1x128x128xbf16> to vector<128x128xbf16>
    %65 = vector.shape_cast %62 : vector<1x64x128xbf16> to vector<64x128xbf16>
    %cst_72 = arith.constant dense<0.000000e+00> : vector<64x128xf32>
    %66 = tpu.matmul %65, %64, %cst_72 {dimension_numbers = #tpu.dot_dimension_numbers<[1], [0], [0], [1], [0, 0, 1, 1], [], []>} : vector<64x128xbf16>, vector<128x128xbf16>, vector<64x128xf32> -> vector<64x128xf32>
    %67 = vector.shape_cast %66 : vector<64x128xf32> to vector<1x64x128xf32>
    %68 = arith.addf %60, %67 : vector<1x64x128xf32>
    %c0_73 = arith.constant 0 : index
    %c2_74 = arith.constant 2 : index
    %c0_75 = arith.constant 0 : index
    %c0_76 = arith.constant 0 : index
    %69 = vector.load %arg11[%c0_73, %c2_74, %c0_75, %c0_76] : memref<1x10x10x128xbf16, #tpu.memory_space<vmem>>, vector<1x8x8x128xbf16>
    %70 = vector.shape_cast %69 : vector<1x8x8x128xbf16> to vector<1x64x128xbf16>
    %c6 = arith.constant 6 : index
    %c0_77 = arith.constant 0 : index
    %c0_78 = arith.constant 0 : index
    %71 = vector.load %arg4[%c6, %c0_77, %c0_78] : memref<9x128x128xbf16, #tpu.memory_space<vmem>>, vector<1x128x128xbf16>
    %72 = vector.shape_cast %71 : vector<1x128x128xbf16> to vector<128x128xbf16>
    %73 = vector.shape_cast %70 : vector<1x64x128xbf16> to vector<64x128xbf16>
    %cst_79 = arith.constant dense<0.000000e+00> : vector<64x128xf32>
    %74 = tpu.matmul %73, %72, %cst_79 {dimension_numbers = #tpu.dot_dimension_numbers<[1], [0], [0], [1], [0, 0, 1, 1], [], []>} : vector<64x128xbf16>, vector<128x128xbf16>, vector<64x128xf32> -> vector<64x128xf32>
    %75 = vector.shape_cast %74 : vector<64x128xf32> to vector<1x64x128xf32>
    %76 = arith.addf %68, %75 : vector<1x64x128xf32>
    %c0_80 = arith.constant 0 : index
    %c2_81 = arith.constant 2 : index
    %c1_82 = arith.constant 1 : index
    %c0_83 = arith.constant 0 : index
    %77 = vector.load %arg11[%c0_80, %c2_81, %c1_82, %c0_83] : memref<1x10x10x128xbf16, #tpu.memory_space<vmem>>, vector<1x8x8x128xbf16>
    %78 = vector.shape_cast %77 : vector<1x8x8x128xbf16> to vector<1x64x128xbf16>
    %c7 = arith.constant 7 : index
    %c0_84 = arith.constant 0 : index
    %c0_85 = arith.constant 0 : index
    %79 = vector.load %arg4[%c7, %c0_84, %c0_85] : memref<9x128x128xbf16, #tpu.memory_space<vmem>>, vector<1x128x128xbf16>
    %80 = vector.shape_cast %79 : vector<1x128x128xbf16> to vector<128x128xbf16>
    %81 = vector.shape_cast %78 : vector<1x64x128xbf16> to vector<64x128xbf16>
    %cst_86 = arith.constant dense<0.000000e+00> : vector<64x128xf32>
    %82 = tpu.matmul %81, %80, %cst_86 {dimension_numbers = #tpu.dot_dimension_numbers<[1], [0], [0], [1], [0, 0, 1, 1], [], []>} : vector<64x128xbf16>, vector<128x128xbf16>, vector<64x128xf32> -> vector<64x128xf32>
    %83 = vector.shape_cast %82 : vector<64x128xf32> to vector<1x64x128xf32>
    %84 = arith.addf %76, %83 : vector<1x64x128xf32>
    %c0_87 = arith.constant 0 : index
    %c2_88 = arith.constant 2 : index
    %c2_89 = arith.constant 2 : index
    %c0_90 = arith.constant 0 : index
    %85 = vector.load %arg11[%c0_87, %c2_88, %c2_89, %c0_90] : memref<1x10x10x128xbf16, #tpu.memory_space<vmem>>, vector<1x8x8x128xbf16>
    %86 = vector.shape_cast %85 : vector<1x8x8x128xbf16> to vector<1x64x128xbf16>
    %c8 = arith.constant 8 : index
    %c0_91 = arith.constant 0 : index
    %c0_92 = arith.constant 0 : index
    %87 = vector.load %arg4[%c8, %c0_91, %c0_92] : memref<9x128x128xbf16, #tpu.memory_space<vmem>>, vector<1x128x128xbf16>
    %88 = vector.shape_cast %87 : vector<1x128x128xbf16> to vector<128x128xbf16>
    %89 = vector.shape_cast %86 : vector<1x64x128xbf16> to vector<64x128xbf16>
    %cst_93 = arith.constant dense<0.000000e+00> : vector<64x128xf32>
    %90 = tpu.matmul %89, %88, %cst_93 {dimension_numbers = #tpu.dot_dimension_numbers<[1], [0], [0], [1], [0, 0, 1, 1], [], []>} : vector<64x128xbf16>, vector<128x128xbf16>, vector<64x128xf32> -> vector<64x128xf32>
    %91 = vector.shape_cast %90 : vector<64x128xf32> to vector<1x64x128xf32>
    %92 = arith.addf %84, %91 : vector<1x64x128xf32>
    %c0_94 = arith.constant 0 : index
    %c0_95 = arith.constant 0 : index
    %93 = vector.load %arg5[%c0_94, %c0_95] : memref<1x128xf32, #tpu.memory_space<vmem>>, vector<1x128xf32>
    %94 = vector.shape_cast %93 : vector<1x128xf32> to vector<1x1x128xf32>
    %95 = vector.broadcast %94 : vector<1x1x128xf32> to vector<1x64x128xf32>
    %96 = arith.addf %92, %95 : vector<1x64x128xf32>
    %cst_96 = arith.constant 0.000000e+00 : f32
    %97 = vector.broadcast %cst_96 : f32 to vector<1x64x128xf32>
    %98 = arith.maximumf %96, %97 : vector<1x64x128xf32>
    %c0_97 = arith.constant 0 : index
    %c0_98 = arith.constant 0 : index
    %99 = vector.load %arg6[%c0_97, %c0_98] : memref<128x128xbf16, #tpu.memory_space<vmem>>, vector<128x128xbf16>
    %100 = vector.shape_cast %98 : vector<1x64x128xf32> to vector<64x128xf32>
    %101 = arith.truncf %100 : vector<64x128xf32> to vector<64x128xbf16>
    %cst_99 = arith.constant dense<0.000000e+00> : vector<64x128xf32>
    %102 = tpu.matmul %101, %99, %cst_99 {dimension_numbers = #tpu.dot_dimension_numbers<[1], [0], [0], [1], [0, 0, 1, 1], [], []>} : vector<64x128xbf16>, vector<128x128xbf16>, vector<64x128xf32> -> vector<64x128xf32>
    %103 = vector.shape_cast %102 : vector<64x128xf32> to vector<1x64x128xf32>
    %c0_100 = arith.constant 0 : index
    %c0_101 = arith.constant 0 : index
    %104 = vector.load %arg7[%c0_100, %c0_101] : memref<1x128xf32, #tpu.memory_space<vmem>>, vector<1x128xf32>
    %105 = vector.shape_cast %104 : vector<1x128xf32> to vector<1x1x128xf32>
    %106 = vector.broadcast %105 : vector<1x1x128xf32> to vector<1x64x128xf32>
    %107 = arith.addf %103, %106 : vector<1x64x128xf32>
    %cst_102 = arith.constant dense<0.000000e+00> : vector<1x128xf32>
    %108 = vector.multi_reduction <add>, %107, %cst_102 [1] : vector<1x64x128xf32> to vector<1x128xf32>
    %cst_103 = arith.constant 6.400000e+01 : f32
    %109 = vector.broadcast %cst_103 : f32 to vector<1x128xf32>
    %110 = arith.divf %108, %109 : vector<1x128xf32>
    %111 = arith.truncf %110 : vector<1x128xf32> to vector<1x128xbf16>
    %c0_104 = arith.constant 0 : index
    %c0_105 = arith.constant 0 : index
    %112 = vector.load %arg8[%c0_104, %c0_105] : memref<128x128xbf16, #tpu.memory_space<vmem>>, vector<128x128xbf16>
    %cst_106 = arith.constant dense<0.000000e+00> : vector<1x128xf32>
    %113 = tpu.matmul %111, %112, %cst_106 {dimension_numbers = #tpu.dot_dimension_numbers<[1], [0], [0], [1], [0, 0, 1, 1], [], []>} : vector<1x128xbf16>, vector<128x128xbf16>, vector<1x128xf32> -> vector<1x128xf32>
    %cst_107 = arith.constant 0.000000e+00 : f32
    %114 = vector.broadcast %cst_107 : f32 to vector<1x128xf32>
    %115 = arith.maximumf %113, %114 : vector<1x128xf32>
    %116 = arith.truncf %115 : vector<1x128xf32> to vector<1x128xbf16>
    %c0_108 = arith.constant 0 : index
    %c0_109 = arith.constant 0 : index
    %117 = vector.load %arg9[%c0_108, %c0_109] : memref<128x128xbf16, #tpu.memory_space<vmem>>, vector<128x128xbf16>
    %cst_110 = arith.constant dense<0.000000e+00> : vector<1x128xf32>
    %118 = tpu.matmul %116, %117, %cst_110 {dimension_numbers = #tpu.dot_dimension_numbers<[1], [0], [0], [1], [0, 0, 1, 1], [], []>} : vector<1x128xbf16>, vector<128x128xbf16>, vector<1x128xf32> -> vector<1x128xf32>
    %119 = arith.negf %118 : vector<1x128xf32>
    %120 = math.exp %119 : vector<1x128xf32>
    %cst_111 = arith.constant 1.000000e+00 : f32
    %121 = vector.broadcast %cst_111 : f32 to vector<1x128xf32>
    %122 = arith.addf %121, %120 : vector<1x128xf32>
    %123 = arith.divf %121, %122 : vector<1x128xf32>
    %124 = vector.shape_cast %123 : vector<1x128xf32> to vector<1x1x128xf32>
    %125 = vector.broadcast %124 : vector<1x1x128xf32> to vector<1x64x128xf32>
    %126 = arith.mulf %107, %125 : vector<1x64x128xf32>
    %127 = arith.extf %0 : vector<1x64x128xbf16> to vector<1x64x128xf32>
    %128 = arith.addf %126, %127 : vector<1x64x128xf32>
    %cst_112 = arith.constant 0.000000e+00 : f32
    %129 = vector.broadcast %cst_112 : f32 to vector<1x64x128xf32>
    %130 = arith.maximumf %128, %129 : vector<1x64x128xf32>
    %131 = arith.truncf %130 : vector<1x64x128xf32> to vector<1x64x128xbf16>
    %c0_113 = arith.constant 0 : index
    %c0_114 = arith.constant 0 : index
    %c0_115 = arith.constant 0 : index
    %132 = vector.load %arg10[%c0_113, %c0_114, %c0_115] : memref<1x64x128xbf16, #tpu.memory_space<vmem>>, vector<1x64x128xbf16>
    tpu.vector_store %arg10[%c0_113, %c0_114, %c0_115], %131 {strides = array<i32>} : memref<1x64x128xbf16, #tpu.memory_space<vmem>>, vector<1x64x128xbf16>,
    return
  }
  func.func @transform_0(%arg0: i32) -> (i32, i32, i32) {
    %c0_i32 = arith.constant 0 : i32
    %c0_i32_0 = arith.constant 0 : i32
    %c0_i32_1 = arith.constant 0 : i32
    return %arg0, %c0_i32, %c0_i32_0 : i32, i32, i32
  }
  func.func @transform_1(%arg0: i32) -> (i32, i32) {
    %c0_i32 = arith.constant 0 : i32
    %c0_i32_0 = arith.constant 0 : i32
    %c0_i32_1 = arith.constant 0 : i32
    return %c0_i32, %c0_i32_0 : i32, i32
  }
  func.func @transform_2(%arg0: i32) -> (i32, i32) {
    %c0_i32 = arith.constant 0 : i32
    %c0_i32_0 = arith.constant 0 : i32
    %c0_i32_1 = arith.constant 0 : i32
    return %c0_i32, %c0_i32_0 : i32, i32
  }
  func.func @transform_3(%arg0: i32) -> (i32, i32, i32) {
    %c0_i32 = arith.constant 0 : i32
    %c0_i32_0 = arith.constant 0 : i32
    %c0_i32_1 = arith.constant 0 : i32
    %c0_i32_2 = arith.constant 0 : i32
    return %c0_i32, %c0_i32_0, %c0_i32_1 : i32, i32, i32
  }
  func.func @transform_4(%arg0: i32) -> (i32, i32) {
    %c0_i32 = arith.constant 0 : i32
    %c0_i32_0 = arith.constant 0 : i32
    %c0_i32_1 = arith.constant 0 : i32
    return %c0_i32, %c0_i32_0 : i32, i32
  }
  func.func @transform_5(%arg0: i32) -> (i32, i32) {
    %c0_i32 = arith.constant 0 : i32
    %c0_i32_0 = arith.constant 0 : i32
    %c0_i32_1 = arith.constant 0 : i32
    return %c0_i32, %c0_i32_0 : i32, i32
  }
  func.func @transform_6(%arg0: i32) -> (i32, i32) {
    %c0_i32 = arith.constant 0 : i32
    %c0_i32_0 = arith.constant 0 : i32
    %c0_i32_1 = arith.constant 0 : i32
    return %c0_i32, %c0_i32_0 : i32, i32
  }
  func.func @transform_7(%arg0: i32) -> (i32, i32) {
    %c0_i32 = arith.constant 0 : i32
    %c0_i32_0 = arith.constant 0 : i32
    %c0_i32_1 = arith.constant 0 : i32
    return %c0_i32, %c0_i32_0 : i32, i32
  }
  func.func @transform_8(%arg0: i32) -> (i32, i32) {
    %c0_i32 = arith.constant 0 : i32
    %c0_i32_0 = arith.constant 0 : i32
    %c0_i32_1 = arith.constant 0 : i32
    return %c0_i32, %c0_i32_0 : i32, i32
  }
  func.func @transform_9(%arg0: i32) -> (i32, i32, i32) {
    %c0_i32 = arith.constant 0 : i32
    %c0_i32_0 = arith.constant 0 : i32
    %c0_i32_1 = arith.constant 0 : i32
    return %arg0, %c0_i32, %c0_i32_0 : i32, i32, i32
  }
}

</mosaic_0001>

<bundles_post_ra>
// kernel: tpu_custom_call.1
= control target key start
LH: loop header
LB: loop body
LE: loop exit
PB: predicated region body
PF: predicated region fallthrough
CT: control target
= control target key end

     0   :  { %s4683_s0 = inlined_call_operand.hbm [shape: bf16[2,64,128], index: 0, kind: input, shape index: {}]   ;;  %s4684_s1 = inlined_call_operand.hbm [shape: bf16[128,128], index: 1, kind: input, shape index: {}]   ;;  %s4685_s2 = inlined_call_operand.vmem [shape: f32[1,128], index: 2, kind: input, shape index: {}]   ;;  %s4686_s3 = inlined_call_operand.hbm [shape: bf16[9,128,128], index: 3, kind: input, shape index: {}]   ;;  %s4687_s4 = inlined_call_operand.vmem [shape: f32[1,128], index: 4, kind: input, shape index: {}]   ;;  %s4688_s5 = inlined_call_operand.hbm [shape: bf16[128,128], index: 5, kind: input, shape index: {}]   ;;  %s4689_s6 = inlined_call_operand.vmem [shape: f32[1,128], index: 6, kind: input, shape index: {}]   ;;  %s4690_s7 = inlined_call_operand.hbm [shape: bf16[128,128], index: 7, kind: input, shape index: {}]   ;;  %s4691_s8 = inlined_call_operand.hbm [shape: bf16[128,128], index: 8, kind: input, shape index: {}]   ;;  %s4692_s9 = inlined_call_operand.hbm [shape: bf16[2,64,128], index: 9, kind: output, shape index: {}]  }
   0x1   :  { %4695 = sst [smem:[#allocation20_spill]] %s4684_s1 }
   0x2   :  { %4696 = sst [smem:[#allocation21_spill]] %s4686_s3 }
   0x3   :  { %4697 = sst [smem:[#allocation22_spill]] %s4688_s5 }
   0x4   :  { %14 = vsyncpa [#allocation4], 0 }
   0x5   :  { %16 = vsyncpa [#allocation4 + $0x1], 0 }
   0x6   :  { %17 = vsyncpa [#allocation7], 0 }
   0x7   :  { %18 = vsyncpa [#allocation10], 0 }
   0x8   :  { %19 = vsyncpa [#allocation13], 0 }
   0x9   :  { %20 = vsyncpa [#allocation5], 0 }
   0xa   :  { %22 = vsyncpa [#allocation5 + $0x1], 0  ;;  %s4070_s30 = smov 0   ;;  %s4072_s10 = smov 0  }
   0xb   :  { %s4074_s11 = smov 0   ;;  %s4076_s12 = smov 0  }
   0xc LB: > { %s4698_s1 = sld [smem:[#allocation20_spill]]  ;;  %s4094_s16 = sadd.s32 4294967295, %s4007_s12   ;;  %s4007_s12 = sphi %s4076_s12, %s4723_s12   ;;  %s4003_s11 = sphi %s4074_s11, %s4722_s11   ;;  %s3999_s10 = sphi %s4072_s10, %s4721_s10   ;;  %s3995_s30 = sphi %s4070_s30, %s4720_s30  }
   0xd   : > { %p2964_p0 = scmp.ge.s32.totalorder %s4007_s12, 1  ;;  %p49_p1 = scmp.eq.s32.totalorder %s4094_s16, 0 }
   0xe   : > { %p253_p2 = scmp.lt.s32.totalorder %s4007_s12, 3  ;;  %s4009_s18 = smov [#allocation6]  }
   0xf   : > { %s266_s19 = sshll.u32 %s4009_s18, 4  ;;  %s4700_s5 = sld [smem:[#allocation22_spill]]  ;;  %s267_s19 = int_to_ptr.vmem [resolvable:$true] %s266_s19 }
  0x10   : > { %p4099_p3 = pnand %p2964_p0, %p253_p2  ;;  %s4702_s3 = sld [smem:[#allocation21_spill]] }
  0x11   : > { %s4010_s27 = smov [#allocation9]   ;;  %s4693_s29 = smov 64  }
  0x12   : > { %s264_s15 = sshll.u32 %s4698_s1, 4  ;;  %p3661_p4 = pneg %p4099_p3  ;;  %s265_s15 = int_to_ptr.hbm [resolvable:$true] %s264_s15 }
  0x13   : > { %s300_s28 = sshll.u32 %s4010_s27, 4  ;;  %s4694_s13 = smov 4   ;;  %s301_s28 = int_to_ptr.vmem [resolvable:$true] %s300_s28 }
  0x14   : > { %p4111_p6 = pnand %p3661_p4, %p49_p1  ;;  %s315_s20 = sshll.u32 %s4690_s7, 4  ;;  %s316_s20 = int_to_ptr.hbm [resolvable:$true] %s315_s20 }
  0x15   : > { %s298_s22 = sshll.u32 %s4700_s5, 4  ;;  %s4013_s21 = smov [#allocation8]   ;;  %s299_s22 = int_to_ptr.hbm [resolvable:$true] %s298_s22 }
  0x16   : > { %s281_s26 = sshll.u32 %s4702_s3, 4  ;;  %s283_s24 = sshll.u32 %s4013_s21, 4  ;;  %s282_s26 = int_to_ptr.hbm [resolvable:$true] %s281_s26  ;;  %s284_s24 = int_to_ptr.vmem [resolvable:$true] %s283_s24 }
  0x17   : > { %3664 = dma.hbm_to_vmem [thread:$0]  (!%p4111_p6), %s265_s15, 1024, %s267_s19, [#allocation7], %s4693_s29, %s4693_s29, %s4694_s13  }
  0x18   : > { %3670 = dma.hbm_to_vmem [thread:$0]  (!%p4111_p6), %s299_s22, 1024, %s301_s28, [#allocation10], %s4693_s29, %s4693_s29, %s4694_s13  }
  0x19   : > { %3667 = dma.hbm_to_vmem [thread:$0]  (!%p4111_p6), %s282_s26, 9216, %s284_s24, [#allocation7], %s4693_s29, %s4693_s29, %s4694_s13  }
  0x1a   : > { %s4014_s15 = smov [#allocation11]   ;;  %s329_s27 = sshll.u32 %s4691_s8, 4  ;;  %s330_s27 = int_to_ptr.hbm [resolvable:$true] %s329_s27 }
  0x1b   : > { %s317_s19 = sshll.u32 %s4014_s15, 4  ;;  %s4015_s26 = smov [#allocation12]   ;;  %s318_s19 = int_to_ptr.vmem [resolvable:$true] %s317_s19 }
  0x1c   : > { %3673 = dma.hbm_to_vmem [thread:$0]  (!%p4111_p6), %s316_s20, 1024, %s318_s19, [#allocation10], %s4693_s29, %s4693_s29, %s4694_s13  }
  0x1d   : > { %s331_s28 = sshll.u32 %s4015_s26, 4  ;;  %s2963_s14 = sadd.s32 4294967294, %s4007_s12   ;;  %s332_s28 = int_to_ptr.vmem [resolvable:$true] %s331_s28 }
  0x1e   : > { %3676 = dma.hbm_to_vmem [thread:$0]  (!%p4111_p6), %s330_s27, 1024, %s332_s28, [#allocation13], %s4693_s29, %s4693_s29, %s4694_s13  }
  0x1f   : > { %s4151_s18 = sadd.s32 1, %s4007_s12   ;;  %s35_s21 = sadd.s32 1, %s4003_s11 }
  0x20   : > { %s32_s24 = ssub.s32 %s4007_s12, %s4151_s18  ;;  %p42_p7 = scmp.ne.s32.totalorder %s4003_s11, %s3999_s10 }
  0x21   : > { %p33_p8 = scmp.eq.s32.totalorder %s32_s24, 0  ;;  %p43_p9 = scmp.eq.s32.totalorder %s4007_s12, 0 }
  0x22   : > { %p48_p10 = scmp.ne.s32.totalorder %s3999_s10, %s3995_s30  ;;  %p240_p11 = scmp.eq.s32.totalorder %s4094_s16, 1 }
  0x23   : > { %s4163_s20 = scalar_select %p33_p8, %s4003_s11, %s35_s21  }
  0x24   : > { %p4167_p12 = por %p49_p1, %p48_p10  ;;  %p4171_p13 = por %p240_p11, %p42_p7 }
  0x25   : > { %p246_p0 = scmp.eq.s32.totalorder %s2963_s14, 1  ;;  %p44_p2 = por %p43_p9, %p42_p7 }
  0x26   : > { %s345_s19 = sand.u32 1, %s4003_s11   ;;  %p3690_p6 = scmp.lt.s32.totalorder %s4007_s12, 2 }
  0x27   : > { %p4176_p4 = por %p246_p0, %p48_p10  ;;  %s2971_s25 = sshll.u32 %s345_s19, 5 }
  0x28   : > { %s3492_s27 = sshll.u32 %s4007_s12, 5  ;;  %s349_s29 = scalar_lea.vmem [#allocation3], %s2971_s25 }
  0x29   : > { %s354_s21 = scalar_lea.hbm %s4683_s0, %s3492_s27  ;;  %s357_s13 = sshll.u32 %s349_s29, 4  ;;  %s358_s13 = int_to_ptr.vmem [resolvable:$true] %s357_s13 }
  0x2a   : > { %s355_s24 = sshll.u32 %s354_s21, 4  ;;  %p4185_p8 = pnand %p3690_p6, %p44_p2  ;;  %s356_s24 = int_to_ptr.hbm [resolvable:$true] %s355_s24 }
  0x2b   : > { %s346_s1 = scalar_lea.sflag [#allocation4], %s345_s19  ;;  %s3899_s3 = sshra.s32 %s356_s24, 4  ;;  %s3900_s3 = int_to_ptr.hbm [resolvable:$true] %s3899_s3 }
  0x2c   : > { %s3901_s5 = scalar_lea.hbm %s3900_s3, 32  ;;  %p3903_p9 = pneg %p4185_p8 }
  0x2d   : > { %p3902_p7 = scmp.ne.s32.totalorder %s3900_s3, %s3901_s5  ;;  %s3906_s29 = scalar_lea.hbm %s4683_s0, 64 }
  0x2e   : > { %p3907_p0 = scmp.lt.s32.totalorder %s3900_s3, %s4683_s0  ;;  %p3908_p2 = scmp.lt.s32.totalorder %s3906_s29, %s3901_s5 }
  0x2f   : > { %p3904_p10 = pnand %p3903_p9, %p3902_p7 }
  0x30   : > { %p3909_p6 = por %p3908_p2, %p3907_p0 }
  0x31   : > { %p3905_p11 = pneg %p3904_p10 }
  0x33   : > { %p3910_p5 = pnand %p3909_p6, %p3905_p11 }
  0x35   : > { %3913 = shalt.err (!%p3910_p5)
}
  0x36   : > { %s4707_s19 = smov 4   ;;  %s4708_s21 = smov 64  }
  0x37   : > { %3680 = dma.hbm_to_vmem [thread:$0]  (!%p4185_p8), %s356_s24, 512, %s358_s13, %s346_s1, %s4708_s21, %s4708_s21, %s4707_s19  }
  0x38   : > { %369 = sbr.rel (%p4099_p3) target bundleno = 1040 (0x410), region = 56  ;;  %s4205_s27 = sand.u32 (!%p4099_p3), 1, %s3999_s10  }
  0x39   : > { %s2975_s3 = sshll.u32 (!%p4099_p3), %s4205_s27, 5  ;;  %s372_s5 = scalar_lea.sflag (!%p4099_p3), [#allocation4], %s4205_s27 }
  0x3a   : > { %s4211_s26 = scalar_lea.vmem (!%p4099_p3), [#allocation3], %s2975_s3 }
  0x3d   : > { %3974 = dma.done.wait (%p4167_p12), %s372_s5, 512  }
  0x3e   : > { %3976 = vsyncadd (%p4167_p12), %s372_s5, 4294966784 }
  0x3f   : > { %3978 = dma.done.wait (%p49_p1), [#allocation7], 10240  }
  0x40   : > { %3980 = vsyncadd (%p49_p1), [#allocation7], 4294957056 }
  0x41   : > { %3982 = dma.done.wait (%p49_p1), [#allocation10], 2048  }
  0x42   : > { %3984 = vsyncadd (%p49_p1), [#allocation10], 4294965248 }
  0x43   : > { %3986 = dma.done.wait (%p49_p1), [#allocation13], 1024  }
  0x44   : > { %3988 = vsyncadd (%p49_p1), [#allocation13], 4294966272  ;;  %v3504_v0 = vld [vmem:[#allocation6 + $0x38] sm:$0xff]  ;;  %v3503_v1 = vld [vmem:[#allocation6 + $0x30] sm:$0xff]  ;;  %vm587_vm0 = vcmask 1040384   ;;  %v4016_v29 = vmov 0  }
  0x45   : > { %533 = vmatpush.bf16.msra.mxu0 %v3504_v0  ;;  %v3502_v2 = vld [vmem:[#allocation6 + $0x28] sm:$0xff]  ;;  %v3501_v3 = vld [vmem:[#allocation6 + $0x20] sm:$0xff]  ;;  %v3500_v4 = vld [vmem:[#allocation6 + $0x18] sm:$0xff]  ;;  %vm588_vm1 = vsmask.f32 256  ;;  %vm741_vm5 = vcmask 1043456  }
  0x46   : > { %v3499_v5 = vld [vmem:[#allocation6 + $0x10] sm:$0xff]  ;;  %v3498_v6 = vld [vmem:[#allocation6 + $0x8] sm:$0xff]  ;;  %v3497_v7 = vld [vmem:[#allocation6] sm:$0xff]  ;;  %vm620_vm2 = vsmask.f32 7938  ;;  %vm1206_vm7 = vcmask 1042432  }
  0x47   : > { %v3493_v8 = vld [vmem:[%s4211_s26] sm:$0xff]  ;;  %v3494_v9 = vld [vmem:[%s4211_s26 + $0x8] sm:$0xff]  ;;  %v3516_v10 = vld [vmem:[#allocation8 + $0x38] sm:$0xff]  ;;  %582 = vst [vmem:[#allocation2] sm:$0xf] %v4016_v29  ;;  %vm1207_vm8 = vcmask 1046532  }
  0x48   : > { %v3532_v11 = vld [vmem:[#allocation8 + $0xb8] sm:$0xff]  ;;  %887 = vmatpush.bf16.msra.mxu1 %v3516_v10  ;;  %v3515_v12 = vld [vmem:[#allocation8 + $0x30] sm:$0xff]  ;;  %v3514_v15 = vld [vmem:[#allocation8 + $0x28] sm:$0xff]  ;;  %583 = vst [vmem:[#allocation2 + $0x4] sm:$0x1] %v4016_v29  ;;  %s3613_s29 = sshll.u32 %s4094_s16, 5 }
  0x49   : > { %534 = vmatpush.bf16.msra.mxu0 %v3503_v1  ;;  %1305 = vmatpush.bf16.msra.mxu3 %v3532_v11  ;;  %v3495_v13 = vld [vmem:[%s4211_s26 + $0x10] sm:$0xff]  ;;  %v3496_v14 = vld [vmem:[%s4211_s26 + $0x18] sm:$0xff]  ;;  %vm4233_vm3 = vmand %vm587_vm0, %vm588_vm1  ;;  %586 = vst [vmem:[#allocation2 + $0x4c] sm:$0x1] %v4016_v29  ;;  %vm949_vm10 = vsmask.f32 3328  ;;  %s2838_s28 = scalar_lea.hbm %s4692_s9, %s3613_s29 }
  0x4a   : > { %v3544_v16 = vld [vmem:[#allocation8 + $0xf8] sm:$0xff]  ;;  %v3531_v17 = vld [vmem:[#allocation8 + $0xb0] sm:$0xff]  ;;  %vm4240_vm4 = vmand %vm587_vm0, %vm620_vm2  ;;  %585 = vst [vmem:[#allocation2 + $0x48] sm:$0xf] %v4016_v29  ;;  %vm950_vm11 = vsmask.f32 7440 }
  0x4b   : > { %v593_v19 = vld [vmem:[#allocation2 + $0x8] sm:$0x1]  ;;  %v625_v20 = vld [vmem:[#allocation2 + $0xc] sm:$0x1]  ;;  %v3513_v24 = vld [vmem:[#allocation8 + $0x20] sm:$0xff]  ;;  %s435_s19 = scalar_lea.vmem [#allocation14], %s2975_s3 }
  0x4c   : > { %888 = vmatpush.bf16.msra.mxu1 %v3515_v12  ;;  %v594_v21 = vsel %vm4233_vm3, 0, %v593_v19  ;;  %v3524_v23 = vld [vmem:[#allocation8 + $0x78] sm:$0xff]  ;;  %v626_v25 = vsel %vm4240_vm4, 0, %v625_v20  ;;  %v3543_v26 = vld [vmem:[#allocation8 + $0xf0] sm:$0xff]  ;;  %v3530_v27 = vld [vmem:[#allocation8 + $0xa8] sm:$0xff]  ;;  %s2839_s21 = sshll.u32 %s435_s19, 4  ;;  %s2840_s21 = int_to_ptr.vmem [resolvable:$true] %s2839_s21 }
  0x4d   : > { %535 = vmatpush.bf16.msra.mxu0 %v3502_v2  ;;  %1306 = vmatpush.bf16.msra.mxu3 %v3531_v17  ;;  %595 = vst [vmem:[#allocation2 + $0x8] sm:$0x1] %v594_v21  ;;  %v3523_v28 = vld [vmem:[#allocation8 + $0x70] sm:$0xff]  ;;  %v3512_v30 = vld [vmem:[#allocation8 + $0x18] sm:$0xff]  ;;  %v3542_v31 = vld [vmem:[#allocation8 + $0xe8] sm:$0xff]  ;;  %s2841_s5 = sshll.u32 %s2838_s28, 4  ;;  %s2842_s5 = int_to_ptr.hbm [resolvable:$true] %s2841_s5 }
  0x4e   : > { %627 = vst [vmem:[#allocation2 + $0xc] sm:$0x1] %v626_v25  ;;  %1128 = vmatpush.bf16.msra.mxu2 %v3524_v23  ;;  %v3529_v32 = vld [vmem:[#allocation8 + $0xa0] sm:$0xff]  ;;  %v3522_v33 = vld [vmem:[#allocation8 + $0x68] sm:$0xff]  ;;  %v3511_v37 = vld [vmem:[#allocation8 + $0x10] sm:$0xff]  ;;  %s3943_s1 = sshra.s32 %s2842_s5, 4  ;;  %s3944_s1 = int_to_ptr.hbm [resolvable:$true] %s3943_s1 }
  0x4f   : > { %v596_v34 = vld [vmem:[#allocation2 + $0x10] sm:$0x1]  ;;  %v628_v36 = vld [vmem:[#allocation2 + $0x14] sm:$0x1]  ;;  %v3528_v40 = vld [vmem:[#allocation8 + $0x98] sm:$0xff]  ;;  %s3945_s17 = scalar_lea.hbm %s3944_s1, 32  ;;  %p3950_p12 = scmp.lt.s32.totalorder %s3944_s1, %s4692_s9 }
  0x50   : > { %889 = vmatpush.bf16.msra.mxu1 %v3514_v15  ;;  %v597_v35 = vsel %vm4233_vm3, 0, %v596_v34  ;;  %v629_v38 = vsel %vm4240_vm4, 0, %v628_v36  ;;  %v3541_v39 = vld [vmem:[#allocation8 + $0xe0] sm:$0xff]  ;;  %v590_v42 = vld [vmem:[#allocation2] sm:$0x1]  ;;  %v3510_v43 = vld [vmem:[#allocation8 + $0x8] sm:$0xff]  ;;  %p3946_p1 = scmp.ne.s32.totalorder %s3944_s1, %s3945_s17 }
  0x51   : > { %536 = vmatpush.bf16.msra.mxu0 %v3501_v3  ;;  %1307 = vmatpush.bf16.msra.mxu3 %v3530_v27  ;;  %598 = vst [vmem:[#allocation2 + $0x10] sm:$0x1] %v597_v35  ;;  %v3521_v41 = vld [vmem:[#allocation8 + $0x60] sm:$0xff]  ;;  %v3540_v44 = vld [vmem:[#allocation8 + $0xd8] sm:$0xff]  ;;  %v591_v45 = vsel %vm4233_vm3, 0, %v590_v42  ;;  %v3527_v47 = vld [vmem:[#allocation8 + $0x90] sm:$0xff] }
  0x52   : > { %1129 = vmatpush.bf16.msra.mxu2 %v3523_v28  ;;  %630 = vst [vmem:[#allocation2 + $0x14] sm:$0x1] %v629_v38  ;;  %v622_v46 = vld [vmem:[#allocation2 + $0x4] sm:$0x1]  ;;  %v3520_v49 = vld [vmem:[#allocation8 + $0x58] sm:$0xff]  ;;  %v3509_v52 = vld [vmem:[#allocation8] sm:$0xff]  ;;  %p3947_p3 = pnand %p3946_p1, %p4171_p13 }
  0x53   : > { %592 = vst [vmem:[#allocation2] sm:$0x1] %v591_v45  ;;  %v623_v48 = vsel %vm4240_vm4, 0, %v622_v46  ;;  %v599_v50 = vld [vmem:[#allocation2 + $0x18] sm:$0x1]  ;;  %v3539_v55 = vld [vmem:[#allocation8 + $0xd0] sm:$0xff]  ;;  %vm4274_vm6 = vmand %vm741_vm5, %vm620_vm2 }
  0x54   : > { %890 = vmatpush.bf16.msra.mxu1 %v3513_v24  ;;  %624 = vst [vmem:[#allocation2 + $0x4] sm:$0x1] %v623_v48  ;;  %v631_v51 = vld [vmem:[#allocation2 + $0x1c] sm:$0x1]  ;;  %v600_v53 = vsel %vm4233_vm3, 0, %v599_v50  ;;  %v3519_v57 = vld [vmem:[#allocation8 + $0x50] sm:$0xff]  ;;  %vm4285_vm9 = vmor %vm1206_vm7, %vm1207_vm8  ;;  %p3948_p5 = pneg %p3947_p3 }
  0x55   : > { %537 = vmatpush.bf16.msra.mxu0 %v3500_v4  ;;  %1308 = vmatpush.bf16.msra.mxu3 %v3529_v32  ;;  %v632_v54 = vsel %vm4240_vm4, 0, %v631_v51  ;;  %v3526_v56 = vld [vmem:[#allocation8 + $0x88] sm:$0xff]  ;;  %601 = vst [vmem:[#allocation2 + $0x18] sm:$0x1] %v600_v53  ;;  %v3525_v59 = vld [vmem:[#allocation8 + $0x80] sm:$0xff]  ;;  %v3551_v36 = vld [vmem:[#allocation8 + $0x130] sm:$0xff] }
  0x56   : > { %1130 = vmatpush.bf16.msra.mxu2 %v3522_v33  ;;  %633 = vst [vmem:[#allocation2 + $0x1c] sm:$0x1] %v632_v54  ;;  %v3538_v58 = vld [vmem:[#allocation8 + $0xc8] sm:$0xff]  ;;  %v602_v61 = vld [vmem:[#allocation2 + $0x20] sm:$0x1]  ;;  %v3537_v63 = vld [vmem:[#allocation8 + $0xc0] sm:$0xff] }
  0x57   : > { %v3518_v60 = vld [vmem:[#allocation8 + $0x48] sm:$0xff]  ;;  %v634_v62 = vld [vmem:[#allocation2 + $0x24] sm:$0x1]  ;;  %v4261_v0 = vld [vmem:[%s4685_s2] ss:$0 sm:$0xff]  ;;  %v603_v1 = vsel %vm4233_vm3, 0, %v602_v61 }
  0x58   : > { %891 = vmatpush.bf16.msra.mxu1 %v3512_v30  ;;  %v635_v2 = vsel %vm4240_vm4, 0, %v634_v62  ;;  %604 = vst [vmem:[#allocation2 + $0x20] sm:$0x1] %v603_v1  ;;  %v3517_v3 = vld [vmem:[#allocation8 + $0x40] sm:$0xff]  ;;  %v743_v21 = vld [vmem:[#allocation2 + $0x8] sm:$0xf]  ;;  %vm4304_vm12 = vmor %vm949_vm10, %vm950_vm11 }
  0x59   : > { %538 = vmatpush.bf16.msra.mxu0 %v3499_v5  ;;  %1309 = vmatpush.bf16.msra.mxu3 %v3528_v40  ;;  %636 = vst [vmem:[#allocation2 + $0x24] sm:$0x1] %v635_v2  ;;  %v746_v23 = vld [vmem:[#allocation2 + $0xc] sm:$0x1]  ;;  %v1165_v28 = vld [vmem:[#allocation2] sm:$0xe] }
  0x5a   : > { %1131 = vmatpush.bf16.msra.mxu2 %v3521_v41  ;;  %v3110_v34 = vrot.slane %v1165_v28, 9  ;;  %v608_v42 = vld [vmem:[#allocation2 + $0x30] sm:$0x1]  ;;  %v752_v50 = vld [vmem:[#allocation2 + $0x14] sm:$0x1]  ;;  %s3949_s23 = scalar_lea.hbm %s4692_s9, 64 }
  0x5b   : > { %v917_v33 = vld [vmem:[#allocation2 + $0x4] sm:$0x1]  ;;  %v749_v45 = vld [vmem:[#allocation2 + $0x10] sm:$0xf]  ;;  %v609_v48 = vsel %vm4233_vm3, 0, %v608_v42  ;;  %p3951_p8 = scmp.lt.s32.totalorder %s3949_s23, %s3945_s17 }
  0x5c   : > { %892 = vmatpush.bf16.msra.mxu1 %v3511_v37  ;;  %v1211_v41 = vrot.slane %v917_v33, 5  ;;  %v962_v51 = vshll.u32 %v917_v33, 16  ;;  %610 = vst [vmem:[#allocation2 + $0x30] sm:$0x1] %v609_v48  ;;  %v3549_v48 = vld [vmem:[#allocation8 + $0x120] sm:$0xff] }
  0x5d   : > { %539 = vmatpush.bf16.msra.mxu0 %v3498_v6  ;;  %1310 = vmatpush.bf16.msra.mxu3 %v3527_v47  ;;  %p3952_p7 = por %p3951_p8, %p3950_p12 }
  0x5e   : > { %1132 = vmatpush.bf16.msra.mxu2 %v3520_v49 }
  0x5f   : > { %p3953_p9 = pnand %p3952_p7, %p3948_p5 }
  0x60   : > { %893 = vmatpush.bf16.msra.mxu1 %v3510_v43  ;;  %v640_v43 = vld [vmem:[#allocation2 + $0x34] sm:$0x1] }
  0x61   : > { %540 = vmatpush.bf16.msra.mxu0 %v3497_v7  ;;  %1311 = vmatpush.bf16.msra.mxu3 %v3526_v56  ;;  %v605_v7 = vld [vmem:[#allocation2 + $0x28] sm:$0x1]  ;;  %v641_v49 = vsel %vm4240_vm4, 0, %v640_v43 }
  0x62   : > { %1133 = vmatpush.bf16.msra.mxu2 %v3519_v57  ;;  %v606_v10 = vsel %vm4233_vm3, 0, %v605_v7  ;;  %642 = vst [vmem:[#allocation2 + $0x34] sm:$0x1] %v641_v49  ;;  %v1212_v57 = vsel %vm4285_vm9, %v3110_v34, %v1211_v41  ;;  %v761_v49 = vld [vmem:[#allocation2 + $0x20] sm:$0xf] }
  0x63   : > { %607 = vst [vmem:[#allocation2 + $0x28] sm:$0x1] %v606_v10 }
  0x64   : > { %541 = vmatmul.bf16.vlgmr.msra.gmra.mxu0 %v3493_v8  ;;  %894 = vmatpush.bf16.msra.mxu1 %v3509_v52  ;;  %v637_v8 = vld [vmem:[#allocation2 + $0x2c] sm:$0x1] }
  0x65   : > { %1439 = vmatpush.bf16.msrb.mxu0 %v3544_v16  ;;  %1312 = vmatpush.bf16.msra.mxu3 %v3525_v59  ;;  %v638_v11 = vsel %vm4240_vm4, 0, %v637_v8 }
  0x66   : > { %1134 = vmatpush.bf16.msra.mxu2 %v3518_v60  ;;  %639 = vst [vmem:[#allocation2 + $0x2c] sm:$0x1] %v638_v11  ;;  %v3550_v11 = vld [vmem:[#allocation8 + $0x128] sm:$0xff] }
  0x69   : > { %1440 = vmatpush.bf16.msrb.mxu0 %v3543_v26 }
  0x6a   : > { %1135 = vmatpush.bf16.msra.mxu2 %v3517_v3 }
  0x6d   : > { %1441 = vmatpush.bf16.msrb.mxu0 %v3542_v31 }
  0x71   : > { %1442 = vmatpush.bf16.msrb.mxu0 %v3541_v39 }
  0x74   : > { %546 = vmatmul.bf16.gmra.mxu0 %v3494_v9 }
  0x75   : > { %1443 = vmatpush.bf16.msrb.mxu0 %v3540_v44 }
  0x79   : > { %1444 = vmatpush.bf16.msrb.mxu0 %v3539_v55  ;;  %v3032_v55 = vld [vmem:[#allocation2] sm:$0xf] }
  0x7d   : > { %1445 = vmatpush.bf16.msrb.mxu0 %v3538_v58 }
  0x81   : > { %1446 = vmatpush.bf16.msrb.mxu0 %v3537_v63 }
  0x84   : > { %551 = vmatmul.bf16.gmra.mxu0 %v3495_v13  ;;  %v3552_v13 = vld [vmem:[#allocation8 + $0x138] sm:$0xff] }
  0x85   : > { %1685 = vmatpush.bf16.msrb.mxu1 %v3552_v13 }
  0x89   : > { %1686 = vmatpush.bf16.msrb.mxu1 %v3551_v36 }
  0x8d   : > { %1687 = vmatpush.bf16.msrb.mxu1 %v3550_v11  ;;  %v3580_v11 = vld [vmem:[#allocation8 + $0x1f8] sm:$0xff] }
  0x8e   : > { %2240 = vmatpush.bf16.msra.mxu0 %v3580_v11 }
  0x91   : > { %1688 = vmatpush.bf16.msrb.mxu1 %v3549_v48 }
  0x94   : > { %556 = vmatmul.bf16.gmra.mxu0 %v3496_v14  ;;  %v916_v14 = vld [vmem:[#allocation2] sm:$0xf] }
  0x95   : > { %v953_v24 = vshrl.u32 %v916_v14, 16  ;;  %v956_v29 = vshll.u32 %v916_v14, 16  ;;  %v755_v14 = vld [vmem:[#allocation2 + $0x18] sm:$0xf] }
  0x97   : > { %v955_v37 = vrot.slane %v953_v24, 4  ;;  %v958_v38 = vrot.slane %v956_v29, 5 }
  0x99   : > { %v959_v56 = vor.u32 %v958_v38, %v955_v37 }
  0xe1   : > { %v542_v4 = vpop.f32.mrf.mxu0 }
  0xe2   : > { %v566_v5 = vadd.f32 %v4261_v0, %v542_v4 }
  0xe4   : > { %v574_v6 = vmax.f32 %v566_v5, 0.0  ;;  %v960_v5 = vrot.slane %v959_v56, 4 }
  0xe6   : > { %v652_v9 = vpack.c.bf16 %v574_v6, %v574_v6  ;;  %v964_v6 = vrot.slane %v962_v51, 5 }
  0xe8   : > { %v661_v12 = vshrl.u32 %v652_v9, 16  ;;  %v664_v17 = vshll.u32 %v652_v9, 16  ;;  %v1241_v9 = vunpack.c.l.b16 %v1212_v57  ;;  %v965_v34 = vsel %vm4304_vm12, %v960_v5, %v964_v6 }
  0xe9   : > { %v544_v15 = vpop.f32.mrf.mxu0 }
  0xea   : > { %v663_v16 = vrot.slane %v661_v12, 7  ;;  %v567_v19 = vadd.f32 %v4261_v0, %v544_v15  ;;  %v611_v12 = vld [vmem:[#allocation2 + $0x38] sm:$0x1]  ;;  %v758_v15 = vld [vmem:[#allocation2 + $0x1c] sm:$0x1] }
  0xec   : > { %v666_v25 = vor.u32 %v664_v17, %v663_v16  ;;  %v667_v26 = vrot.slane %v663_v16, 4  ;;  %v575_v27 = vmax.f32 %v567_v19, 0.0 }
  0xee   : > { %v744_v30 = vsel %vm4274_vm6, %v666_v25, %v743_v21  ;;  %v747_v31 = vsel %vm4233_vm3, %v667_v26, %v746_v23  ;;  %v653_v32 = vpack.c.bf16 %v575_v27, %v575_v27  ;;  %v612_v26 = vsel %vm4233_vm3, 0, %v611_v12  ;;  %v643_v27 = vld [vmem:[#allocation2 + $0x3c] sm:$0x1] }
  0xef   : > { %745 = vst [vmem:[#allocation2 + $0x8] sm:$0xf] %v744_v30  ;;  %v644_v41 = vsel %vm4240_vm4, 0, %v643_v27  ;;  %v3571_v27 = vld [vmem:[#allocation8 + $0x1b0] sm:$0xff] }
  0xf0   : > { %748 = vst [vmem:[#allocation2 + $0xc] sm:$0x1] %v747_v31  ;;  %v669_v35 = vshrl.u32 %v653_v32, 16  ;;  %v672_v39 = vshll.u32 %v653_v32, 16 }
  0xf1   : > { %v547_v40 = vpop.f32.mrf.mxu0  ;;  %613 = vst [vmem:[#allocation2 + $0x38] sm:$0x1] %v612_v26 }
  0xf2   : > { %v671_v44 = vrot.slane %v669_v35, 7  ;;  %v568_v46 = vadd.f32 %v4261_v0, %v547_v40  ;;  %645 = vst [vmem:[#allocation2 + $0x3c] sm:$0x1] %v644_v41 }
  0xf4   : > { %v674_v52 = vor.u32 %v672_v39, %v671_v44  ;;  %v675_v53 = vrot.slane %v671_v44, 4  ;;  %v576_v54 = vmax.f32 %v568_v46, 0.0 }
  0xf6   : > { %v750_v58 = vsel %vm4274_vm6, %v674_v52, %v749_v45  ;;  %v753_v59 = vsel %vm4233_vm3, %v675_v53, %v752_v50  ;;  %v654_v60 = vpack.c.bf16 %v576_v54, %v576_v54  ;;  %v3505_v61 = vld [vmem:[#allocation2 + $0x4] sm:$0xf0]  ;;  %v1064_v52 = vunpack.c.l.b16 %v965_v34  ;;  %v770_v34 = vld [vmem:[#allocation2 + $0x2c] sm:$0x1] }
  0xf7   : > { %v1166_v62 = vld [vmem:[#allocation2 + $0x8] sm:$0xe]  ;;  %751 = vst [vmem:[#allocation2 + $0x10] sm:$0xf] %v750_v58  ;;  %v3033_v63 = vor.u32 %v3505_v61, %v3032_v55  ;;  %v919_v1 = vld [vmem:[#allocation2 + $0xc] sm:$0x1] }
  0xf8   : > { %v3111_v2 = vrot.slane %v1166_v62, 9  ;;  %754 = vst [vmem:[#allocation2 + $0x14] sm:$0x1] %v753_v59  ;;  %v677_v3 = vshrl.u32 %v654_v60, 16  ;;  %v1215_v4 = vrot.slane %v919_v1, 5  ;;  %v680_v7 = vshll.u32 %v654_v60, 16 }
  0xf9   : > { %v549_v8 = vpop.f32.mrf.mxu0  ;;  %895 = vmatmul.bf16.vlgmr.msra.gmra.mxu1 %v3033_v63  ;;  %v918_v10 = vld [vmem:[#allocation2 + $0x8] sm:$0xf]  ;;  %v976_v25 = vshll.u32 %v919_v1, 16  ;;  %v614_v59 = vld [vmem:[#allocation2 + $0x40] sm:$0x1] }
  0xfa   : > { %v679_v13 = vrot.slane %v677_v3, 7  ;;  %v569_v16 = vadd.f32 %v4261_v0, %v549_v8  ;;  %v1216_v17 = vsel %vm4285_vm9, %v3111_v2, %v1215_v4  ;;  %v967_v21 = vshrl.u32 %v918_v10, 16  ;;  %v3152_v33 = vld [vmem:[#allocation2 + $0x8] sm:$0xf]  ;;  %v764_v60 = vld [vmem:[#allocation2 + $0x24] sm:$0x1] }
  0xfb   : > { %v1242_v23 = vunpack.c.l.b16 %v1216_v17  ;;  %v970_v24 = vshll.u32 %v918_v10, 16  ;;  %v978_v44 = vrot.slane %v976_v25, 5  ;;  %v3572_v2 = vld [vmem:[#allocation8 + $0x1b8] sm:$0xff]  ;;  %v646_v10 = vld [vmem:[#allocation2 + $0x44] sm:$0x1] }
  0xfc   : > { %v682_v28 = vor.u32 %v680_v7, %v679_v13  ;;  %v683_v29 = vrot.slane %v679_v13, 4  ;;  %v577_v30 = vmax.f32 %v569_v16, 0.0  ;;  %v969_v31 = vrot.slane %v967_v21, 4  ;;  %1994 = vmatpush.bf16.msrb.mxu3 %v3572_v2 }
  0xfd   : > { %v1249_v32 = vpack.c.b16 %v1242_v23, %v1241_v9  ;;  %v972_v35 = vrot.slane %v970_v24, 5  ;;  %v615_v9 = vsel %vm4233_vm3, 0, %v614_v59 }
  0xfe   : > { %v756_v36 = vsel %vm4274_vm6, %v682_v28, %v755_v14  ;;  %v759_v37 = vsel %vm4233_vm3, %v683_v29, %v758_v15  ;;  %v655_v38 = vpack.c.bf16 %v577_v30, %v577_v30  ;;  %v3533_v39 = vld [vmem:[#allocation2 + $0xc] sm:$0xf0]  ;;  %616 = vst [vmem:[#allocation2 + $0x40] sm:$0x1] %v615_v9 }
  0xff   : > { %v1167_v40 = vld [vmem:[#allocation2 + $0x10] sm:$0xe]  ;;  %757 = vst [vmem:[#allocation2 + $0x18] sm:$0xf] %v756_v36  ;;  %1313 = vmatmul.bf16.vlgmr.msra.gmra.mxu3 %v1249_v32  ;;  %v3153_v42 = vor.u32 %v3533_v39, %v3152_v33  ;;  %v973_v43 = vor.u32 %v972_v35, %v969_v31  ;;  %v4318_v46 = vld [vmem:[#allocation2 + $0x14] sm:$0x1] }
 0x100   : > { %760 = vst [vmem:[#allocation2 + $0x1c] sm:$0x1] %v759_v37  ;;  %v685_v45 = vshrl.u32 %v655_v38, 16  ;;  %v3112_v53 = vrot.slane %v1167_v40, 9  ;;  %v920_v54 = vld [vmem:[#allocation2 + $0x10] sm:$0xf]  ;;  %1995 = vmatpush.bf16.msrb.mxu3 %v3571_v27 }
 0x101   : > { %v552_v50 = vpop.f32.mrf.mxu0  ;;  %1447 = vmatmul.bf16.vlgmr.msrb.gmra.mxu0 %v3153_v42  ;;  %v974_v51 = vrot.slane %v973_v43, 4  ;;  %v688_v56 = vshll.u32 %v655_v38, 16  ;;  %v981_v58 = vshrl.u32 %v920_v54, 16  ;;  %v1219_v62 = vrot.slane %v4318_v46, 5  ;;  %v3036_v16 = vld [vmem:[#allocation2 + $0x10] sm:$0xf] }
 0x102   : > { %v687_v55 = vrot.slane %v685_v45, 7  ;;  %v570_v57 = vadd.f32 %v4261_v0, %v552_v50  ;;  %v984_v63 = vshll.u32 %v920_v54, 16  ;;  %v990_v1 = vshll.u32 %v4318_v46, 16  ;;  %v767_v33 = vld [vmem:[#allocation2 + $0x28] sm:$0xf]  ;;  %v3547_v50 = vld [vmem:[#allocation8 + $0x110] sm:$0xff] }
 0x103   : > { %v979_v61 = vsel %vm4304_vm12, %v974_v51, %v978_v44  ;;  %v983_v7 = vrot.slane %v981_v58, 4  ;;  %v1220_v29 = vsel %vm4285_vm9, %v3112_v53, %v1219_v62  ;;  %v647_v31 = vsel %vm4240_vm4, 0, %v646_v10  ;;  %v3548_v39 = vld [vmem:[#allocation8 + $0x118] sm:$0xff]  ;;  %v3579_v51 = vld [vmem:[#allocation8 + $0x1f0] sm:$0xff]  ;;  %v3546_v10 = vld [vmem:[#allocation8 + $0x108] sm:$0xff] }
 0x104   : > { %v690_v3 = vor.u32 %v688_v56, %v687_v55  ;;  %v691_v4 = vrot.slane %v687_v55, 4  ;;  %v578_v5 = vmax.f32 %v570_v57, 0.0  ;;  %v1065_v6 = vunpack.c.l.b16 %v979_v61  ;;  %v3560_v44 = vld [vmem:[#allocation8 + $0x178] sm:$0xff]  ;;  %648 = vst [vmem:[#allocation2 + $0x44] sm:$0x1] %v647_v31  ;;  %1689 = vmatpush.bf16.msrb.mxu1 %v3548_v39  ;;  %v3559_v57 = vld [vmem:[#allocation8 + $0x170] sm:$0xff]  ;;  %2241 = vmatpush.bf16.msra.mxu0 %v3579_v51 }
 0x105   : > { %v986_v8 = vrot.slane %v984_v63, 5  ;;  %v1243_v45 = vunpack.c.l.b16 %v1220_v29  ;;  %1859 = vmatpush.bf16.msrb.mxu2 %v3560_v44  ;;  %v3569_v61 = vld [vmem:[#allocation8 + $0x1a0] sm:$0xff]  ;;  %v3558_v46 = vld [vmem:[#allocation8 + $0x168] sm:$0xff]  ;;  %v3576_v44 = vld [vmem:[#allocation8 + $0x1d8] sm:$0xff] }
 0x106   : > { %v762_v12 = vsel %vm4274_vm6, %v690_v3, %v761_v49  ;;  %v765_v13 = vsel %vm4233_vm3, %v691_v4, %v764_v60  ;;  %v656_v14 = vpack.c.bf16 %v578_v5, %v578_v5  ;;  %v1072_v15 = vpack.c.b16 %v1065_v6, %v1064_v52  ;;  %v3506_v17 = vld [vmem:[#allocation2 + $0x14] sm:$0xf0]  ;;  %v3577_v27 = vld [vmem:[#allocation8 + $0x1e0] sm:$0xff] }
 0x107   : > { %v1168_v21 = vld [vmem:[#allocation2 + $0x18] sm:$0xe]  ;;  %763 = vst [vmem:[#allocation2 + $0x20] sm:$0xf] %v762_v12  ;;  %v3037_v23 = vor.u32 %v3506_v17, %v3036_v16  ;;  %v4331_v24 = vld [vmem:[#allocation2 + $0x1c] sm:$0x1]  ;;  %v987_v26 = vor.u32 %v986_v8, %v983_v7 }
 0x108   : > { %v3113_v25 = vrot.slane %v1168_v21, 9  ;;  %766 = vst [vmem:[#allocation2 + $0x24] sm:$0x1] %v765_v13  ;;  %v693_v28 = vshrl.u32 %v656_v14, 16  ;;  %1136 = vmatmul.bf16.vlgmr.msra.gmra.mxu2 %v1072_v15  ;;  %v1223_v30 = vrot.slane %v4331_v24, 5  ;;  %v696_v32 = vshll.u32 %v656_v14, 16  ;;  %1690 = vmatpush.bf16.msrb.mxu1 %v3547_v50 }
 0x109   : > { %v554_v35 = vpop.f32.mrf.mxu0  ;;  %900 = vmatmul.bf16.gmra.mxu1 %v3037_v23  ;;  %v922_v36 = vld [vmem:[#allocation2 + $0x18] sm:$0xf]  ;;  %v4338_v37 = vrot.slane %v987_v26, 4  ;;  %v1004_v38 = vshll.u32 %v4331_v24, 16  ;;  %v992_v4 = vrot.slane %v990_v1, 5  ;;  %1860 = vmatpush.bf16.msrb.mxu2 %v3559_v57  ;;  %v3568_v21 = vld [vmem:[#allocation8 + $0x198] sm:$0xff] }
 0x10a   : > { %v695_v40 = vrot.slane %v693_v28, 7  ;;  %v571_v41 = vadd.f32 %v4261_v0, %v554_v35  ;;  %v1224_v42 = vsel %vm4285_vm9, %v3113_v25, %v1223_v30  ;;  %v995_v43 = vshrl.u32 %v922_v36, 16  ;;  %v3570_v52 = vld [vmem:[#allocation8 + $0x1a8] sm:$0xff]  ;;  %v773_v28 = vld [vmem:[#allocation2 + $0x30] sm:$0xf] }
 0x10b   : > { %v1244_v48 = vunpack.c.l.b16 %v1224_v42  ;;  %v998_v49 = vshll.u32 %v922_v36, 16  ;;  %v3156_v59 = vld [vmem:[#allocation2 + $0x18] sm:$0xf]  ;;  %1996 = vmatpush.bf16.msrb.mxu3 %v3570_v52  ;;  %v993_v12 = vsel %vm4304_vm12, %v4338_v37, %v992_v4  ;;  %v1006_v13 = vrot.slane %v1004_v38, 5  ;;  %v776_v29 = vld [vmem:[#allocation2 + $0x34] sm:$0x1] }
 0x10c   : > { %v698_v53 = vor.u32 %v696_v32, %v695_v40  ;;  %v699_v54 = vrot.slane %v695_v40, 4  ;;  %v579_v55 = vmax.f32 %v571_v41, 0.0  ;;  %v997_v56 = vrot.slane %v995_v43, 4  ;;  %v3578_v6 = vld [vmem:[#allocation8 + $0x1e8] sm:$0xff]  ;;  %1691 = vmatpush.bf16.msrb.mxu1 %v3546_v10  ;;  %v4359_v38 = vld [vmem:[#allocation2 + $0x8] sm:$0xf] }
 0x10d   : > { %v1250_v58 = vpack.c.b16 %v1244_v48, %v1243_v45  ;;  %v1000_v60 = vrot.slane %v998_v49, 5  ;;  %2242 = vmatpush.bf16.msra.mxu0 %v3578_v6  ;;  %v1066_v31 = vunpack.c.l.b16 %v993_v12  ;;  %1861 = vmatpush.bf16.msrb.mxu2 %v3558_v46  ;;  %v3557_v43 = vld [vmem:[#allocation8 + $0x160] sm:$0xff]  ;;  %v3556_v4 = vld [vmem:[#allocation8 + $0x158] sm:$0xff]  ;;  %v3566_v12 = vld [vmem:[#allocation8 + $0x188] sm:$0xff] }
 0x10e   : > { %v768_v62 = vsel %vm4274_vm6, %v698_v53, %v767_v33  ;;  %v771_v63 = vsel %vm4233_vm3, %v699_v54, %v770_v34  ;;  %v657_v2 = vpack.c.bf16 %v579_v55, %v579_v55  ;;  %v3534_v3 = vld [vmem:[#allocation2 + $0x1c] sm:$0xf0]  ;;  %v3545_v33 = vld [vmem:[#allocation8 + $0x100] sm:$0xff]  ;;  %v782_v46 = vld [vmem:[#allocation2 + $0x3c] sm:$0x1] }
 0x10f   : > { %v1169_v5 = vld [vmem:[#allocation2 + $0x20] sm:$0xe]  ;;  %769 = vst [vmem:[#allocation2 + $0x28] sm:$0xf] %v768_v62  ;;  %1318 = vmatmul.bf16.gmra.mxu3 %v1250_v58  ;;  %v3157_v7 = vor.u32 %v3534_v3, %v3156_v59  ;;  %v1001_v8 = vor.u32 %v1000_v60, %v997_v56  ;;  %v4350_v9 = vld [vmem:[#allocation2 + $0x24] sm:$0x1] }
 0x110   : > { %772 = vst [vmem:[#allocation2 + $0x2c] sm:$0x1] %v771_v63  ;;  %v701_v11 = vshrl.u32 %v657_v2, 16  ;;  %v3114_v15 = vrot.slane %v1169_v5, 9  ;;  %v1227_v16 = vrot.slane %v4350_v9, 5  ;;  %1997 = vmatpush.bf16.msrb.mxu3 %v3569_v61  ;;  %v704_v24 = vshll.u32 %v657_v2, 16  ;;  %1692 = vmatpush.bf16.msrb.mxu1 %v3545_v33 }
 0x111   : > { %v557_v1 = vpop.f32.mrf.mxu0  ;;  %1452 = vmatmul.bf16.gmra.mxu0 %v3157_v7  ;;  %v1002_v14 = vrot.slane %v1001_v8, 4  ;;  %v924_v17 = vld [vmem:[#allocation2 + $0x20] sm:$0xf]  ;;  %v779_v61 = vld [vmem:[#allocation2 + $0x38] sm:$0xf]  ;;  %v1018_v3 = vshll.u32 %v4350_v9, 16  ;;  %1862 = vmatpush.bf16.msrb.mxu2 %v3557_v43 }
 0x112   : > { %v703_v23 = vrot.slane %v701_v11, 7  ;;  %v572_v25 = vadd.f32 %v4261_v0, %v557_v1  ;;  %v1009_v26 = vshrl.u32 %v924_v17, 16  ;;  %v1012_v32 = vshll.u32 %v924_v17, 16  ;;  %v3040_v39 = vld [vmem:[#allocation2 + $0x20] sm:$0xf]  ;;  %2243 = vmatpush.bf16.msra.mxu0 %v3577_v27 }
 0x113   : > { %v1007_v30 = vsel %vm4304_vm12, %v1002_v14, %v1006_v13  ;;  %v1228_v40 = vsel %vm4285_vm9, %v3114_v15, %v1227_v16  ;;  %v3567_v53 = vld [vmem:[#allocation8 + $0x190] sm:$0xff]  ;;  %v1510_v5 = vshrl.u32 %v4359_v38, 16  ;;  %v3588_v13 = vld [vmem:[#allocation8 + $0x238] sm:$0xff]  ;;  %v1020_v33 = vrot.slane %v1018_v3, 5 }
 0x114   : > { %v706_v34 = vor.u32 %v704_v24, %v703_v23  ;;  %v707_v35 = vrot.slane %v703_v23, 4  ;;  %v580_v36 = vmax.f32 %v572_v25, 0.0  ;;  %v1067_v37 = vunpack.c.l.b16 %v1007_v30  ;;  %1998 = vmatpush.bf16.msrb.mxu3 %v3568_v21  ;;  %v3575_v11 = vld [vmem:[#allocation8 + $0x1d0] sm:$0xff]  ;;  %2414 = vmatpush.bf16.msra.mxu1 %v3588_v13  ;;  %v3553_v13 = vld [vmem:[#allocation8 + $0x140] sm:$0xff] }
 0x115   : > { %v1011_v41 = vrot.slane %v1009_v26, 4  ;;  %v1014_v42 = vrot.slane %v1012_v32, 5  ;;  %v1245_v63 = vunpack.c.l.b16 %v1228_v40  ;;  %1863 = vmatpush.bf16.msrb.mxu2 %v3556_v4  ;;  %v3555_v27 = vld [vmem:[#allocation8 + $0x150] sm:$0xff]  ;;  %v4382_v40 = vrot.slane %v1510_v5, 4 }
 0x116   : > { %v774_v45 = vsel %vm4274_vm6, %v706_v34, %v773_v28  ;;  %v777_v48 = vsel %vm4233_vm3, %v707_v35, %v776_v29  ;;  %v658_v49 = vpack.c.bf16 %v580_v36, %v580_v36  ;;  %v1073_v50 = vpack.c.b16 %v1067_v37, %v1066_v31  ;;  %v3507_v51 = vld [vmem:[#allocation2 + $0x24] sm:$0xf0]  ;;  %2244 = vmatpush.bf16.msra.mxu0 %v3576_v44  ;;  %v3574_v28 = vld [vmem:[#allocation8 + $0x1c8] sm:$0xff]  ;;  %v3565_v35 = vld [vmem:[#allocation8 + $0x180] sm:$0xff] }
 0x117   : > { %v1170_v52 = vld [vmem:[#allocation2 + $0x28] sm:$0xe]  ;;  %775 = vst [vmem:[#allocation2 + $0x30] sm:$0xf] %v774_v45  ;;  %v3041_v54 = vor.u32 %v3507_v51, %v3040_v39  ;;  %v4367_v55 = vld [vmem:[#allocation2 + $0x2c] sm:$0x1]  ;;  %v1015_v57 = vor.u32 %v1014_v42, %v1011_v41 }
 0x118   : > { %v3115_v56 = vrot.slane %v1170_v52, 9  ;;  %778 = vst [vmem:[#allocation2 + $0x34] sm:$0x1] %v777_v48  ;;  %v709_v58 = vshrl.u32 %v658_v49, 16  ;;  %1141 = vmatmul.bf16.gmra.mxu2 %v1073_v50  ;;  %v1231_v59 = vrot.slane %v4367_v55, 5  ;;  %v712_v60 = vshll.u32 %v658_v49, 16  ;;  %1999 = vmatpush.bf16.msrb.mxu3 %v3567_v53 }
 0x119   : > { %v559_v62 = vpop.f32.mrf.mxu0  ;;  %905 = vmatmul.bf16.gmra.mxu1 %v3041_v54  ;;  %v926_v2 = vld [vmem:[#allocation2 + $0x28] sm:$0xf]  ;;  %v1016_v14 = vrot.slane %v1015_v57, 4  ;;  %v1032_v15 = vshll.u32 %v4367_v55, 16  ;;  %v1513_v41 = vshll.u32 %v4359_v38, 16  ;;  %v3554_v49 = vld [vmem:[#allocation8 + $0x148] sm:$0xff]  ;;  %1864 = vmatpush.bf16.msrb.mxu2 %v3555_v27 }
 0x11a   : > { %v711_v6 = vrot.slane %v709_v58, 7  ;;  %v573_v7 = vadd.f32 %v4261_v0, %v559_v62  ;;  %v1232_v8 = vsel %vm4285_vm9, %v3115_v56, %v1231_v59  ;;  %v1023_v10 = vshrl.u32 %v926_v2, 16  ;;  %v1478_v0 = vld [vmem:[#allocation2 + $0x10] sm:$0xf]  ;;  %v3160_v25 = vld [vmem:[#allocation2 + $0x28] sm:$0xf]  ;;  %2245 = vmatpush.bf16.msra.mxu0 %v3575_v11 }
 0x11b   : > { %v1246_v1 = vunpack.c.l.b16 %v1232_v8  ;;  %v1026_v9 = vshll.u32 %v926_v2, 16  ;;  %v1021_v43 = vsel %vm4304_vm12, %v1016_v14, %v1020_v33  ;;  %v1034_v44 = vrot.slane %v1032_v15, 5  ;;  %v4387_v48 = vld [vmem:[#allocation2 + $0xc] sm:$0x1]  ;;  %v3573_v58 = vld [vmem:[#allocation8 + $0x1c0] sm:$0xff]  ;;  %v3587_v59 = vld [vmem:[#allocation8 + $0x230] sm:$0xff] }
 0x11c   : > { %v714_v16 = vor.u32 %v712_v60, %v711_v6  ;;  %v715_v17 = vrot.slane %v711_v6, 4  ;;  %v581_v21 = vmax.f32 %v573_v7, 0.0  ;;  %v1025_v23 = vrot.slane %v1023_v10, 4  ;;  %2000 = vmatpush.bf16.msrb.mxu3 %v3566_v12  ;;  %v785_v60 = vld [vmem:[#allocation2 + $0x40] sm:$0xf]  ;;  %2415 = vmatpush.bf16.msra.mxu1 %v3587_v59 }
 0x11d   : > { %v1251_v24 = vpack.c.b16 %v1246_v1, %v1245_v63  ;;  %v1028_v26 = vrot.slane %v1026_v9, 5  ;;  %v1524_v53 = vshrl.u32 %v1478_v0, 16  ;;  %v1527_v54 = vshll.u32 %v1478_v0, 16  ;;  %v4392_v8 = vld [vmem:[#allocation2 + $0x14] sm:$0x1]  ;;  %1865 = vmatpush.bf16.msrb.mxu2 %v3554_v49 }
 0x11e   : > { %v780_v29 = vsel %vm4274_vm6, %v714_v16, %v779_v61  ;;  %v783_v30 = vsel %vm4233_vm3, %v715_v17, %v782_v46  ;;  %v659_v31 = vpack.c.bf16 %v581_v21, %v581_v21  ;;  %v3535_v32 = vld [vmem:[#allocation2 + $0x2c] sm:$0xf0]  ;;  %2246 = vmatpush.bf16.msra.mxu0 %v3574_v28  ;;  %v788_v61 = vld [vmem:[#allocation2 + $0x44] sm:$0x1]  ;;  %v1068_v63 = vunpack.c.l.b16 %v1021_v43 }
 0x11f   : > { %v1171_v34 = vld [vmem:[#allocation2 + $0x30] sm:$0xe]  ;;  %781 = vst [vmem:[#allocation2 + $0x38] sm:$0xf] %v780_v29  ;;  %1323 = vmatmul.bf16.gmra.mxu3 %v1251_v24  ;;  %v3161_v36 = vor.u32 %v3535_v32, %v3160_v25  ;;  %v1029_v37 = vor.u32 %v1028_v26, %v1025_v23  ;;  %v4380_v39 = vld [vmem:[#allocation2 + $0x34] sm:$0x1] }
 0x120   : > { %784 = vst [vmem:[#allocation2 + $0x3c] sm:$0x1] %v783_v30  ;;  %v717_v42 = vshrl.u32 %v659_v31, 16  ;;  %v3116_v45 = vrot.slane %v1171_v34, 9  ;;  %v720_v50 = vshll.u32 %v659_v31, 16  ;;  %v1235_v38 = vrot.slane %v4380_v39, 5  ;;  %2001 = vmatpush.bf16.msrb.mxu3 %v3565_v35 }
 0x121   : > { %1457 = vmatmul.bf16.gmra.mxu0 %v3161_v36  ;;  %v1030_v51 = vrot.slane %v1029_v37, 4  ;;  %v928_v52 = vld [vmem:[#allocation2 + $0x30] sm:$0xf]  ;;  %v1515_v2 = vrot.slane %v1513_v41, 5  ;;  %v1526_v3 = vrot.slane %v1524_v53, 4  ;;  %v1519_v11 = vshll.u32 %v4387_v48, 16  ;;  %1866 = vmatpush.bf16.msrb.mxu2 %v3553_v13 }
 0x122   : > { %v719_v55 = vrot.slane %v717_v42, 7  ;;  %v1037_v56 = vshrl.u32 %v928_v52, 16  ;;  %v1040_v57 = vshll.u32 %v928_v52, 16  ;;  %v1529_v12 = vrot.slane %v1527_v54, 5  ;;  %v2031_v46 = vld [vmem:[#allocation2 + $0x10] sm:$0xf]  ;;  %2247 = vmatpush.bf16.msra.mxu0 %v3573_v58 }
 0x123   : > { %v1035_v62 = vsel %vm4304_vm12, %v1030_v51, %v1034_v44  ;;  %v3044_v15 = vld [vmem:[#allocation2 + $0x30] sm:$0xf]  ;;  %v1236_v21 = vsel %vm4285_vm9, %v3116_v45, %v1235_v38  ;;  %v1046_v26 = vshll.u32 %v4380_v39, 16  ;;  %v1516_v28 = vor.u32 %v1515_v2, %v4382_v40  ;;  %v3586_v41 = vld [vmem:[#allocation8 + $0x228] sm:$0xff] }
 0x124   : > { %v722_v4 = vor.u32 %v720_v50, %v719_v55  ;;  %v723_v5 = vrot.slane %v719_v55, 4  ;;  %v1069_v6 = vunpack.c.l.b16 %v1035_v62  ;;  %v1039_v7 = vrot.slane %v1037_v56, 4  ;;  %v2033_v45 = vld [vmem:[#allocation2 + $0x18] sm:$0xf]  ;;  %2416 = vmatpush.bf16.msra.mxu1 %v3586_v41  ;;  %v4408_v2 = vld [vmem:[#allocation2 + $0x1c] sm:$0x1] }
 0x125   : > { %v1042_v10 = vrot.slane %v1040_v57, 5  ;;  %v1530_v29 = vor.u32 %v1529_v12, %v1526_v3  ;;  %v1533_v30 = vshll.u32 %v4392_v8, 16  ;;  %v1247_v31 = vunpack.c.l.b16 %v1236_v21  ;;  %v3585_v13 = vld [vmem:[#allocation8 + $0x220] sm:$0xff]  ;;  %v4424_v41 = vld [vmem:[#allocation2 + $0x1c] sm:$0x1] }
 0x126   : > { %v786_v1 = vsel %vm4274_vm6, %v722_v4, %v785_v60  ;;  %v789_v14 = vsel %vm4233_vm3, %v723_v5, %v788_v61  ;;  %v1074_v9 = vpack.c.b16 %v1069_v6, %v1068_v63  ;;  %v3508_v16 = vld [vmem:[#allocation2 + $0x34] sm:$0xf0]  ;;  %v1521_v34 = vrot.slane %v1519_v11, 5  ;;  %v4412_v4 = vld [vmem:[#allocation2 + $0x14] sm:$0x1] }
 0x127   : > { %v1172_v17 = vld [vmem:[#allocation2 + $0x38] sm:$0xe]  ;;  %787 = vst [vmem:[#allocation2 + $0x40] sm:$0xf] %v786_v1  ;;  %v3045_v23 = vor.u32 %v3508_v16, %v3044_v15  ;;  %v931_v0 = vld [vmem:[#allocation2 + $0x3c] sm:$0x1]  ;;  %v1043_v25 = vor.u32 %v1042_v10, %v1039_v7 }
 0x128   : > { %v3117_v24 = vrot.slane %v1172_v17, 9  ;;  %790 = vst [vmem:[#allocation2 + $0x44] sm:$0x1] %v789_v14  ;;  %1146 = vmatmul.bf16.gmra.mxu2 %v1074_v9  ;;  %v1239_v20 = vrot.slane %v931_v0, 5  ;;  %v930_v27 = vld [vmem:[#allocation2 + $0x38] sm:$0xf]  ;;  %2417 = vmatpush.bf16.msra.mxu1 %v3585_v13 }
 0x129   : > { %910 = vmatmul.bf16.gmra.mxu1 %v3045_v23  ;;  %v1051_v32 = vshrl.u32 %v930_v27, 16  ;;  %v1054_v33 = vshll.u32 %v930_v27, 16  ;;  %v1060_v36 = vshll.u32 %v931_v0, 16  ;;  %v2065_v37 = vshrl.u32 %v2031_v46, 16  ;;  %v3164_v56 = vld [vmem:[#allocation2 + $0x38] sm:$0xf] }
 0x12a   : > { %v1240_v35 = vsel %vm4285_vm9, %v3117_v24, %v1239_v20  ;;  %v2068_v39 = vshll.u32 %v2031_v46, 16  ;;  %v1044_v43 = vrot.slane %v1043_v25, 4  ;;  %v1048_v49 = vrot.slane %v1046_v26, 5  ;;  %v1480_v7 = vld [vmem:[#allocation2 + $0x18] sm:$0xf] }
 0x12b   : > { %v1248_v42 = vunpack.c.l.b16 %v1240_v35  ;;  %v1053_v44 = vrot.slane %v1051_v32, 4  ;;  %v1056_v40 = vrot.slane %v1054_v33, 5  ;;  %v1517_v50 = vrot.slane %v1516_v28, 4  ;;  %v1482_v17 = vld [vmem:[#allocation2 + $0x20] sm:$0xf] }
 0x12c   : > { %v1531_v51 = vrot.slane %v1530_v29, 4  ;;  %v1535_v52 = vrot.slane %v1533_v30, 5  ;;  %v2067_v55 = vrot.slane %v2065_v37, 4  ;;  %v2070_v38 = vrot.slane %v2068_v39, 5  ;;  %v4420_v20 = vld [vmem:[#allocation2 + $0x24] sm:$0x1] }
 0x12d   : > { %v1252_v53 = vpack.c.b16 %v1248_v42, %v1247_v31  ;;  %v1057_v54 = vor.u32 %v1056_v40, %v1053_v44  ;;  %v2079_v58 = vshrl.u32 %v2033_v45, 16  ;;  %v2082_v59 = vshll.u32 %v2033_v45, 16  ;;  %v2035_v32 = vld [vmem:[#allocation2 + $0x20] sm:$0xf]  ;;  %v1723_v39 = vld [vmem:[#allocation2 + $0x10] sm:$0xe] }
 0x12e   : > { %v3536_v57 = vld [vmem:[#allocation2 + $0x3c] sm:$0xf0]  ;;  %v1049_v61 = vsel %vm4304_vm12, %v1044_v43, %v1048_v49  ;;  %v1062_v63 = vrot.slane %v1060_v36, 5  ;;  %v1536_v3 = vsel %vm4304_vm12, %v1531_v51, %v1535_v52  ;;  %v1522_v11 = vsel %vm4304_vm12, %v1517_v50, %v1521_v34  ;;  %v3561_v34 = vld [vmem:[#allocation2 + $0x14] sm:$0xf0]  ;;  %v3584_v51 = vld [vmem:[#allocation8 + $0x218] sm:$0xff] }
 0x12f   : > { %1328 = vmatmul.bf16.gmra.mxu3 %v1252_v53  ;;  %v3165_v60 = vor.u32 %v3536_v57, %v3164_v56  ;;  %v1058_v62 = vrot.slane %v1057_v54, 4  ;;  %v2081_v5 = vrot.slane %v2079_v58, 4  ;;  %v2084_v6 = vrot.slane %v2082_v59, 5  ;;  %v2037_v36 = vld [vmem:[#allocation2 + $0x28] sm:$0xf]  ;;  %2418 = vmatpush.bf16.msra.mxu1 %v3584_v51 }
 0x130   : > { %v2071_v12 = vor.u32 %v2070_v38, %v2067_v55  ;;  %v1070_v46 = vunpack.c.l.b16 %v1049_v61  ;;  %v2088_v9 = vshll.u32 %v4408_v2, 16  ;;  %v1622_v15 = vunpack.c.l.b16 %v1536_v3  ;;  %v1722_v40 = vld [vmem:[#allocation2 + $0x8] sm:$0xe]  ;;  %v3272_v38 = vld [vmem:[#allocation2 + $0x10] sm:$0xf] }
 0x131   : > { %1462 = vmatmul.bf16.gmra.mxu0 %v3165_v60  ;;  %v1063_v10 = vsel %vm4304_vm12, %v1058_v62, %v1062_v63  ;;  %v2085_v14 = vor.u32 %v2084_v6, %v2081_v5  ;;  %v2074_v16 = vshll.u32 %v4412_v4, 16  ;;  %v1538_v21 = vshrl.u32 %v1480_v7, 16  ;;  %v1484_v13 = vld [vmem:[#allocation2 + $0x28] sm:$0xf]  ;;  %v1725_v51 = vld [vmem:[#allocation2 + $0x20] sm:$0xe] }
 0x132   : > { %v1071_v1 = vunpack.c.l.b16 %v1063_v10  ;;  %v1541_v23 = vshll.u32 %v1480_v7, 16  ;;  %v1621_v25 = vunpack.c.l.b16 %v1522_v11  ;;  %v2072_v26 = vrot.slane %v2071_v12, 4 }
 0x133   : > { %v2086_v24 = vrot.slane %v2085_v14, 4  ;;  %v1540_v27 = vrot.slane %v1538_v21, 4  ;;  %v2090_v29 = vrot.slane %v2088_v9, 5  ;;  %v1552_v30 = vshrl.u32 %v1482_v17, 16  ;;  %v4434_v14 = vld [vmem:[#allocation2 + $0x2c] sm:$0x1] }
 0x134   : > { %v1075_v0 = vpack.c.b16 %v1071_v1, %v1070_v46  ;;  %v1543_v28 = vrot.slane %v1541_v23, 5  ;;  %v1555_v31 = vshll.u32 %v1482_v17, 16  ;;  %v1629_v33 = vpack.c.b16 %v1622_v15, %v1621_v25  ;;  %v4438_v15 = vld [vmem:[#allocation2 + $0x24] sm:$0x1] }
 0x135   : > { %v2076_v35 = vrot.slane %v2074_v16, 5  ;;  %v2091_v37 = vsel %vm4304_vm12, %v2086_v24, %v2090_v29  ;;  %v1554_v42 = vrot.slane %v1552_v30, 4  ;;  %v1561_v49 = vshll.u32 %v4420_v20, 16  ;;  %v1486_v16 = vld [vmem:[#allocation2 + $0x30] sm:$0xf]  ;;  %v3583_v24 = vld [vmem:[#allocation8 + $0x210] sm:$0xff] }
 0x136   : > { %v1557_v43 = vrot.slane %v1555_v31, 5  ;;  %v1544_v45 = vor.u32 %v1543_v28, %v1540_v27  ;;  %v2093_v50 = vshrl.u32 %v2035_v32, 16  ;;  %v2096_v53 = vshll.u32 %v2035_v32, 16  ;;  %2419 = vmatpush.bf16.msra.mxu1 %v3583_v24  ;;  %v4460_v24 = vld [vmem:[#allocation2 + $0x3c] sm:$0x1] }
 0x137   : > { %v2077_v44 = vsel %vm4304_vm12, %v2072_v26, %v2076_v35  ;;  %v2107_v54 = vshrl.u32 %v2037_v36, 16  ;;  %v2110_v55 = vshll.u32 %v2037_v36, 16  ;;  %v2177_v56 = vunpack.c.l.b16 %v2091_v37 }
 0x138   : > { %1151 = vmatmul.bf16.gmra.mxu2 %v1075_v0  ;;  %v1558_v52 = vor.u32 %v1557_v43, %v1554_v42  ;;  %v3231_v57 = vrot.slane %v1723_v39, 9  ;;  %v1769_v58 = vrot.slane %v4392_v8, 5  ;;  %v1547_v59 = vshll.u32 %v4424_v41, 16  ;;  %v2041_v42 = vld [vmem:[#allocation2 + $0x38] sm:$0xf] }
 0x139   : > { %1693 = vmatmul.bf16.vlgmr.msrb.gmra.mxu1 %v1629_v33  ;;  %v3273_v60 = vor.u32 %v3561_v34, %v3272_v38  ;;  %v3230_v61 = vrot.slane %v1722_v40, 9  ;;  %v2109_v63 = vrot.slane %v2107_v54, 4  ;;  %v2176_v3 = vunpack.c.l.b16 %v2077_v44  ;;  %v1724_v54 = vld [vmem:[#allocation2 + $0x18] sm:$0xe] }
 0x13a   : > { %v1559_v62 = vrot.slane %v1558_v52, 4  ;;  %v1765_v5 = vrot.slane %v4387_v48, 5  ;;  %v1545_v6 = vrot.slane %v1544_v45, 4  ;;  %v2112_v7 = vrot.slane %v2110_v55, 5  ;;  %v2039_v45 = vld [vmem:[#allocation2 + $0x30] sm:$0xf] }
 0x13b   : > { %v1563_v10 = vrot.slane %v1561_v49, 5  ;;  %v2095_v11 = vrot.slane %v2093_v50, 4  ;;  %v2098_v12 = vrot.slane %v2096_v53, 5  ;;  %v2184_v46 = vpack.c.b16 %v2177_v56, %v2176_v3  ;;  %v4446_v52 = vld [vmem:[#allocation2 + $0x34] sm:$0x1] }
 0x13c   : > { %v1770_v8 = vsel %vm4285_vm9, %v3231_v57, %v1769_v58  ;;  %v1549_v1 = vrot.slane %v1547_v59, 5  ;;  %v2113_v48 = vor.u32 %v2112_v7, %v2109_v63  ;;  %v1766_v17 = vsel %vm4285_vm9, %v3230_v61, %v1765_v5  ;;  %v4450_v55 = vld [vmem:[#allocation2 + $0x2c] sm:$0x1]  ;;  %v3562_v58 = vld [vmem:[#allocation2 + $0x24] sm:$0xf0] }
 0x13d   : > { %v1564_v9 = vsel %vm4304_vm12, %v1559_v62, %v1563_v10  ;;  %v1566_v23 = vshrl.u32 %v1484_v13, 16  ;;  %v1569_v0 = vshll.u32 %v1484_v13, 16  ;;  %v1796_v25 = vunpack.c.l.b16 %v1770_v8  ;;  %v3582_v62 = vld [vmem:[#allocation8 + $0x208] sm:$0xff]  ;;  %v3276_v7 = vld [vmem:[#allocation2 + $0x20] sm:$0xf] }
 0x13e   : > { %v1550_v21 = vsel %vm4304_vm12, %v1545_v6, %v1549_v1  ;;  %v2099_v26 = vor.u32 %v2098_v12, %v2095_v11  ;;  %v2116_v27 = vshll.u32 %v4434_v14, 16  ;;  %v1624_v28 = vunpack.c.l.b16 %v1564_v9  ;;  %2420 = vmatpush.bf16.msra.mxu1 %v3582_v62 }
 0x13f   : > { %2002 = vmatmul.bf16.vlgmr.msrb.gmra.mxu3 %v3273_v60  ;;  %v2102_v29 = vshll.u32 %v4438_v15, 16  ;;  %v1580_v30 = vshrl.u32 %v1486_v16, 16  ;;  %v1583_v31 = vshll.u32 %v1486_v16, 16  ;;  %v1795_v32 = vunpack.c.l.b16 %v1766_v17 }
 0x140   : > { %v1623_v33 = vunpack.c.l.b16 %v1550_v21  ;;  %v2114_v34 = vrot.slane %v2113_v48, 4  ;;  %v1568_v35 = vrot.slane %v1566_v23, 4  ;;  %v1571_v36 = vrot.slane %v1569_v0, 5  ;;  %v1490_v23 = vld [vmem:[#allocation2 + $0x40] sm:$0xf] }
 0x141   : > { %2248 = vmatmul.bf16.vlgmr.msra.gmra.mxu0 %v2184_v46  ;;  %v1582_v37 = vrot.slane %v1580_v30, 4  ;;  %v1585_v39 = vrot.slane %v1583_v31, 5  ;;  %v1803_v43 = vpack.c.b16 %v1796_v25, %v1795_v32  ;;  %v2100_v44 = vrot.slane %v2099_v26, 4  ;;  %v1488_v25 = vld [vmem:[#allocation2 + $0x38] sm:$0xf] }
 0x142   : > { %v2118_v40 = vrot.slane %v2116_v27, 5  ;;  %v1630_v49 = vpack.c.b16 %v1624_v28, %v1623_v33  ;;  %v2104_v50 = vrot.slane %v2102_v29, 5  ;;  %v2135_v56 = vshrl.u32 %v2041_v42, 16  ;;  %v617_v28 = vld [vmem:[#allocation2 + $0x48] sm:$0x1] }
 0x143   : > { %v1586_v38 = vor.u32 %v1585_v39, %v1582_v37  ;;  %v2138_v57 = vshll.u32 %v2041_v42, 16  ;;  %v1572_v59 = vor.u32 %v1571_v36, %v1568_v35  ;;  %v2121_v60 = vshrl.u32 %v2039_v45, 16  ;;  %v649_v29 = vld [vmem:[#allocation2 + $0x4c] sm:$0x1]  ;;  %v4466_v31 = vld [vmem:[#allocation2 + $0x34] sm:$0x1] }
 0x144   : > { %v2119_v53 = vsel %vm4304_vm12, %v2114_v34, %v2118_v40  ;;  %v2124_v61 = vshll.u32 %v2039_v45, 16  ;;  %v2105_v63 = vsel %vm4304_vm12, %v2100_v44, %v2104_v50  ;;  %v3233_v3 = vrot.slane %v1725_v51, 9  ;;  %v3581_v42 = vld [vmem:[#allocation8 + $0x200] sm:$0xff] }
 0x145   : > { %v1777_v5 = vrot.slane %v4420_v20, 5  ;;  %v1589_v6 = vshll.u32 %v4446_v52, 16  ;;  %v2179_v10 = vunpack.c.l.b16 %v2119_v53  ;;  %v3232_v11 = vrot.slane %v1724_v54, 9  ;;  %2421 = vmatpush.bf16.msra.mxu1 %v3581_v42 }
 0x146   : > { %v1773_v12 = vrot.slane %v4424_v41, 5  ;;  %v1575_v13 = vshll.u32 %v4450_v55, 16  ;;  %v3277_v46 = vor.u32 %v3562_v58, %v3276_v7  ;;  %v1587_v8 = vrot.slane %v1586_v38, 4  ;;  %v3563_v58 = vld [vmem:[#allocation2 + $0x34] sm:$0xf0] }
 0x147   : > { %v2137_v1 = vrot.slane %v2135_v56, 4  ;;  %v2140_v9 = vrot.slane %v2138_v57, 5  ;;  %v2178_v48 = vunpack.c.l.b16 %v2105_v63  ;;  %v1573_v16 = vrot.slane %v1572_v59, 4  ;;  %v2043_v59 = vld [vmem:[#allocation2 + $0x40] sm:$0xf] }
 0x148   : > { %1867 = vmatmul.bf16.vlgmr.msrb.gmra.mxu2 %v1803_v43  ;;  %v2123_v17 = vrot.slane %v2121_v60, 4  ;;  %v2126_v21 = vrot.slane %v2124_v61, 5  ;;  %v1778_v20 = vsel %vm4285_vm9, %v3233_v3, %v1777_v5  ;;  %v1591_v0 = vrot.slane %v1589_v6, 5  ;;  %v1727_v61 = vld [vmem:[#allocation2 + $0x30] sm:$0xe] }
 0x149   : > { %1698 = vmatmul.bf16.gmra.mxu1 %v1630_v49  ;;  %v2185_v41 = vpack.c.b16 %v2179_v10, %v2178_v48  ;;  %v1774_v26 = vsel %vm4285_vm9, %v3232_v11, %v1773_v12  ;;  %v1577_v27 = vrot.slane %v1575_v13, 5  ;;  %v2141_v32 = vor.u32 %v2140_v9, %v2137_v1  ;;  %v4476_v5 = vld [vmem:[#allocation2 + $0x44] sm:$0x1]  ;;  %v3280_v6 = vld [vmem:[#allocation2 + $0x30] sm:$0xf] }
 0x14a   : > { %v1592_v30 = vsel %vm4304_vm12, %v1587_v8, %v1591_v0  ;;  %v1608_v33 = vshrl.u32 %v1490_v23, 16  ;;  %v1611_v34 = vshll.u32 %v1490_v23, 16  ;;  %v1798_v35 = vunpack.c.l.b16 %v1778_v20  ;;  %v4480_v10 = vld [vmem:[#allocation2 + $0x3c] sm:$0x1]  ;;  %v1726_v8 = vld [vmem:[#allocation2 + $0x28] sm:$0xe] }
 0x14b   : > { %v1578_v36 = vsel %vm4304_vm12, %v1573_v16, %v1577_v27  ;;  %v2127_v37 = vor.u32 %v2126_v21, %v2123_v17  ;;  %v2144_v39 = vshll.u32 %v4460_v24, 16  ;;  %v1594_v43 = vshrl.u32 %v1488_v25, 16 }
 0x14c   : > { %v1597_v44 = vshll.u32 %v1488_v25, 16  ;;  %v618_v40 = vsel %vm4233_vm3, 0, %v617_v28  ;;  %v650_v45 = vsel %vm4240_vm4, 0, %v649_v29  ;;  %v1797_v49 = vunpack.c.l.b16 %v1774_v26 }
 0x14d   : > { %v1626_v50 = vunpack.c.l.b16 %v1592_v30  ;;  %v2130_v51 = vshll.u32 %v4466_v31, 16  ;;  %619 = vst [vmem:[#allocation2 + $0x48] sm:$0x1] %v618_v40  ;;  %v2142_v53 = vrot.slane %v2141_v32, 4  ;;  %v1610_v54 = vrot.slane %v1608_v33, 4 }
 0x14e   : > { %v1613_v38 = vrot.slane %v1611_v34, 5  ;;  %651 = vst [vmem:[#allocation2 + $0x4c] sm:$0x1] %v650_v45  ;;  %v1804_v56 = vpack.c.b16 %v1798_v35, %v1797_v49  ;;  %v1625_v57 = vunpack.c.l.b16 %v1578_v36  ;;  %v2128_v60 = vrot.slane %v2127_v37, 4 }
 0x14f   : > { %2007 = vmatmul.bf16.gmra.mxu3 %v3277_v46  ;;  %v2146_v18 = vrot.slane %v2144_v39, 5  ;;  %v1596_v62 = vrot.slane %v1594_v43, 4  ;;  %v1599_v22 = vrot.slane %v1597_v44, 5  ;;  %v2132_v3 = vrot.slane %v2130_v51, 5  ;;  %v4490_v39 = vld [vmem:[#allocation2 + $0x44] sm:$0x1] }
 0x150   : > { %v1631_v63 = vpack.c.b16 %v1626_v50, %v1625_v57  ;;  %v1614_v11 = vor.u32 %v1613_v38, %v1610_v54  ;;  %v2149_v12 = vshrl.u32 %v2043_v59, 16  ;;  %v2152_v13 = vshll.u32 %v2043_v59, 16 }
 0x151   : > { %2253 = vmatmul.bf16.gmra.mxu0 %v2185_v41  ;;  %v2147_v7 = vsel %vm4304_vm12, %v2142_v53, %v2146_v18  ;;  %v3281_v46 = vor.u32 %v3563_v58, %v3280_v6  ;;  %v3235_v1 = vrot.slane %v1727_v61, 9  ;;  %v2133_v9 = vsel %vm4304_vm12, %v2128_v60, %v2132_v3  ;;  %v3284_v3 = vld [vmem:[#allocation2 + $0x40] sm:$0xf] }
 0x152   : > { %v1785_v48 = vrot.slane %v4446_v52, 5  ;;  %v1600_v16 = vor.u32 %v1599_v22, %v1596_v62  ;;  %v1617_v17 = vshll.u32 %v4476_v5, 16  ;;  %v2181_v23 = vunpack.c.l.b16 %v2147_v7  ;;  %v1729_v22 = vld [vmem:[#allocation2 + $0x40] sm:$0xe]  ;;  %v1728_v7 = vld [vmem:[#allocation2 + $0x38] sm:$0xe] }
 0x153   : > { %v1603_v20 = vshll.u32 %v4480_v10, 16  ;;  %v3234_v41 = vrot.slane %v1726_v8, 9  ;;  %v1615_v26 = vrot.slane %v1614_v11, 4  ;;  %v2151_v27 = vrot.slane %v2149_v12, 4  ;;  %v2277_v8 = vld [vmem:[#allocation2 + $0x10] sm:$0xe] }
 0x154   : > { %v2045_v21 = vld [vmem:[#allocation2 + $0x48] sm:$0xf]  ;;  %v2154_v28 = vrot.slane %v2152_v13, 5  ;;  %v2180_v29 = vunpack.c.l.b16 %v2133_v9  ;;  %v1781_v30 = vrot.slane %v4450_v55, 5  ;;  %v1601_v34 = vrot.slane %v1600_v16, 4 }
 0x155   : > { %v2163_v0 = vshrl.u32 %v2045_v21, 16  ;;  %v2166_v25 = vshll.u32 %v2045_v21, 16  ;;  %v1619_v52 = vrot.slane %v1617_v17, 5  ;;  %v1786_v36 = vsel %vm4285_vm9, %v3235_v1, %v1785_v48  ;;  %v4492_v42 = vld [vmem:[#allocation2 + $0x4c] sm:$0x1] }
 0x156   : > { %v2186_v35 = vpack.c.b16 %v2181_v23, %v2180_v29  ;;  %v1605_v37 = vrot.slane %v1603_v20, 5  ;;  %v2155_v44 = vor.u32 %v2154_v28, %v2151_v27  ;;  %v2172_v55 = vshll.u32 %v4492_v42, 16  ;;  %v3564_v6 = vld [vmem:[#allocation2 + $0x44] sm:$0xf0] }
 0x157   : > { %v2165_v32 = vrot.slane %v2163_v0, 4  ;;  %v2168_v33 = vrot.slane %v2166_v25, 5  ;;  %v1620_v43 = vsel %vm4304_vm12, %v1615_v26, %v1619_v52  ;;  %v1782_v45 = vsel %vm4285_vm9, %v3234_v41, %v1781_v30  ;;  %v2280_v29 = vld [vmem:[#allocation2 + $0x28] sm:$0xe]  ;;  %v2279_v30 = vld [vmem:[#allocation2 + $0x20] sm:$0xe] }
 0x158   : > { %1872 = vmatmul.bf16.gmra.mxu2 %v1804_v56  ;;  %v1800_v49 = vunpack.c.l.b16 %v1786_v36  ;;  %v1606_v50 = vsel %vm4304_vm12, %v1601_v34, %v1605_v37  ;;  %v2158_v51 = vshll.u32 %v4490_v39, 16  ;;  %v1628_v53 = vunpack.c.l.b16 %v1620_v43 }
 0x159   : > { %1703 = vmatmul.bf16.gmra.mxu1 %v1631_v63  ;;  %v2169_v40 = vor.u32 %v2168_v33, %v2165_v32  ;;  %v1799_v54 = vunpack.c.l.b16 %v1782_v45  ;;  %v2156_v38 = vrot.slane %v2155_v44, 4  ;;  %v2174_v57 = vrot.slane %v2172_v55, 5  ;;  %v2278_v63 = vld [vmem:[#allocation2 + $0x18] sm:$0xe] }
 0x15a   : > { %v1627_v58 = vunpack.c.l.b16 %v1606_v50  ;;  %v2160_v60 = vrot.slane %v2158_v51, 5  ;;  %v3237_v13 = vrot.slane %v1729_v22, 9  ;;  %v3351_v1 = vrot.slane %v2278_v63, 9  ;;  %v2282_v50 = vld [vmem:[#allocation2 + $0x38] sm:$0xe] }
 0x15b   : > { %v2170_v56 = vrot.slane %v2169_v40, 4  ;;  %v1805_v59 = vpack.c.b16 %v1800_v49, %v1799_v54  ;;  %v2324_v9 = vrot.slane %v4408_v2, 5  ;;  %v3285_v48 = vor.u32 %v3564_v6, %v3284_v3 }
 0x15c   : > { %v1632_v18 = vpack.c.b16 %v1628_v53, %v1627_v58  ;;  %v2161_v61 = vsel %vm4304_vm12, %v2156_v38, %v2160_v60  ;;  %v3236_v16 = vrot.slane %v1728_v7, 9  ;;  %v1789_v19 = vrot.slane %v4480_v10, 5  ;;  %v2281_v53 = vld [vmem:[#allocation2 + $0x30] sm:$0xe] }
 0x15d   : > { %v2175_v62 = vsel %vm4304_vm12, %v2170_v56, %v2174_v57  ;;  %v2182_v11 = vunpack.c.l.b16 %v2161_v61  ;;  %v3350_v17 = vrot.slane %v2277_v8, 9  ;;  %v2320_v21 = vrot.slane %v4412_v4, 5 }
 0x15e   : > { %v2183_v12 = vunpack.c.l.b16 %v2175_v62  ;;  %v2325_v0 = vsel %vm4285_vm9, %v3351_v1, %v2324_v9  ;;  %v3353_v32 = vrot.slane %v2280_v29, 9  ;;  %v2332_v33 = vrot.slane %v4434_v14, 5 }
 0x15f   : > { %2012 = vmatmul.bf16.gmra.mxu3 %v3281_v46  ;;  %v1793_v46 = vrot.slane %v4476_v5, 5  ;;  %v1790_v5 = vsel %vm4285_vm9, %v3236_v16, %v1789_v19  ;;  %v2321_v25 = vsel %vm4285_vm9, %v3350_v17, %v2320_v21  ;;  %v2351_v10 = vunpack.c.l.b16 %v2325_v0 }
 0x160   : > { %v2187_v23 = vpack.c.b16 %v2183_v12, %v2182_v11  ;;  %v1801_v41 = vunpack.c.l.b16 %v1790_v5  ;;  %v2350_v26 = vunpack.c.l.b16 %v2321_v25  ;;  %v3352_v52 = vrot.slane %v2279_v30, 9  ;;  %v2283_v11 = vld [vmem:[#allocation2 + $0x40] sm:$0xe]  ;;  %v2284_v12 = vld [vmem:[#allocation2 + $0x48] sm:$0xe] }
 0x161   : > { %2258 = vmatmul.bf16.gmra.mxu0 %v2186_v35  ;;  %v1794_v20 = vsel %vm4285_vm9, %v3237_v13, %v1793_v46  ;;  %v2328_v35 = vrot.slane %v4438_v15, 5  ;;  %v2333_v36 = vsel %vm4285_vm9, %v3353_v32, %v2332_v33  ;;  %v3355_v15 = vrot.slane %v2282_v50, 9  ;;  %v3595_v33 = vld [vmem:[#allocation9 + $0x30] sm:$0xff] }
 0x162   : > { %v1802_v2 = vunpack.c.l.b16 %v1794_v20  ;;  %v2358_v28 = vpack.c.b16 %v2351_v10, %v2350_v26  ;;  %v2353_v44 = vunpack.c.l.b16 %v2333_v36  ;;  %v2340_v38 = vrot.slane %v4460_v24, 5 }
 0x163   : > { %v2329_v43 = vsel %vm4285_vm9, %v3352_v52, %v2328_v35  ;;  %v3354_v58 = vrot.slane %v2281_v53, 9  ;;  %v3356_v13 = vrot.slane %v2283_v11, 9  ;;  %v2344_v8 = vrot.slane %v4490_v39, 5 }
 0x164   : > { %v1806_v4 = vpack.c.b16 %v1802_v2, %v1801_v41  ;;  %v2352_v40 = vunpack.c.l.b16 %v2329_v43  ;;  %v2341_v60 = vsel %vm4285_vm9, %v3355_v15, %v2340_v38  ;;  %v3357_v1 = vrot.slane %v2284_v12, 9  ;;  %v3592_v38 = vld [vmem:[#allocation9 + $0x18] sm:$0xff] }
 0x165   : > { %v2355_v22 = vunpack.c.l.b16 %v2341_v60  ;;  %v2348_v9 = vrot.slane %v4492_v42, 5  ;;  %v2345_v21 = vsel %vm4285_vm9, %v3356_v13, %v2344_v8 }
 0x166   : > { %v2359_v45 = vpack.c.b16 %v2353_v44, %v2352_v40  ;;  %v2356_v0 = vunpack.c.l.b16 %v2345_v21 }
 0x168   : > { %1877 = vmatmul.bf16.gmra.mxu2 %v1805_v59  ;;  %v2336_v59 = vrot.slane %v4466_v31, 5 }
 0x169   : > { %1708 = vmatmul.bf16.gmra.mxu1 %v1632_v18 }
 0x16a   : > { %v2337_v18 = vsel %vm4285_vm9, %v3354_v58, %v2336_v59  ;;  %v3591_v59 = vld [vmem:[#allocation9 + $0x10] sm:$0xff] }
 0x16b   : > { %v2354_v3 = vunpack.c.l.b16 %v2337_v18 }
 0x16d   : > { %v2360_v7 = vpack.c.b16 %v2355_v22, %v2354_v3 }
 0x16f   : > { %2017 = vmatmul.bf16.gmra.mxu3 %v3285_v48 }
 0x171   : > { %2263 = vmatmul.bf16.gmra.mxu0 %v2187_v23  ;;  %v2349_v23 = vsel %vm4285_vm9, %v3357_v1, %v2348_v9 }
 0x172   : > { %v2357_v5 = vunpack.c.l.b16 %v2349_v23 }
 0x174   : > { %v2361_v42 = vpack.c.b16 %v2357_v5, %v2356_v0 }
 0x176   : > { %v896_v27 = vpop.f32.mrf.mxu1 }
 0x178   : > { %1882 = vmatmul.bf16.gmra.mxu2 %v1806_v4 }
 0x179   : > { %2422 = vmatmul.bf16.vlgmr.msra.gmra.mxu1 %v2358_v28  ;;  %v3596_v28 = vld [vmem:[#allocation9 + $0x38] sm:$0xff] }
 0x17a   : > { %2539 = vmatpush.bf16.msra.mxu2 %v3596_v28 }
 0x17e   : > { %v4519_v34 = vpop.f32.mrf.mxu1  ;;  %v1448_v49 = vpop.f32.mrf.mxu0  ;;  %2540 = vmatpush.bf16.msra.mxu2 %v3595_v33 }
 0x182   : > { %v1314_v37 = vpop.f32.mrf.mxu3 }
 0x186   : > { %v901_v55 = vpop.f32.mrf.mxu1  ;;  %v4536_v61 = vpop.f32.mrf.mxu0 }
 0x189   : > { %2427 = vmatmul.bf16.gmra.mxu1 %v2359_v45  ;;  %v3594_v45 = vld [vmem:[#allocation9 + $0x28] sm:$0xff] }
 0x18a   : > { %v4526_v51 = vpop.f32.mrf.mxu3  ;;  %2541 = vmatpush.bf16.msra.mxu2 %v3594_v45 }
 0x18b   : > { %v1137_v14 = vpop.f32.mrf.mxu2 }
 0x18c   : > { %v1157_v54 = vadd.f32 %v1137_v14, %v896_v27  ;;  %v3593_v14 = vld [vmem:[#allocation9 + $0x20] sm:$0xff] }
 0x18e   : > { %v1334_v56 = vadd.f32 %v1314_v37, %v1157_v54  ;;  %v4529_v57 = vpop.f32.mrf.mxu1  ;;  %v1453_v48 = vpop.f32.mrf.mxu0  ;;  %2542 = vmatpush.bf16.msra.mxu2 %v3593_v14 }
 0x190   : > { %v1468_v6 = vadd.f32 %v1448_v49, %v1334_v56 }
 0x192   : > { %v1319_v63 = vpop.f32.mrf.mxu3  ;;  %2543 = vmatpush.bf16.msra.mxu2 %v3592_v38 }
 0x193   : > { %v4538_v62 = vpop.f32.mrf.mxu2 }
 0x196   : > { %v906_v24 = vpop.f32.mrf.mxu1  ;;  %v4552_v25 = vpop.f32.mrf.mxu0  ;;  %2544 = vmatpush.bf16.msra.mxu2 %v3591_v59 }
 0x199   : > { %2432 = vmatmul.bf16.gmra.mxu1 %v2360_v7 }
 0x19a   : > { %v4544_v17 = vpop.f32.mrf.mxu3 }
 0x19b   : > { %v1142_v31 = vpop.f32.mrf.mxu2 }
 0x19c   : > { %v1159_v46 = vadd.f32 %v1142_v31, %v901_v55  ;;  %v3589_v31 = vld [vmem:[#allocation9] sm:$0xff] }
 0x19e   : > { %v1336_v16 = vadd.f32 %v1319_v63, %v1159_v46  ;;  %v4542_v19 = vpop.f32.mrf.mxu1  ;;  %v1458_v47 = vpop.f32.mrf.mxu0  ;;  %v1158_v46 = vadd.f32 %v4538_v62, %v4519_v34 }
 0x1a0   : > { %v1470_v2 = vadd.f32 %v1453_v48, %v1336_v16  ;;  %v1335_v1 = vadd.f32 %v4526_v51, %v1158_v46 }
 0x1a2   : > { %v1324_v10 = vpop.f32.mrf.mxu3  ;;  %v1469_v21 = vadd.f32 %v4536_v61, %v1335_v1 }
 0x1a3   : > { %v4550_v20 = vpop.f32.mrf.mxu2 }
 0x1a6   : > { %v911_v39 = vpop.f32.mrf.mxu1  ;;  %v4560_v36 = vpop.f32.mrf.mxu0 }
 0x1a9   : > { %2437 = vmatmul.bf16.gmra.mxu1 %v2361_v42 }
 0x1aa   : > { %v4556_v29 = vpop.f32.mrf.mxu3 }
 0x1ab   : > { %v1147_v41 = vpop.f32.mrf.mxu2 }
 0x1ac   : > { %v1161_v26 = vadd.f32 %v1147_v41, %v906_v24  ;;  %v3590_v24 = vld [vmem:[#allocation9 + $0x8] sm:$0xff] }
 0x1ad   : > { %2545 = vmatpush.bf16.msra.mxu2 %v3590_v24 }
 0x1ae   : > { %v1338_v4 = vadd.f32 %v1324_v10, %v1161_v26  ;;  %v4554_v27 = vpop.f32.mrf.mxu1  ;;  %v1463_v49 = vpop.f32.mrf.mxu0  ;;  %v1160_v10 = vadd.f32 %v4550_v20, %v4529_v57 }
 0x1b0   : > { %v1472_v52 = vadd.f32 %v1458_v47, %v1338_v4  ;;  %v4585_v4 = vld [vmem:[%s4687_s4] ss:$0 sm:$0xff]  ;;  %v1337_v61 = vadd.f32 %v4544_v17, %v1160_v10 }
 0x1b1   : > { %2546 = vmatpush.bf16.msra.mxu2 %v3589_v31 }
 0x1b2   : > { %v1329_v44 = vpop.f32.mrf.mxu3  ;;  %v1471_v57 = vadd.f32 %v4552_v25, %v1337_v61 }
 0x1b3   : > { %v4558_v30 = vpop.f32.mrf.mxu2 }
 0x1b4   : > { %v1162_v14 = vadd.f32 %v4558_v30, %v4542_v19 }
 0x1b6   : > { %v1694_v32 = vpop.f32.mrf.mxu1  ;;  %v4568_v22 = vpop.f32.mrf.mxu0 }
 0x1b7   : > { %v1714_v35 = vadd.f32 %v1694_v32, %v1468_v6 }
 0x1ba   : > { %v4566_v18 = vpop.f32.mrf.mxu3 }
 0x1bb   : > { %v1152_v37 = vpop.f32.mrf.mxu2 }
 0x1bc   : > { %v1163_v43 = vadd.f32 %v1152_v37, %v911_v39 }
 0x1be   : > { %v1340_v40 = vadd.f32 %v1329_v44, %v1163_v43  ;;  %v1696_v55 = vpop.f32.mrf.mxu1  ;;  %v2249_v7 = vpop.f32.mrf.mxu0 }
 0x1bf   : > { %v1715_v0 = vadd.f32 %v1696_v55, %v1469_v21 }
 0x1c0   : > { %v1474_v53 = vadd.f32 %v1463_v49, %v1340_v40 }
 0x1c2   : > { %v2003_v6 = vpop.f32.mrf.mxu3 }
 0x1c3   : > { %v4562_v56 = vpop.f32.mrf.mxu2 }
 0x1c6   : > { %v1699_v50 = vpop.f32.mrf.mxu1  ;;  %v2251_v48 = vpop.f32.mrf.mxu0 }
 0x1c7   : > { %v1716_v54 = vadd.f32 %v1699_v50, %v1470_v2 }
 0x1ca   : > { %v2005_v8 = vpop.f32.mrf.mxu3 }
 0x1cb   : > { %v1868_v63 = vpop.f32.mrf.mxu2 }
 0x1cc   : > { %v1888_v23 = vadd.f32 %v1868_v63, %v1714_v35 }
 0x1ce   : > { %v1701_v15 = vpop.f32.mrf.mxu1  ;;  %v2023_v5 = vadd.f32 %v2003_v6, %v1888_v23  ;;  %v2254_v41 = vpop.f32.mrf.mxu0 }
 0x1cf   : > { %v1717_v37 = vadd.f32 %v1701_v15, %v1471_v57 }
 0x1d0   : > { %v2269_v62 = vadd.f32 %v2249_v7, %v2023_v5 }
 0x1d2   : > { %v2008_v2 = vpop.f32.mrf.mxu3 }
 0x1d3   : > { %v1870_v11 = vpop.f32.mrf.mxu2 }
 0x1d4   : > { %v1889_v39 = vadd.f32 %v1870_v11, %v1715_v0  ;;  %v1164_v0 = vadd.f32 %v4562_v56, %v4554_v27 }
 0x1d6   : > { %v1704_v58 = vpop.f32.mrf.mxu1  ;;  %v2024_v34 = vadd.f32 %v2005_v8, %v1889_v39  ;;  %v2256_v43 = vpop.f32.mrf.mxu0  ;;  %v1341_v39 = vadd.f32 %v4566_v18, %v1164_v0  ;;  %v3610_v0 = vld [vmem:[#allocation12 + $0x28] sm:$0xff] }
 0x1d7   : > { %v4564_v60 = vadd.f32 %v1704_v58, %v1472_v52 }
 0x1d8   : > { %v2270_v28 = vadd.f32 %v2251_v48, %v2024_v34  ;;  %v1475_v34 = vadd.f32 %v4568_v22, %v1341_v39 }
 0x1da   : > { %v2010_v52 = vpop.f32.mrf.mxu3 }
 0x1db   : > { %v1873_v16 = vpop.f32.mrf.mxu2 }
 0x1dc   : > { %v1890_v20 = vadd.f32 %v1873_v16, %v1716_v54  ;;  %v1339_v54 = vadd.f32 %v4556_v29, %v1162_v14 }
 0x1de   : > { %v4570_v3 = vpop.f32.mrf.mxu1  ;;  %v2025_v45 = vadd.f32 %v2008_v2, %v1890_v20  ;;  %v2259_v59 = vpop.f32.mrf.mxu0  ;;  %v1473_v11 = vadd.f32 %v4560_v36, %v1339_v54  ;;  %v3599_v54 = vld [vmem:[#allocation11 + $0x10] sm:$0xff] }
 0x1e0   : > { %v2271_v38 = vadd.f32 %v2254_v41, %v2025_v45  ;;  %v1719_v19 = vadd.f32 %v4570_v3, %v1473_v11 }
 0x1e2   : > { %v2013_v58 = vpop.f32.mrf.mxu3 }
 0x1e3   : > { %v1875_v26 = vpop.f32.mrf.mxu2 }
 0x1e4   : > { %v1891_v49 = vadd.f32 %v1875_v26, %v1717_v37 }
 0x1e6   : > { %v1709_v12 = vpop.f32.mrf.mxu1  ;;  %v2261_v21 = vpop.f32.mrf.mxu0 }
 0x1e7   : > { %v4572_v13 = vadd.f32 %v1709_v12, %v1474_v53  ;;  %v2026_v53 = vadd.f32 %v2010_v52, %v1891_v49  ;;  %v3604_v49 = vld [vmem:[#allocation11 + $0x38] sm:$0xff] }
 0x1e8   : > { %2666 = vmatpush.bf16.msra.mxu3 %v3604_v49 }
 0x1e9   : > { %v2272_v15 = vadd.f32 %v2256_v43, %v2026_v53  ;;  %v3601_v53 = vld [vmem:[#allocation11 + $0x20] sm:$0xff] }
 0x1ea   : > { %v2015_v8 = vpop.f32.mrf.mxu3 }
 0x1eb   : > { %v1878_v55 = vpop.f32.mrf.mxu2 }
 0x1ec   : > { %v1892_v12 = vadd.f32 %v1878_v55, %v4564_v60 }
 0x1ee   : > { %v4577_v9 = vpop.f32.mrf.mxu1  ;;  %v2027_v1 = vadd.f32 %v2013_v58, %v1892_v12  ;;  %v3600_v58 = vld [vmem:[#allocation11 + $0x18] sm:$0xff] }
 0x1ef   : > { %v1721_v27 = vadd.f32 %v4577_v9, %v1475_v34 }
 0x1f0   : > { %v2273_v5 = vadd.f32 %v2259_v59, %v2027_v1 }
 0x1f2   : > { %v2018_v3 = vpop.f32.mrf.mxu3 }
 0x1f3   : > { %v1880_v63 = vpop.f32.mrf.mxu2 }
 0x1f4   : > { %v1893_v29 = vadd.f32 %v1880_v63, %v1719_v19  ;;  %v3612_v19 = vld [vmem:[#allocation12 + $0x38] sm:$0xff] }
 0x1f6   : > { %v2423_v42 = vpop.f32.mrf.mxu1  ;;  %v2028_v36 = vadd.f32 %v2015_v8, %v1893_v29  ;;  %v3611_v8 = vld [vmem:[#allocation12 + $0x30] sm:$0xff] }
 0x1f7   : > { %v2443_v51 = vadd.f32 %v2423_v42, %v2269_v62 }
 0x1f8   : > { %v2274_v2 = vadd.f32 %v2261_v21, %v2028_v36 }
 0x1f9   : > { %v2455_v32 = vadd.f32 %v4585_v4, %v2443_v51  ;;  %v2264_v51 = vpop.f32.mrf.mxu0 }
 0x1fa   : > { %v2020_v52 = vpop.f32.mrf.mxu3 }
 0x1fb   : > { %v2463_v44 = vmax.f32 %v2455_v32, 0.0  ;;  %v1883_v23 = vpop.f32.mrf.mxu2 }
 0x1fc   : > { %v1894_v62 = vadd.f32 %v1883_v23, %v4572_v13 }
 0x1fe   : > { %v2425_v47 = vpop.f32.mrf.mxu1 }
 0x1ff   : > { %v2444_v33 = vadd.f32 %v2425_v47, %v2270_v28  ;;  %v2029_v47 = vadd.f32 %v2018_v3, %v1894_v62  ;;  %v3608_v62 = vld [vmem:[#allocation12 + $0x18] sm:$0xff] }
 0x201   : > { %v2456_v35 = vadd.f32 %v4585_v4, %v2444_v33  ;;  %v2275_v20 = vadd.f32 %v2264_v51, %v2029_v47  ;;  %v2266_v22 = vpop.f32.mrf.mxu0 }
 0x203   : > { %v2464_v40 = vmax.f32 %v2456_v35, 0.0  ;;  %v1885_v61 = vpop.f32.mrf.mxu2 }
 0x204   : > { %v1895_v18 = vadd.f32 %v1885_v61, %v1721_v27  ;;  %v3607_v27 = vld [vmem:[#allocation12 + $0x10] sm:$0xff] }
 0x205   : > { %v2487_v50 = vpack.c.bf16 %v2464_v40, %v2463_v44 }
 0x206   : > { %v2428_v17 = vpop.f32.mrf.mxu1  ;;  %v2030_v57 = vadd.f32 %v2020_v52, %v1895_v18  ;;  %v3606_v18 = vld [vmem:[#allocation12 + $0x8] sm:$0xff] }
 0x207   : > { %2547 = vmatmul.bf16.vlgmr.msra.gmra.mxu2 %v2487_v50  ;;  %v2445_v25 = vadd.f32 %v2428_v17, %v2271_v38  ;;  %v3603_v50 = vld [vmem:[#allocation11 + $0x30] sm:$0xff]  ;;  %v3602_v17 = vld [vmem:[#allocation11 + $0x28] sm:$0xff] }
 0x208   : > { %v2276_v37 = vadd.f32 %v2266_v22, %v2030_v57  ;;  %2667 = vmatpush.bf16.msra.mxu3 %v3603_v50 }
 0x209   : > { %v2457_v6 = vadd.f32 %v4585_v4, %v2445_v25 }
 0x20b   : > { %v2465_v30 = vmax.f32 %v2457_v6, 0.0  ;;  %v3597_v6 = vld [vmem:[#allocation11] sm:$0xff] }
 0x20c   : > { %2668 = vmatpush.bf16.msra.mxu3 %v3602_v17 }
 0x20e   : > { %v2430_v24 = vpop.f32.mrf.mxu1 }
 0x20f   : > { %v2446_v7 = vadd.f32 %v2430_v24, %v2272_v15  ;;  %v3598_v15 = vld [vmem:[#allocation11 + $0x8] sm:$0xff]  ;;  %v3742_v24 = vld [vmem:[%s4689_s6] ss:$0 sm:$0xff] }
 0x210   : > { %2669 = vmatpush.bf16.msra.mxu3 %v3601_v53 }
 0x211   : > { %v2458_v31 = vadd.f32 %v4585_v4, %v2446_v7 }
 0x213   : > { %v2466_v46 = vmax.f32 %v2458_v31, 0.0  ;;  %v4017_v31 = vmov 64.0  }
 0x214   : > { %2670 = vmatpush.bf16.msra.mxu3 %v3600_v58  ;;  %3743 = vrcp.f32 %v4017_v31 }
 0x215   : > { %v2488_v48 = vpack.c.bf16 %v2466_v46, %v2465_v30 }
 0x216   : > { %v2433_v16 = vpop.f32.mrf.mxu1 }
 0x217   : > { %2552 = vmatmul.bf16.gmra.mxu2 %v2488_v48  ;;  %v2447_v60 = vadd.f32 %v2433_v16, %v2273_v5 }
 0x218   : > { %2671 = vmatpush.bf16.msra.mxu3 %v3599_v54 }
 0x219   : > { %v2459_v10 = vadd.f32 %v4585_v4, %v2447_v60 }
 0x21a   : > { %v3744_v16 = vpop.eup %3743 }
 0x21b   : > { %v2467_v56 = vmax.f32 %v2459_v10, 0.0  ;;  %v2594_v60 = vmul.f32 64.0, %v3744_v16  ;;  %vm2598_vm13 = vweird.f32 %v3744_v16 }
 0x21c   : > { %2672 = vmatpush.bf16.msra.mxu3 %v3598_v15  ;;  %v441_v15 = vld [vmem:[%s4211_s26 + $0x10] sm:$0xff]  }
 0x21e   : > { %v2435_v42 = vpop.f32.mrf.mxu1 }
 0x21f   : > { %v2448_v41 = vadd.f32 %v2435_v42, %v2274_v2  ;;  %v3609_v2 = vld [vmem:[#allocation12 + $0x20] sm:$0xff] }
 0x220   : > { %2673 = vmatpush.bf16.msra.mxu3 %v3597_v6 }
 0x221   : > { %v2460_v26 = vadd.f32 %v4585_v4, %v2448_v41  ;;  %v2595_v41 = vsub.f32 1.0, %v2594_v60 }
 0x223   : > { %v2468_v28 = vmax.f32 %v2460_v26, 0.0  ;;  %v2596_v51 = vmul.f32 %v3744_v16, %v2595_v41 }
 0x224   : > { %2745 = vmatpush.bf16.msrb.mxu3 %v3612_v19 }
 0x225   : > { %v2489_v32 = vpack.c.bf16 %v2468_v28, %v2467_v56  ;;  %v2597_v28 = vadd.f32 %v3744_v16, %v2596_v51 }
 0x226   : > { %v2438_v33 = vpop.f32.mrf.mxu1 }
 0x227   : > { %2557 = vmatmul.bf16.gmra.mxu2 %v2489_v32  ;;  %v2449_v35 = vadd.f32 %v2438_v33, %v2275_v20  ;;  %v2599_v33 = vsel %vm2598_vm13, %v3744_v16, %v2597_v28 }
 0x228   : > { %2746 = vmatpush.bf16.msrb.mxu3 %v3611_v8 }
 0x229   : > { %v2461_v43 = vadd.f32 %v4585_v4, %v2449_v35  ;;  %v3605_v35 = vld [vmem:[#allocation12] sm:$0xff] }
 0x22b   : > { %v2469_v9 = vmax.f32 %v2461_v43, 0.0 }
 0x22c   : > { %2747 = vmatpush.bf16.msrb.mxu3 %v3610_v0 }
 0x22e   : > { %v2440_v13 = vpop.f32.mrf.mxu1 }
 0x22f   : > { %v2450_v44 = vadd.f32 %v2440_v13, %v2276_v37 }
 0x230   : > { %2748 = vmatpush.bf16.msrb.mxu3 %v3609_v2 }
 0x231   : > { %v2462_v40 = vadd.f32 %v4585_v4, %v2450_v44 }
 0x233   : > { %v2470_v55 = vmax.f32 %v2462_v40, 0.0 }
 0x234   : > { %2749 = vmatpush.bf16.msrb.mxu3 %v3608_v62 }
 0x235   : > { %v2490_v45 = vpack.c.bf16 %v2470_v55, %v2469_v9 }
 0x237   : > { %2562 = vmatmul.bf16.gmra.mxu2 %v2490_v45 }
 0x238   : > { %2750 = vmatpush.bf16.msrb.mxu3 %v3607_v27 }
 0x23c   : > { %2751 = vmatpush.bf16.msrb.mxu3 %v3606_v18 }
 0x240   : > { %2752 = vmatpush.bf16.msrb.mxu3 %v3605_v35 }
 0x28a   : > { %v2548_v14 = vpop.f32.mrf.mxu2 }
 0x28b   : > { %v4614_v11 = vadd.f32 %v3742_v24, %v2548_v14 }
 0x292   : > { %v2550_v38 = vpop.f32.mrf.mxu2 }
 0x293   : > { %v4612_v7 = vadd.f32 %v3742_v24, %v2550_v38 }
 0x295   : > { %v2580_v30 = vadd.f32 %v4612_v7, %v4614_v11 }
 0x29a   : > { %v2553_v25 = vpop.f32.mrf.mxu2 }
 0x29b   : > { %v4616_v12 = vadd.f32 %v3742_v24, %v2553_v25  ;;  %v437_v25 = vld [vmem:[%s4211_s26] sm:$0xff]  }
 0x29c   : > { %v2786_v6 = vunpack.c.l.bf16 %v437_v25  ;;  %v2787_v19 = vunpack.c.h.bf16 %v437_v25 }
 0x29d   : > { %v2581_v29 = vadd.f32 %v2580_v30, %v4616_v12 }
 0x2a2   : > { %v2555_v4 = vpop.f32.mrf.mxu2 }
 0x2a3   : > { %v4620_v46 = vadd.f32 %v3742_v24, %v2555_v4  ;;  %v439_v4 = vld [vmem:[%s4211_s26 + $0x8] sm:$0xff]  }
 0x2a4   : > { %v2788_v30 = vunpack.c.l.bf16 %v439_v4  ;;  %v2789_v8 = vunpack.c.h.bf16 %v439_v4 }
 0x2a5   : > { %v2582_v21 = vadd.f32 %v2581_v29, %v4620_v46  ;;  %v2791_v29 = vunpack.c.h.bf16 %v441_v15 }
 0x2aa   : > { %v2558_v59 = vpop.f32.mrf.mxu2 }
 0x2ab   : > { %v4623_v48 = vadd.f32 %v3742_v24, %v2558_v59 }
 0x2ad   : > { %v2583_v36 = vadd.f32 %v2582_v21, %v4623_v48 }
 0x2b2   : > { %v2560_v63 = vpop.f32.mrf.mxu2 }
 0x2b3   : > { %v4626_v23 = vadd.f32 %v3742_v24, %v2560_v63  ;;  %v443_v63 = vld [vmem:[%s4211_s26 + $0x18] sm:$0xff]   ;;  %s2827_s26 = scalar_lea.sflag [#allocation5], %s4205_s27 }
 0x2b4   : > { %v2792_v16 = vunpack.c.l.bf16 %v443_v63  ;;  %v2793_v21 = vunpack.c.h.bf16 %v443_v63 }
 0x2b5   : > { %v2584_v39 = vadd.f32 %v2583_v36, %v4626_v23 }
 0x2ba   : > { %v2563_v1 = vpop.f32.mrf.mxu2 }
 0x2bb   : > { %v4629_v5 = vadd.f32 %v3742_v24, %v2563_v1  ;;  %v2790_v1 = vunpack.c.l.bf16 %v441_v15 }
 0x2bd   : > { %v2585_v42 = vadd.f32 %v2584_v39, %v4629_v5 }
 0x2c2   : > { %v2565_v3 = vpop.f32.mrf.mxu2 }
 0x2c3   : > { %v4633_v10 = vadd.f32 %v3742_v24, %v2565_v3 }
 0x2c5   : > { %v2586_v34 = vadd.f32 %v2585_v42, %v4633_v10 }
 0x2c7   : > { %v2587_v26 = vrot.slane %v2586_v34, 4 }
 0x2c9   : > { %v2588_v61 = vadd.f32 %v2587_v26, %v2586_v34 }
 0x2cb   : > { %v2589_v56 = vrot.slane %v2588_v61, 2 }
 0x2cd   : > { %v2590_v47 = vadd.f32 %v2589_v56, %v2588_v61 }
 0x2cf   : > { %v2591_v32 = vrot.slane %v2590_v47, 1 }
 0x2d1   : > { %v2592_v52 = vadd.f32 %v2591_v32, %v2590_v47 }
 0x2d3   : > { %v2600_v57 = vmul.f32 %v2599_v33, %v2592_v52 }
 0x2d5   : > { %v2601_v20 = vpack.c.bf16 %v2600_v57, %v2600_v57 }
 0x2d7   : > { %2674 = vmatmul.bf16.vlgmr.msra.gmra.mxu3 %v2601_v20 }
 0x35a   : > { %v2675_v22 = vpop.f32.mrf.mxu3 }
 0x35b   : > { %v2679_v37 = vmax.f32 %v2675_v22, 0.0 }
 0x35d   : > { %v2680_v13 = vpack.c.bf16 %v2679_v37, %v2679_v37 }
 0x35f   : > { %2753 = vmatmul.bf16.vlgmr.msrb.gmra.mxu3 %v2680_v13 }
 0x362   : > { %v2677_v43 = vpop.f32.mrf.mxu3 }
 0x3e2   : > { %v2754_v44 = vpop.f32.mrf.mxu3 }
 0x3e3   : > { %v3486_v40 = vmul.f32 -1.442695, %v2754_v44 }
 0x3e5   : > { %3745 = vpow2.f32 %v3486_v40 }
 0x3ea   : > { %v2756_v9 = vpop.f32.mrf.mxu3 }
 0x3eb   : > { %v3746_v55 = vpop.eup %3745 }
 0x3ec   : > { %v2761_v45 = vadd.f32 1.0, %v3746_v55 }
 0x3ee   : > { %3747 = vrcp.f32 %v2761_v45  ;;  %v2773_v14 = vand.u32 2147483648, %v2761_v45  ;;  %v2771_v38 = vand.u32 2147483647, %v2761_v45  ;;  %vm2767_vm15 = vweird.f32 %v2761_v45 }
 0x3f0   : > { %v2774_v54 = vor.u32 1.1754944e-38, %v2773_v14  ;;  %vm2772_vm1 = vcmp.eq.f32.partialorder %v2771_v38, 8.507059e+37 }
 0x3f4   : > { %v3748_v49 = vpop.eup %3747 }
 0x3f5   : > { %v2763_v50 = vmul.f32 %v3748_v49, %v2761_v45  ;;  %vm2768_vm14 = vweird.f32 %v3748_v49 }
 0x3f6   : > { %vm2769_vm0 = vmor %vm2767_vm15, %vm2768_vm14 }
 0x3f7   : > { %v2764_v17 = vsub.f32 1.0, %v2763_v50 }
 0x3f9   : > { %v2765_v53 = vmul.f32 %v3748_v49, %v2764_v17 }
 0x3fb   : > { %v2766_v58 = vadd.f32 %v3748_v49, %v2765_v53 }
 0x3fd   : > { %v2770_v59 = vsel %vm2769_vm0, %v3748_v49, %v2766_v58 }
 0x3fe   : > { %v2775_v24 = vsel %vm2772_vm1, %v2774_v54, %v2770_v59 }
 0x3ff   : > { %v2777_v31 = vperm.slane %v2775_v24, 0 }
 0x401   : > { %v2778_v0 = vmul.f32 %v2777_v31, %v4614_v11  ;;  %v2779_v36 = vmul.f32 %v2777_v31, %v4612_v7  ;;  %v2780_v60 = vmul.f32 %v2777_v31, %v4616_v12  ;;  %v2781_v39 = vmul.f32 %v2777_v31, %v4620_v46 }
 0x402   : > { %v2782_v2 = vmul.f32 %v2777_v31, %v4623_v48  ;;  %v2783_v3 = vmul.f32 %v2777_v31, %v4626_v23  ;;  %v2784_v42 = vmul.f32 %v2777_v31, %v4629_v5  ;;  %v2785_v41 = vmul.f32 %v2777_v31, %v4633_v10 }
 0x403   : > { %v2794_v34 = vadd.f32 %v2786_v6, %v2778_v0  ;;  %v2795_v62 = vadd.f32 %v2787_v19, %v2779_v36  ;;  %v2796_v26 = vadd.f32 %v2788_v30, %v2780_v60  ;;  %v2797_v51 = vadd.f32 %v2789_v8, %v2781_v39 }
 0x404   : > { %v2798_v7 = vadd.f32 %v2790_v1, %v2782_v2  ;;  %v2799_v11 = vadd.f32 %v2791_v29, %v2783_v3  ;;  %v2800_v12 = vadd.f32 %v2792_v16, %v2784_v42  ;;  %v2801_v46 = vadd.f32 %v2793_v21, %v2785_v41 }
 0x405   : > { %v2802_v48 = vmax.f32 %v2794_v34, 0.0  ;;  %v2803_v61 = vmax.f32 %v2795_v62, 0.0  ;;  %v2804_v23 = vmax.f32 %v2796_v26, 0.0  ;;  %v2805_v27 = vmax.f32 %v2797_v51, 0.0 }
 0x406   : > { %v2806_v5 = vmax.f32 %v2798_v7, 0.0  ;;  %v2807_v56 = vmax.f32 %v2799_v11, 0.0  ;;  %v2808_v10 = vmax.f32 %v2800_v12, 0.0  ;;  %v2809_v28 = vmax.f32 %v2801_v46, 0.0 }
 0x407   : > { %v3617_v47 = vpack.c.bf16 %v2803_v61, %v2802_v48  ;;  %v3622_v18 = vpack.c.bf16 %v2805_v27, %v2804_v23 }
 0x408   : > { %v3627_v32 = vpack.c.bf16 %v2807_v56, %v2806_v5  ;;  %v3632_v33 = vpack.c.bf16 %v2809_v28, %v2808_v10 }
 0x409   : > { %3618 = vst [vmem:[%s435_s19] sm:$0xff] %v3617_v47  }
 0x40a   : > { %3634 = vst [vmem:[%s435_s19 + $0x8] sm:$0xff] %v3622_v18  }
 0x40b   : > { %3635 = vst [vmem:[%s435_s19 + $0x10] sm:$0xff] %v3627_v32  }
 0x40c   : > { %3636 = vst [vmem:[%s435_s19 + $0x18] sm:$0xff] %v3632_v33  }
 0x40d   : > { %3956 = shalt.err (!%p3953_p9)
}
 0x40e   : > { %s4018_s27 = smov 64   ;;  %s4019_s29 = smov 4  }
 0x40f   : > { %3659 = dma.vmem_to_hbm [thread:$0]  (%p4171_p13), %s2840_s21, 512, %s2842_s5, %s2827_s26, %s4018_s27, %s4018_s27, %s4019_s29  }
 0x410 PF: > { %s2856_s16 = sand.u32 1, %s3995_s30   ;;  %p4719_p10 = scmp.ge.s32.totalorder %s4007_s12, 2 }
 0x411   : > { %s2857_s25 = scalar_lea.sflag [#allocation5], %s2856_s16 }
 0x412   : > { %p3682_p11 = pnand %p4719_p10, %p4176_p4 }
 0x414   : > { %p3683_p0 = pneg %p3682_p11 }
 0x416   : > { %3990 = dma.done.wait (%p3683_p0), %s2857_s25, 512  }
 0x417   : > { %3992 = vsyncadd (%p3683_p0), %s2857_s25, 4294966784  ;;  %p25_p2 = scmp.ge.s32.totalorder %s4151_s18, 4   ;;  %s4720_s30 = smov %s3999_s10 }
 0x418   : > { %s4721_s10 = smov %s4003_s11  ;;  %s4722_s11 = smov %s4163_s20 }
 0x419   : > { %s4723_s12 = smov %s4151_s18  ;;  %27 = sbr.rel (!%p25_p2) target bundleno = 12 (0xc), region = 132 }
 0x41e   :  { %2863 = vsyncpa [#allocation4], 1 }
 0x41f   :  { %2865 = vsyncpa [#allocation4 + $0x1], 1 }
 0x420   :  { %2866 = vsyncpa [#allocation7], 1 }
 0x421   :  { %2867 = vsyncpa [#allocation10], 1 }
 0x422   :  { %2868 = vsyncpa [#allocation13], 1 }
 0x423   :  { %2869 = vsyncpa [#allocation5], 1 }
 0x424   :  { %2871 = vsyncpa [#allocation5 + $0x1], 1 }

// kernel: tpu_custom_call.1
= control target key start
LH: loop header
LB: loop body
LE: loop exit
PB: predicated region body
PF: predicated region fallthrough
CT: control target
= control target key end

     0   :  { %s4683_s0 = inlined_call_operand.hbm [shape: bf16[2,64,128], index: 0, kind: input, shape index: {}]   ;;  %s4684_s1 = inlined_call_operand.hbm [shape: bf16[128,128], index: 1, kind: input, shape index: {}]   ;;  %s4685_s2 = inlined_call_operand.vmem [shape: f32[1,128], index: 2, kind: input, shape index: {}]   ;;  %s4686_s3 = inlined_call_operand.hbm [shape: bf16[9,128,128], index: 3, kind: input, shape index: {}]   ;;  %s4687_s4 = inlined_call_operand.vmem [shape: f32[1,128], index: 4, kind: input, shape index: {}]   ;;  %s4688_s5 = inlined_call_operand.hbm [shape: bf16[128,128], index: 5, kind: input, shape index: {}]   ;;  %s4689_s6 = inlined_call_operand.vmem [shape: f32[1,128], index: 6, kind: input, shape index: {}]   ;;  %s4690_s7 = inlined_call_operand.hbm [shape: bf16[128,128], index: 7, kind: input, shape index: {}]   ;;  %s4691_s8 = inlined_call_operand.hbm [shape: bf16[128,128], index: 8, kind: input, shape index: {}]   ;;  %s4692_s9 = inlined_call_operand.hbm [shape: bf16[2,64,128], index: 9, kind: output, shape index: {}]  }
   0x1   :  { %4695 = sst [smem:[#allocation20_spill]] %s4684_s1 }
   0x2   :  { %4696 = sst [smem:[#allocation21_spill]] %s4686_s3 }
   0x3   :  { %4697 = sst [smem:[#allocation22_spill]] %s4688_s5 }
   0x4   :  { %14 = vsyncpa [#allocation4], 0 }
   0x5   :  { %16 = vsyncpa [#allocation4 + $0x1], 0 }
   0x6   :  { %17 = vsyncpa [#allocation7], 0 }
   0x7   :  { %18 = vsyncpa [#allocation10], 0 }
   0x8   :  { %19 = vsyncpa [#allocation13], 0 }
   0x9   :  { %20 = vsyncpa [#allocation5], 0 }
   0xa   :  { %22 = vsyncpa [#allocation5 + $0x1], 0  ;;  %s4070_s30 = smov 0   ;;  %s4072_s10 = smov 0  }
   0xb   :  { %s4074_s11 = smov 0   ;;  %s4076_s12 = smov 0  }
   0xc LB: > { %s4698_s1 = sld [smem:[#allocation20_spill]]  ;;  %s4094_s16 = sadd.s32 4294967295, %s4007_s12   ;;  %s4007_s12 = sphi %s4076_s12, %s4723_s12   ;;  %s4003_s11 = sphi %s4074_s11, %s4722_s11   ;;  %s3999_s10 = sphi %s4072_s10, %s4721_s10   ;;  %s3995_s30 = sphi %s4070_s30, %s4720_s30  }
   0xd   : > { %p2964_p0 = scmp.ge.s32.totalorder %s4007_s12, 1  ;;  %p49_p1 = scmp.eq.s32.totalorder %s4094_s16, 0 }
   0xe   : > { %p253_p2 = scmp.lt.s32.totalorder %s4007_s12, 3  ;;  %s4009_s18 = smov [#allocation6]  }
   0xf   : > { %s266_s19 = sshll.u32 %s4009_s18, 4  ;;  %s4700_s5 = sld [smem:[#allocation22_spill]]  ;;  %s267_s19 = int_to_ptr.vmem [resolvable:$true] %s266_s19 }
  0x10   : > { %p4099_p3 = pnand %p2964_p0, %p253_p2  ;;  %s4702_s3 = sld [smem:[#allocation21_spill]] }
  0x11   : > { %s4010_s27 = smov [#allocation9]   ;;  %s4693_s29 = smov 64  }
  0x12   : > { %s264_s15 = sshll.u32 %s4698_s1, 4  ;;  %p3661_p4 = pneg %p4099_p3  ;;  %s265_s15 = int_to_ptr.hbm [resolvable:$true] %s264_s15 }
  0x13   : > { %s300_s28 = sshll.u32 %s4010_s27, 4  ;;  %s4694_s13 = smov 4   ;;  %s301_s28 = int_to_ptr.vmem [resolvable:$true] %s300_s28 }
  0x14   : > { %p4111_p6 = pnand %p3661_p4, %p49_p1  ;;  %s315_s20 = sshll.u32 %s4690_s7, 4  ;;  %s316_s20 = int_to_ptr.hbm [resolvable:$true] %s315_s20 }
  0x15   : > { %s298_s22 = sshll.u32 %s4700_s5, 4  ;;  %s4013_s21 = smov [#allocation8]   ;;  %s299_s22 = int_to_ptr.hbm [resolvable:$true] %s298_s22 }
  0x16   : > { %s281_s26 = sshll.u32 %s4702_s3, 4  ;;  %s283_s24 = sshll.u32 %s4013_s21, 4  ;;  %s282_s26 = int_to_ptr.hbm [resolvable:$true] %s281_s26  ;;  %s284_s24 = int_to_ptr.vmem [resolvable:$true] %s283_s24 }
  0x17   : > { %3664 = dma.hbm_to_vmem [thread:$0]  (!%p4111_p6), %s265_s15, 1024, %s267_s19, [#allocation7], %s4693_s29, %s4693_s29, %s4694_s13  }
  0x18   : > { %3670 = dma.hbm_to_vmem [thread:$0]  (!%p4111_p6), %s299_s22, 1024, %s301_s28, [#allocation10], %s4693_s29, %s4693_s29, %s4694_s13  }
  0x19   : > { %3667 = dma.hbm_to_vmem [thread:$0]  (!%p4111_p6), %s282_s26, 9216, %s284_s24, [#allocation7], %s4693_s29, %s4693_s29, %s4694_s13  }
  0x1a   : > { %s4014_s15 = smov [#allocation11]   ;;  %s329_s27 = sshll.u32 %s4691_s8, 4  ;;  %s330_s27 = int_to_ptr.hbm [resolvable:$true] %s329_s27 }
  0x1b   : > { %s317_s19 = sshll.u32 %s4014_s15, 4  ;;  %s4015_s26 = smov [#allocation12]   ;;  %s318_s19 = int_to_ptr.vmem [resolvable:$true] %s317_s19 }
  0x1c   : > { %3673 = dma.hbm_to_vmem [thread:$0]  (!%p4111_p6), %s316_s20, 1024, %s318_s19, [#allocation10], %s4693_s29, %s4693_s29, %s4694_s13  }
  0x1d   : > { %s331_s28 = sshll.u32 %s4015_s26, 4  ;;  %s2963_s14 = sadd.s32 4294967294, %s4007_s12   ;;  %s332_s28 = int_to_ptr.vmem [resolvable:$true] %s331_s28 }
  0x1e   : > { %3676 = dma.hbm_to_vmem [thread:$0]  (!%p4111_p6), %s330_s27, 1024, %s332_s28, [#allocation13], %s4693_s29, %s4693_s29, %s4694_s13  }
  0x1f   : > { %s4151_s18 = sadd.s32 1, %s4007_s12   ;;  %s35_s21 = sadd.s32 1, %s4003_s11 }
  0x20   : > { %s32_s24 = ssub.s32 %s4007_s12, %s4151_s18  ;;  %p42_p7 = scmp.ne.s32.totalorder %s4003_s11, %s3999_s10 }
  0x21   : > { %p33_p8 = scmp.eq.s32.totalorder %s32_s24, 0  ;;  %p43_p9 = scmp.eq.s32.totalorder %s4007_s12, 0 }
  0x22   : > { %p48_p10 = scmp.ne.s32.totalorder %s3999_s10, %s3995_s30  ;;  %p240_p11 = scmp.eq.s32.totalorder %s4094_s16, 1 }
  0x23   : > { %s4163_s20 = scalar_select %p33_p8, %s4003_s11, %s35_s21  }
  0x24   : > { %p4167_p12 = por %p49_p1, %p48_p10  ;;  %p4171_p13 = por %p240_p11, %p42_p7 }
  0x25   : > { %p246_p0 = scmp.eq.s32.totalorder %s2963_s14, 1  ;;  %p44_p2 = por %p43_p9, %p42_p7 }
  0x26   : > { %s345_s19 = sand.u32 1, %s4003_s11   ;;  %p3690_p6 = scmp.lt.s32.totalorder %s4007_s12, 2 }
  0x27   : > { %p4176_p4 = por %p246_p0, %p48_p10  ;;  %s2971_s25 = sshll.u32 %s345_s19, 5 }
  0x28   : > { %s3492_s27 = sshll.u32 %s4007_s12, 5  ;;  %s349_s29 = scalar_lea.vmem [#allocation3], %s2971_s25 }
  0x29   : > { %s354_s21 = scalar_lea.hbm %s4683_s0, %s3492_s27  ;;  %s357_s13 = sshll.u32 %s349_s29, 4  ;;  %s358_s13 = int_to_ptr.vmem [resolvable:$true] %s357_s13 }
  0x2a   : > { %s355_s24 = sshll.u32 %s354_s21, 4  ;;  %p4185_p8 = pnand %p3690_p6, %p44_p2  ;;  %s356_s24 = int_to_ptr.hbm [resolvable:$true] %s355_s24 }
  0x2b   : > { %s346_s1 = scalar_lea.sflag [#allocation4], %s345_s19  ;;  %s3899_s3 = sshra.s32 %s356_s24, 4  ;;  %s3900_s3 = int_to_ptr.hbm [resolvable:$true] %s3899_s3 }
  0x2c   : > { %s3901_s5 = scalar_lea.hbm %s3900_s3, 32  ;;  %p3903_p9 = pneg %p4185_p8 }
  0x2d   : > { %p3902_p7 = scmp.ne.s32.totalorder %s3900_s3, %s3901_s5  ;;  %s3906_s29 = scalar_lea.hbm %s4683_s0, 64 }
  0x2e   : > { %p3907_p0 = scmp.lt.s32.totalorder %s3900_s3, %s4683_s0  ;;  %p3908_p2 = scmp.lt.s32.totalorder %s3906_s29, %s3901_s5 }
  0x2f   : > { %p3904_p10 = pnand %p3903_p9, %p3902_p7 }
  0x30   : > { %p3909_p6 = por %p3908_p2, %p3907_p0 }
  0x31   : > { %p3905_p11 = pneg %p3904_p10 }
  0x33   : > { %p3910_p5 = pnand %p3909_p6, %p3905_p11 }
  0x35   : > { %3913 = shalt.err (!%p3910_p5)
}
  0x36   : > { %s4707_s19 = smov 4   ;;  %s4708_s21 = smov 64  }
  0x37   : > { %3680 = dma.hbm_to_vmem [thread:$0]  (!%p4185_p8), %s356_s24, 512, %s358_s13, %s346_s1, %s4708_s21, %s4708_s21, %s4707_s19  }
  0x38   : > { %369 = sbr.rel (%p4099_p3) target bundleno = 1040 (0x410), region = 56  ;;  %s4205_s27 = sand.u32 (!%p4099_p3), 1, %s3999_s10  }
  0x39   : > { %s2975_s3 = sshll.u32 (!%p4099_p3), %s4205_s27, 5  ;;  %s372_s5 = scalar_lea.sflag (!%p4099_p3), [#allocation4], %s4205_s27 }
  0x3a   : > { %s4211_s26 = scalar_lea.vmem (!%p4099_p3), [#allocation3], %s2975_s3 }
  0x3d   : > { %3974 = dma.done.wait (%p4167_p12), %s372_s5, 512  }
  0x3e   : > { %3976 = vsyncadd (%p4167_p12), %s372_s5, 4294966784 }
  0x3f   : > { %3978 = dma.done.wait (%p49_p1), [#allocation7], 10240  }
  0x40   : > { %3980 = vsyncadd (%p49_p1), [#allocation7], 4294957056 }
  0x41   : > { %3982 = dma.done.wait (%p49_p1), [#allocation10], 2048  }
  0x42   : > { %3984 = vsyncadd (%p49_p1), [#allocation10], 4294965248 }
  0x43   : > { %3986 = dma.done.wait (%p49_p1), [#allocation13], 1024  }
  0x44   : > { %3988 = vsyncadd (%p49_p1), [#allocation13], 4294966272  ;;  %v3504_v0 = vld [vmem:[#allocation6 + $0x38] sm:$0xff]  ;;  %v3503_v1 = vld [vmem:[#allocation6 + $0x30] sm:$0xff]  ;;  %vm587_vm0 = vcmask 1040384   ;;  %v4016_v29 = vmov 0  }
  0x45   : > { %533 = vmatpush.bf16.msra.mxu0 %v3504_v0  ;;  %v3502_v2 = vld [vmem:[#allocation6 + $0x28] sm:$0xff]  ;;  %v3501_v3 = vld [vmem:[#allocation6 + $0x20] sm:$0xff]  ;;  %v3500_v4 = vld [vmem:[#allocation6 + $0x18] sm:$0xff]  ;;  %vm588_vm1 = vsmask.f32 256  ;;  %vm741_vm5 = vcmask 1043456  }
  0x46   : > { %v3499_v5 = vld [vmem:[#allocation6 + $0x10] sm:$0xff]  ;;  %v3498_v6 = vld [vmem:[#allocation6 + $0x8] sm:$0xff]  ;;  %v3497_v7 = vld [vmem:[#allocation6] sm:$0xff]  ;;  %vm620_vm2 = vsmask.f32 7938  ;;  %vm1206_vm7 = vcmask 1042432  }
  0x47   : > { %v3493_v8 = vld [vmem:[%s4211_s26] sm:$0xff]  ;;  %v3494_v9 = vld [vmem:[%s4211_s26 + $0x8] sm:$0xff]  ;;  %v3516_v10 = vld [vmem:[#allocation8 + $0x38] sm:$0xff]  ;;  %582 = vst [vmem:[#allocation2] sm:$0xf] %v4016_v29  ;;  %vm1207_vm8 = vcmask 1046532  }
  0x48   : > { %v3532_v11 = vld [vmem:[#allocation8 + $0xb8] sm:$0xff]  ;;  %887 = vmatpush.bf16.msra.mxu1 %v3516_v10  ;;  %v3515_v12 = vld [vmem:[#allocation8 + $0x30] sm:$0xff]  ;;  %v3514_v15 = vld [vmem:[#allocation8 + $0x28] sm:$0xff]  ;;  %583 = vst [vmem:[#allocation2 + $0x4] sm:$0x1] %v4016_v29  ;;  %s3613_s29 = sshll.u32 %s4094_s16, 5 }
  0x49   : > { %534 = vmatpush.bf16.msra.mxu0 %v3503_v1  ;;  %1305 = vmatpush.bf16.msra.mxu3 %v3532_v11  ;;  %v3495_v13 = vld [vmem:[%s4211_s26 + $0x10] sm:$0xff]  ;;  %v3496_v14 = vld [vmem:[%s4211_s26 + $0x18] sm:$0xff]  ;;  %vm4233_vm3 = vmand %vm587_vm0, %vm588_vm1  ;;  %586 = vst [vmem:[#allocation2 + $0x4c] sm:$0x1] %v4016_v29  ;;  %vm949_vm10 = vsmask.f32 3328  ;;  %s2838_s28 = scalar_lea.hbm %s4692_s9, %s3613_s29 }
  0x4a   : > { %v3544_v16 = vld [vmem:[#allocation8 + $0xf8] sm:$0xff]  ;;  %v3531_v17 = vld [vmem:[#allocation8 + $0xb0] sm:$0xff]  ;;  %vm4240_vm4 = vmand %vm587_vm0, %vm620_vm2  ;;  %585 = vst [vmem:[#allocation2 + $0x48] sm:$0xf] %v4016_v29  ;;  %vm950_vm11 = vsmask.f32 7440 }
  0x4b   : > { %v593_v19 = vld [vmem:[#allocation2 + $0x8] sm:$0x1]  ;;  %v625_v20 = vld [vmem:[#allocation2 + $0xc] sm:$0x1]  ;;  %v3513_v24 = vld [vmem:[#allocation8 + $0x20] sm:$0xff]  ;;  %s435_s19 = scalar_lea.vmem [#allocation14], %s2975_s3 }
  0x4c   : > { %888 = vmatpush.bf16.msra.mxu1 %v3515_v12  ;;  %v594_v21 = vsel %vm4233_vm3, 0, %v593_v19  ;;  %v3524_v23 = vld [vmem:[#allocation8 + $0x78] sm:$0xff]  ;;  %v626_v25 = vsel %vm4240_vm4, 0, %v625_v20  ;;  %v3543_v26 = vld [vmem:[#allocation8 + $0xf0] sm:$0xff]  ;;  %v3530_v27 = vld [vmem:[#allocation8 + $0xa8] sm:$0xff]  ;;  %s2839_s21 = sshll.u32 %s435_s19, 4  ;;  %s2840_s21 = int_to_ptr.vmem [resolvable:$true] %s2839_s21 }
  0x4d   : > { %535 = vmatpush.bf16.msra.mxu0 %v3502_v2  ;;  %1306 = vmatpush.bf16.msra.mxu3 %v3531_v17  ;;  %595 = vst [vmem:[#allocation2 + $0x8] sm:$0x1] %v594_v21  ;;  %v3523_v28 = vld [vmem:[#allocation8 + $0x70] sm:$0xff]  ;;  %v3512_v30 = vld [vmem:[#allocation8 + $0x18] sm:$0xff]  ;;  %v3542_v31 = vld [vmem:[#allocation8 + $0xe8] sm:$0xff]  ;;  %s2841_s5 = sshll.u32 %s2838_s28, 4  ;;  %s2842_s5 = int_to_ptr.hbm [resolvable:$true] %s2841_s5 }
  0x4e   : > { %627 = vst [vmem:[#allocation2 + $0xc] sm:$0x1] %v626_v25  ;;  %1128 = vmatpush.bf16.msra.mxu2 %v3524_v23  ;;  %v3529_v32 = vld [vmem:[#allocation8 + $0xa0] sm:$0xff]  ;;  %v3522_v33 = vld [vmem:[#allocation8 + $0x68] sm:$0xff]  ;;  %v3511_v37 = vld [vmem:[#allocation8 + $0x10] sm:$0xff]  ;;  %s3943_s1 = sshra.s32 %s2842_s5, 4  ;;  %s3944_s1 = int_to_ptr.hbm [resolvable:$true] %s3943_s1 }
  0x4f   : > { %v596_v34 = vld [vmem:[#allocation2 + $0x10] sm:$0x1]  ;;  %v628_v36 = vld [vmem:[#allocation2 + $0x14] sm:$0x1]  ;;  %v3528_v40 = vld [vmem:[#allocation8 + $0x98] sm:$0xff]  ;;  %s3945_s17 = scalar_lea.hbm %s3944_s1, 32  ;;  %p3950_p12 = scmp.lt.s32.totalorder %s3944_s1, %s4692_s9 }
  0x50   : > { %889 = vmatpush.bf16.msra.mxu1 %v3514_v15  ;;  %v597_v35 = vsel %vm4233_vm3, 0, %v596_v34  ;;  %v629_v38 = vsel %vm4240_vm4, 0, %v628_v36  ;;  %v3541_v39 = vld [vmem:[#allocation8 + $0xe0] sm:$0xff]  ;;  %v590_v42 = vld [vmem:[#allocation2] sm:$0x1]  ;;  %v3510_v43 = vld [vmem:[#allocation8 + $0x8] sm:$0xff]  ;;  %p3946_p1 = scmp.ne.s32.totalorder %s3944_s1, %s3945_s17 }
  0x51   : > { %536 = vmatpush.bf16.msra.mxu0 %v3501_v3  ;;  %1307 = vmatpush.bf16.msra.mxu3 %v3530_v27  ;;  %598 = vst [vmem:[#allocation2 + $0x10] sm:$0x1] %v597_v35  ;;  %v3521_v41 = vld [vmem:[#allocation8 + $0x60] sm:$0xff]  ;;  %v3540_v44 = vld [vmem:[#allocation8 + $0xd8] sm:$0xff]  ;;  %v591_v45 = vsel %vm4233_vm3, 0, %v590_v42  ;;  %v3527_v47 = vld [vmem:[#allocation8 + $0x90] sm:$0xff] }
  0x52   : > { %1129 = vmatpush.bf16.msra.mxu2 %v3523_v28  ;;  %630 = vst [vmem:[#allocation2 + $0x14] sm:$0x1] %v629_v38  ;;  %v622_v46 = vld [vmem:[#allocation2 + $0x4] sm:$0x1]  ;;  %v3520_v49 = vld [vmem:[#allocation8 + $0x58] sm:$0xff]  ;;  %v3509_v52 = vld [vmem:[#allocation8] sm:$0xff]  ;;  %p3947_p3 = pnand %p3946_p1, %p4171_p13 }
  0x53   : > { %592 = vst [vmem:[#allocation2] sm:$0x1] %v591_v45  ;;  %v623_v48 = vsel %vm4240_vm4, 0, %v622_v46  ;;  %v599_v50 = vld [vmem:[#allocation2 + $0x18] sm:$0x1]  ;;  %v3539_v55 = vld [vmem:[#allocation8 + $0xd0] sm:$0xff]  ;;  %vm4274_vm6 = vmand %vm741_vm5, %vm620_vm2 }
  0x54   : > { %890 = vmatpush.bf16.msra.mxu1 %v3513_v24  ;;  %624 = vst [vmem:[#allocation2 + $0x4] sm:$0x1] %v623_v48  ;;  %v631_v51 = vld [vmem:[#allocation2 + $0x1c] sm:$0x1]  ;;  %v600_v53 = vsel %vm4233_vm3, 0, %v599_v50  ;;  %v3519_v57 = vld [vmem:[#allocation8 + $0x50] sm:$0xff]  ;;  %vm4285_vm9 = vmor %vm1206_vm7, %vm1207_vm8  ;;  %p3948_p5 = pneg %p3947_p3 }
  0x55   : > { %537 = vmatpush.bf16.msra.mxu0 %v3500_v4  ;;  %1308 = vmatpush.bf16.msra.mxu3 %v3529_v32  ;;  %v632_v54 = vsel %vm4240_vm4, 0, %v631_v51  ;;  %v3526_v56 = vld [vmem:[#allocation8 + $0x88] sm:$0xff]  ;;  %601 = vst [vmem:[#allocation2 + $0x18] sm:$0x1] %v600_v53  ;;  %v3525_v59 = vld [vmem:[#allocation8 + $0x80] sm:$0xff]  ;;  %v3551_v36 = vld [vmem:[#allocation8 + $0x130] sm:$0xff] }
  0x56   : > { %1130 = vmatpush.bf16.msra.mxu2 %v3522_v33  ;;  %633 = vst [vmem:[#allocation2 + $0x1c] sm:$0x1] %v632_v54  ;;  %v3538_v58 = vld [vmem:[#allocation8 + $0xc8] sm:$0xff]  ;;  %v602_v61 = vld [vmem:[#allocation2 + $0x20] sm:$0x1]  ;;  %v3537_v63 = vld [vmem:[#allocation8 + $0xc0] sm:$0xff] }
  0x57   : > { %v3518_v60 = vld [vmem:[#allocation8 + $0x48] sm:$0xff]  ;;  %v634_v62 = vld [vmem:[#allocation2 + $0x24] sm:$0x1]  ;;  %v4261_v0 = vld [vmem:[%s4685_s2] ss:$0 sm:$0xff]  ;;  %v603_v1 = vsel %vm4233_vm3, 0, %v602_v61 }
  0x58   : > { %891 = vmatpush.bf16.msra.mxu1 %v3512_v30  ;;  %v635_v2 = vsel %vm4240_vm4, 0, %v634_v62  ;;  %604 = vst [vmem:[#allocation2 + $0x20] sm:$0x1] %v603_v1  ;;  %v3517_v3 = vld [vmem:[#allocation8 + $0x40] sm:$0xff]  ;;  %v743_v21 = vld [vmem:[#allocation2 + $0x8] sm:$0xf]  ;;  %vm4304_vm12 = vmor %vm949_vm10, %vm950_vm11 }
  0x59   : > { %538 = vmatpush.bf16.msra.mxu0 %v3499_v5  ;;  %1309 = vmatpush.bf16.msra.mxu3 %v3528_v40  ;;  %636 = vst [vmem:[#allocation2 + $0x24] sm:$0x1] %v635_v2  ;;  %v746_v23 = vld [vmem:[#allocation2 + $0xc] sm:$0x1]  ;;  %v1165_v28 = vld [vmem:[#allocation2] sm:$0xe] }
  0x5a   : > { %1131 = vmatpush.bf16.msra.mxu2 %v3521_v41  ;;  %v3110_v34 = vrot.slane %v1165_v28, 9  ;;  %v608_v42 = vld [vmem:[#allocation2 + $0x30] sm:$0x1]  ;;  %v752_v50 = vld [vmem:[#allocation2 + $0x14] sm:$0x1]  ;;  %s3949_s23 = scalar_lea.hbm %s4692_s9, 64 }
  0x5b   : > { %v917_v33 = vld [vmem:[#allocation2 + $0x4] sm:$0x1]  ;;  %v749_v45 = vld [vmem:[#allocation2 + $0x10] sm:$0xf]  ;;  %v609_v48 = vsel %vm4233_vm3, 0, %v608_v42  ;;  %p3951_p8 = scmp.lt.s32.totalorder %s3949_s23, %s3945_s17 }
  0x5c   : > { %892 = vmatpush.bf16.msra.mxu1 %v3511_v37  ;;  %v1211_v41 = vrot.slane %v917_v33, 5  ;;  %v962_v51 = vshll.u32 %v917_v33, 16  ;;  %610 = vst [vmem:[#allocation2 + $0x30] sm:$0x1] %v609_v48  ;;  %v3549_v48 = vld [vmem:[#allocation8 + $0x120] sm:$0xff] }
  0x5d   : > { %539 = vmatpush.bf16.msra.mxu0 %v3498_v6  ;;  %1310 = vmatpush.bf16.msra.mxu3 %v3527_v47  ;;  %p3952_p7 = por %p3951_p8, %p3950_p12 }
  0x5e   : > { %1132 = vmatpush.bf16.msra.mxu2 %v3520_v49 }
  0x5f   : > { %p3953_p9 = pnand %p3952_p7, %p3948_p5 }
  0x60   : > { %893 = vmatpush.bf16.msra.mxu1 %v3510_v43  ;;  %v640_v43 = vld [vmem:[#allocation2 + $0x34] sm:$0x1] }
  0x61   : > { %540 = vmatpush.bf16.msra.mxu0 %v3497_v7  ;;  %1311 = vmatpush.bf16.msra.mxu3 %v3526_v56  ;;  %v605_v7 = vld [vmem:[#allocation2 + $0x28] sm:$0x1]  ;;  %v641_v49 = vsel %vm4240_vm4, 0, %v640_v43 }
  0x62   : > { %1133 = vmatpush.bf16.msra.mxu2 %v3519_v57  ;;  %v606_v10 = vsel %vm4233_vm3, 0, %v605_v7  ;;  %642 = vst [vmem:[#allocation2 + $0x34] sm:$0x1] %v641_v49  ;;  %v1212_v57 = vsel %vm4285_vm9, %v3110_v34, %v1211_v41  ;;  %v761_v49 = vld [vmem:[#allocation2 + $0x20] sm:$0xf] }
  0x63   : > { %607 = vst [vmem:[#allocation2 + $0x28] sm:$0x1] %v606_v10 }
  0x64   : > { %541 = vmatmul.bf16.vlgmr.msra.gmra.mxu0 %v3493_v8  ;;  %894 = vmatpush.bf16.msra.mxu1 %v3509_v52  ;;  %v637_v8 = vld [vmem:[#allocation2 + $0x2c] sm:$0x1] }
  0x65   : > { %1439 = vmatpush.bf16.msrb.mxu0 %v3544_v16  ;;  %1312 = vmatpush.bf16.msra.mxu3 %v3525_v59  ;;  %v638_v11 = vsel %vm4240_vm4, 0, %v637_v8 }
  0x66   : > { %1134 = vmatpush.bf16.msra.mxu2 %v3518_v60  ;;  %639 = vst [vmem:[#allocation2 + $0x2c] sm:$0x1] %v638_v11  ;;  %v3550_v11 = vld [vmem:[#allocation8 + $0x128] sm:$0xff] }
  0x69   : > { %1440 = vmatpush.bf16.msrb.mxu0 %v3543_v26 }
  0x6a   : > { %1135 = vmatpush.bf16.msra.mxu2 %v3517_v3 }
  0x6d   : > { %1441 = vmatpush.bf16.msrb.mxu0 %v3542_v31 }
  0x71   : > { %1442 = vmatpush.bf16.msrb.mxu0 %v3541_v39 }
  0x74   : > { %546 = vmatmul.bf16.gmra.mxu0 %v3494_v9 }
  0x75   : > { %1443 = vmatpush.bf16.msrb.mxu0 %v3540_v44 }
  0x79   : > { %1444 = vmatpush.bf16.msrb.mxu0 %v3539_v55  ;;  %v3032_v55 = vld [vmem:[#allocation2] sm:$0xf] }
  0x7d   : > { %1445 = vmatpush.bf16.msrb.mxu0 %v3538_v58 }
  0x81   : > { %1446 = vmatpush.bf16.msrb.mxu0 %v3537_v63 }
  0x84   : > { %551 = vmatmul.bf16.gmra.mxu0 %v3495_v13  ;;  %v3552_v13 = vld [vmem:[#allocation8 + $0x138] sm:$0xff] }
  0x85   : > { %1685 = vmatpush.bf16.msrb.mxu1 %v3552_v13 }
  0x89   : > { %1686 = vmatpush.bf16.msrb.mxu1 %v3551_v36 }
  0x8d   : > { %1687 = vmatpush.bf16.msrb.mxu1 %v3550_v11  ;;  %v3580_v11 = vld [vmem:[#allocation8 + $0x1f8] sm:$0xff] }
  0x8e   : > { %2240 = vmatpush.bf16.msra.mxu0 %v3580_v11 }
  0x91   : > { %1688 = vmatpush.bf16.msrb.mxu1 %v3549_v48 }
  0x94   : > { %556 = vmatmul.bf16.gmra.mxu0 %v3496_v14  ;;  %v916_v14 = vld [vmem:[#allocation2] sm:$0xf] }
  0x95   : > { %v953_v24 = vshrl.u32 %v916_v14, 16  ;;  %v956_v29 = vshll.u32 %v916_v14, 16  ;;  %v755_v14 = vld [vmem:[#allocation2 + $0x18] sm:$0xf] }
  0x97   : > { %v955_v37 = vrot.slane %v953_v24, 4  ;;  %v958_v38 = vrot.slane %v956_v29, 5 }
  0x99   : > { %v959_v56 = vor.u32 %v958_v38, %v955_v37 }
  0xe1   : > { %v542_v4 = vpop.f32.mrf.mxu0 }
  0xe2   : > { %v566_v5 = vadd.f32 %v4261_v0, %v542_v4 }
  0xe4   : > { %v574_v6 = vmax.f32 %v566_v5, 0.0  ;;  %v960_v5 = vrot.slane %v959_v56, 4 }
  0xe6   : > { %v652_v9 = vpack.c.bf16 %v574_v6, %v574_v6  ;;  %v964_v6 = vrot.slane %v962_v51, 5 }
  0xe8   : > { %v661_v12 = vshrl.u32 %v652_v9, 16  ;;  %v664_v17 = vshll.u32 %v652_v9, 16  ;;  %v1241_v9 = vunpack.c.l.b16 %v1212_v57  ;;  %v965_v34 = vsel %vm4304_vm12, %v960_v5, %v964_v6 }
  0xe9   : > { %v544_v15 = vpop.f32.mrf.mxu0 }
  0xea   : > { %v663_v16 = vrot.slane %v661_v12, 7  ;;  %v567_v19 = vadd.f32 %v4261_v0, %v544_v15  ;;  %v611_v12 = vld [vmem:[#allocation2 + $0x38] sm:$0x1]  ;;  %v758_v15 = vld [vmem:[#allocation2 + $0x1c] sm:$0x1] }
  0xec   : > { %v666_v25 = vor.u32 %v664_v17, %v663_v16  ;;  %v667_v26 = vrot.slane %v663_v16, 4  ;;  %v575_v27 = vmax.f32 %v567_v19, 0.0 }
  0xee   : > { %v744_v30 = vsel %vm4274_vm6, %v666_v25, %v743_v21  ;;  %v747_v31 = vsel %vm4233_vm3, %v667_v26, %v746_v23  ;;  %v653_v32 = vpack.c.bf16 %v575_v27, %v575_v27  ;;  %v612_v26 = vsel %vm4233_vm3, 0, %v611_v12  ;;  %v643_v27 = vld [vmem:[#allocation2 + $0x3c] sm:$0x1] }
  0xef   : > { %745 = vst [vmem:[#allocation2 + $0x8] sm:$0xf] %v744_v30  ;;  %v644_v41 = vsel %vm4240_vm4, 0, %v643_v27  ;;  %v3571_v27 = vld [vmem:[#allocation8 + $0x1b0] sm:$0xff] }
  0xf0   : > { %748 = vst [vmem:[#allocation2 + $0xc] sm:$0x1] %v747_v31  ;;  %v669_v35 = vshrl.u32 %v653_v32, 16  ;;  %v672_v39 = vshll.u32 %v653_v32, 16 }
  0xf1   : > { %v547_v40 = vpop.f32.mrf.mxu0  ;;  %613 = vst [vmem:[#allocation2 + $0x38] sm:$0x1] %v612_v26 }
  0xf2   : > { %v671_v44 = vrot.slane %v669_v35, 7  ;;  %v568_v46 = vadd.f32 %v4261_v0, %v547_v40  ;;  %645 = vst [vmem:[#allocation2 + $0x3c] sm:$0x1] %v644_v41 }
  0xf4   : > { %v674_v52 = vor.u32 %v672_v39, %v671_v44  ;;  %v675_v53 = vrot.slane %v671_v44, 4  ;;  %v576_v54 = vmax.f32 %v568_v46, 0.0 }
  0xf6   : > { %v750_v58 = vsel %vm4274_vm6, %v674_v52, %v749_v45  ;;  %v753_v59 = vsel %vm4233_vm3, %v675_v53, %v752_v50  ;;  %v654_v60 = vpack.c.bf16 %v576_v54, %v576_v54  ;;  %v3505_v61 = vld [vmem:[#allocation2 + $0x4] sm:$0xf0]  ;;  %v1064_v52 = vunpack.c.l.b16 %v965_v34  ;;  %v770_v34 = vld [vmem:[#allocation2 + $0x2c] sm:$0x1] }
  0xf7   : > { %v1166_v62 = vld [vmem:[#allocation2 + $0x8] sm:$0xe]  ;;  %751 = vst [vmem:[#allocation2 + $0x10] sm:$0xf] %v750_v58  ;;  %v3033_v63 = vor.u32 %v3505_v61, %v3032_v55  ;;  %v919_v1 = vld [vmem:[#allocation2 + $0xc] sm:$0x1] }
  0xf8   : > { %v3111_v2 = vrot.slane %v1166_v62, 9  ;;  %754 = vst [vmem:[#allocation2 + $0x14] sm:$0x1] %v753_v59  ;;  %v677_v3 = vshrl.u32 %v654_v60, 16  ;;  %v1215_v4 = vrot.slane %v919_v1, 5  ;;  %v680_v7 = vshll.u32 %v654_v60, 16 }
  0xf9   : > { %v549_v8 = vpop.f32.mrf.mxu0  ;;  %895 = vmatmul.bf16.vlgmr.msra.gmra.mxu1 %v3033_v63  ;;  %v918_v10 = vld [vmem:[#allocation2 + $0x8] sm:$0xf]  ;;  %v976_v25 = vshll.u32 %v919_v1, 16  ;;  %v614_v59 = vld [vmem:[#allocation2 + $0x40] sm:$0x1] }
  0xfa   : > { %v679_v13 = vrot.slane %v677_v3, 7  ;;  %v569_v16 = vadd.f32 %v4261_v0, %v549_v8  ;;  %v1216_v17 = vsel %vm4285_vm9, %v3111_v2, %v1215_v4  ;;  %v967_v21 = vshrl.u32 %v918_v10, 16  ;;  %v3152_v33 = vld [vmem:[#allocation2 + $0x8] sm:$0xf]  ;;  %v764_v60 = vld [vmem:[#allocation2 + $0x24] sm:$0x1] }
  0xfb   : > { %v1242_v23 = vunpack.c.l.b16 %v1216_v17  ;;  %v970_v24 = vshll.u32 %v918_v10, 16  ;;  %v978_v44 = vrot.slane %v976_v25, 5  ;;  %v3572_v2 = vld [vmem:[#allocation8 + $0x1b8] sm:$0xff]  ;;  %v646_v10 = vld [vmem:[#allocation2 + $0x44] sm:$0x1] }
  0xfc   : > { %v682_v28 = vor.u32 %v680_v7, %v679_v13  ;;  %v683_v29 = vrot.slane %v679_v13, 4  ;;  %v577_v30 = vmax.f32 %v569_v16, 0.0  ;;  %v969_v31 = vrot.slane %v967_v21, 4  ;;  %1994 = vmatpush.bf16.msrb.mxu3 %v3572_v2 }
  0xfd   : > { %v1249_v32 = vpack.c.b16 %v1242_v23, %v1241_v9  ;;  %v972_v35 = vrot.slane %v970_v24, 5  ;;  %v615_v9 = vsel %vm4233_vm3, 0, %v614_v59 }
  0xfe   : > { %v756_v36 = vsel %vm4274_vm6, %v682_v28, %v755_v14  ;;  %v759_v37 = vsel %vm4233_vm3, %v683_v29, %v758_v15  ;;  %v655_v38 = vpack.c.bf16 %v577_v30, %v577_v30  ;;  %v3533_v39 = vld [vmem:[#allocation2 + $0xc] sm:$0xf0]  ;;  %616 = vst [vmem:[#allocation2 + $0x40] sm:$0x1] %v615_v9 }
  0xff   : > { %v1167_v40 = vld [vmem:[#allocation2 + $0x10] sm:$0xe]  ;;  %757 = vst [vmem:[#allocation2 + $0x18] sm:$0xf] %v756_v36  ;;  %1313 = vmatmul.bf16.vlgmr.msra.gmra.mxu3 %v1249_v32  ;;  %v3153_v42 = vor.u32 %v3533_v39, %v3152_v33  ;;  %v973_v43 = vor.u32 %v972_v35, %v969_v31  ;;  %v4318_v46 = vld [vmem:[#allocation2 + $0x14] sm:$0x1] }
 0x100   : > { %760 = vst [vmem:[#allocation2 + $0x1c] sm:$0x1] %v759_v37  ;;  %v685_v45 = vshrl.u32 %v655_v38, 16  ;;  %v3112_v53 = vrot.slane %v1167_v40, 9  ;;  %v920_v54 = vld [vmem:[#allocation2 + $0x10] sm:$0xf]  ;;  %1995 = vmatpush.bf16.msrb.mxu3 %v3571_v27 }
 0x101   : > { %v552_v50 = vpop.f32.mrf.mxu0  ;;  %1447 = vmatmul.bf16.vlgmr.msrb.gmra.mxu0 %v3153_v42  ;;  %v974_v51 = vrot.slane %v973_v43, 4  ;;  %v688_v56 = vshll.u32 %v655_v38, 16  ;;  %v981_v58 = vshrl.u32 %v920_v54, 16  ;;  %v1219_v62 = vrot.slane %v4318_v46, 5  ;;  %v3036_v16 = vld [vmem:[#allocation2 + $0x10] sm:$0xf] }
 0x102   : > { %v687_v55 = vrot.slane %v685_v45, 7  ;;  %v570_v57 = vadd.f32 %v4261_v0, %v552_v50  ;;  %v984_v63 = vshll.u32 %v920_v54, 16  ;;  %v990_v1 = vshll.u32 %v4318_v46, 16  ;;  %v767_v33 = vld [vmem:[#allocation2 + $0x28] sm:$0xf]  ;;  %v3547_v50 = vld [vmem:[#allocation8 + $0x110] sm:$0xff] }
 0x103   : > { %v979_v61 = vsel %vm4304_vm12, %v974_v51, %v978_v44  ;;  %v983_v7 = vrot.slane %v981_v58, 4  ;;  %v1220_v29 = vsel %vm4285_vm9, %v3112_v53, %v1219_v62  ;;  %v647_v31 = vsel %vm4240_vm4, 0, %v646_v10  ;;  %v3548_v39 = vld [vmem:[#allocation8 + $0x118] sm:$0xff]  ;;  %v3579_v51 = vld [vmem:[#allocation8 + $0x1f0] sm:$0xff]  ;;  %v3546_v10 = vld [vmem:[#allocation8 + $0x108] sm:$0xff] }
 0x104   : > { %v690_v3 = vor.u32 %v688_v56, %v687_v55  ;;  %v691_v4 = vrot.slane %v687_v55, 4  ;;  %v578_v5 = vmax.f32 %v570_v57, 0.0  ;;  %v1065_v6 = vunpack.c.l.b16 %v979_v61  ;;  %v3560_v44 = vld [vmem:[#allocation8 + $0x178] sm:$0xff]  ;;  %648 = vst [vmem:[#allocation2 + $0x44] sm:$0x1] %v647_v31  ;;  %1689 = vmatpush.bf16.msrb.mxu1 %v3548_v39  ;;  %v3559_v57 = vld [vmem:[#allocation8 + $0x170] sm:$0xff]  ;;  %2241 = vmatpush.bf16.msra.mxu0 %v3579_v51 }
 0x105   : > { %v986_v8 = vrot.slane %v984_v63, 5  ;;  %v1243_v45 = vunpack.c.l.b16 %v1220_v29  ;;  %1859 = vmatpush.bf16.msrb.mxu2 %v3560_v44  ;;  %v3569_v61 = vld [vmem:[#allocation8 + $0x1a0] sm:$0xff]  ;;  %v3558_v46 = vld [vmem:[#allocation8 + $0x168] sm:$0xff]  ;;  %v3576_v44 = vld [vmem:[#allocation8 + $0x1d8] sm:$0xff] }
 0x106   : > { %v762_v12 = vsel %vm4274_vm6, %v690_v3, %v761_v49  ;;  %v765_v13 = vsel %vm4233_vm3, %v691_v4, %v764_v60  ;;  %v656_v14 = vpack.c.bf16 %v578_v5, %v578_v5  ;;  %v1072_v15 = vpack.c.b16 %v1065_v6, %v1064_v52  ;;  %v3506_v17 = vld [vmem:[#allocation2 + $0x14] sm:$0xf0]  ;;  %v3577_v27 = vld [vmem:[#allocation8 + $0x1e0] sm:$0xff] }
 0x107   : > { %v1168_v21 = vld [vmem:[#allocation2 + $0x18] sm:$0xe]  ;;  %763 = vst [vmem:[#allocation2 + $0x20] sm:$0xf] %v762_v12  ;;  %v3037_v23 = vor.u32 %v3506_v17, %v3036_v16  ;;  %v4331_v24 = vld [vmem:[#allocation2 + $0x1c] sm:$0x1]  ;;  %v987_v26 = vor.u32 %v986_v8, %v983_v7 }
 0x108   : > { %v3113_v25 = vrot.slane %v1168_v21, 9  ;;  %766 = vst [vmem:[#allocation2 + $0x24] sm:$0x1] %v765_v13  ;;  %v693_v28 = vshrl.u32 %v656_v14, 16  ;;  %1136 = vmatmul.bf16.vlgmr.msra.gmra.mxu2 %v1072_v15  ;;  %v1223_v30 = vrot.slane %v4331_v24, 5  ;;  %v696_v32 = vshll.u32 %v656_v14, 16  ;;  %1690 = vmatpush.bf16.msrb.mxu1 %v3547_v50 }
 0x109   : > { %v554_v35 = vpop.f32.mrf.mxu0  ;;  %900 = vmatmul.bf16.gmra.mxu1 %v3037_v23  ;;  %v922_v36 = vld [vmem:[#allocation2 + $0x18] sm:$0xf]  ;;  %v4338_v37 = vrot.slane %v987_v26, 4  ;;  %v1004_v38 = vshll.u32 %v4331_v24, 16  ;;  %v992_v4 = vrot.slane %v990_v1, 5  ;;  %1860 = vmatpush.bf16.msrb.mxu2 %v3559_v57  ;;  %v3568_v21 = vld [vmem:[#allocation8 + $0x198] sm:$0xff] }
 0x10a   : > { %v695_v40 = vrot.slane %v693_v28, 7  ;;  %v571_v41 = vadd.f32 %v4261_v0, %v554_v35  ;;  %v1224_v42 = vsel %vm4285_vm9, %v3113_v25, %v1223_v30  ;;  %v995_v43 = vshrl.u32 %v922_v36, 16  ;;  %v3570_v52 = vld [vmem:[#allocation8 + $0x1a8] sm:$0xff]  ;;  %v773_v28 = vld [vmem:[#allocation2 + $0x30] sm:$0xf] }
 0x10b   : > { %v1244_v48 = vunpack.c.l.b16 %v1224_v42  ;;  %v998_v49 = vshll.u32 %v922_v36, 16  ;;  %v3156_v59 = vld [vmem:[#allocation2 + $0x18] sm:$0xf]  ;;  %1996 = vmatpush.bf16.msrb.mxu3 %v3570_v52  ;;  %v993_v12 = vsel %vm4304_vm12, %v4338_v37, %v992_v4  ;;  %v1006_v13 = vrot.slane %v1004_v38, 5  ;;  %v776_v29 = vld [vmem:[#allocation2 + $0x34] sm:$0x1] }
 0x10c   : > { %v698_v53 = vor.u32 %v696_v32, %v695_v40  ;;  %v699_v54 = vrot.slane %v695_v40, 4  ;;  %v579_v55 = vmax.f32 %v571_v41, 0.0  ;;  %v997_v56 = vrot.slane %v995_v43, 4  ;;  %v3578_v6 = vld [vmem:[#allocation8 + $0x1e8] sm:$0xff]  ;;  %1691 = vmatpush.bf16.msrb.mxu1 %v3546_v10  ;;  %v4359_v38 = vld [vmem:[#allocation2 + $0x8] sm:$0xf] }
 0x10d   : > { %v1250_v58 = vpack.c.b16 %v1244_v48, %v1243_v45  ;;  %v1000_v60 = vrot.slane %v998_v49, 5  ;;  %2242 = vmatpush.bf16.msra.mxu0 %v3578_v6  ;;  %v1066_v31 = vunpack.c.l.b16 %v993_v12  ;;  %1861 = vmatpush.bf16.msrb.mxu2 %v3558_v46  ;;  %v3557_v43 = vld [vmem:[#allocation8 + $0x160] sm:$0xff]  ;;  %v3556_v4 = vld [vmem:[#allocation8 + $0x158] sm:$0xff]  ;;  %v3566_v12 = vld [vmem:[#allocation8 + $0x188] sm:$0xff] }
 0x10e   : > { %v768_v62 = vsel %vm4274_vm6, %v698_v53, %v767_v33  ;;  %v771_v63 = vsel %vm4233_vm3, %v699_v54, %v770_v34  ;;  %v657_v2 = vpack.c.bf16 %v579_v55, %v579_v55  ;;  %v3534_v3 = vld [vmem:[#allocation2 + $0x1c] sm:$0xf0]  ;;  %v3545_v33 = vld [vmem:[#allocation8 + $0x100] sm:$0xff]  ;;  %v782_v46 = vld [vmem:[#allocation2 + $0x3c] sm:$0x1] }
 0x10f   : > { %v1169_v5 = vld [vmem:[#allocation2 + $0x20] sm:$0xe]  ;;  %769 = vst [vmem:[#allocation2 + $0x28] sm:$0xf] %v768_v62  ;;  %1318 = vmatmul.bf16.gmra.mxu3 %v1250_v58  ;;  %v3157_v7 = vor.u32 %v3534_v3, %v3156_v59  ;;  %v1001_v8 = vor.u32 %v1000_v60, %v997_v56  ;;  %v4350_v9 = vld [vmem:[#allocation2 + $0x24] sm:$0x1] }
 0x110   : > { %772 = vst [vmem:[#allocation2 + $0x2c] sm:$0x1] %v771_v63  ;;  %v701_v11 = vshrl.u32 %v657_v2, 16  ;;  %v3114_v15 = vrot.slane %v1169_v5, 9  ;;  %v1227_v16 = vrot.slane %v4350_v9, 5  ;;  %1997 = vmatpush.bf16.msrb.mxu3 %v3569_v61  ;;  %v704_v24 = vshll.u32 %v657_v2, 16  ;;  %1692 = vmatpush.bf16.msrb.mxu1 %v3545_v33 }
 0x111   : > { %v557_v1 = vpop.f32.mrf.mxu0  ;;  %1452 = vmatmul.bf16.gmra.mxu0 %v3157_v7  ;;  %v1002_v14 = vrot.slane %v1001_v8, 4  ;;  %v924_v17 = vld [vmem:[#allocation2 + $0x20] sm:$0xf]  ;;  %v779_v61 = vld [vmem:[#allocation2 + $0x38] sm:$0xf]  ;;  %v1018_v3 = vshll.u32 %v4350_v9, 16  ;;  %1862 = vmatpush.bf16.msrb.mxu2 %v3557_v43 }
 0x112   : > { %v703_v23 = vrot.slane %v701_v11, 7  ;;  %v572_v25 = vadd.f32 %v4261_v0, %v557_v1  ;;  %v1009_v26 = vshrl.u32 %v924_v17, 16  ;;  %v1012_v32 = vshll.u32 %v924_v17, 16  ;;  %v3040_v39 = vld [vmem:[#allocation2 + $0x20] sm:$0xf]  ;;  %2243 = vmatpush.bf16.msra.mxu0 %v3577_v27 }
 0x113   : > { %v1007_v30 = vsel %vm4304_vm12, %v1002_v14, %v1006_v13  ;;  %v1228_v40 = vsel %vm4285_vm9, %v3114_v15, %v1227_v16  ;;  %v3567_v53 = vld [vmem:[#allocation8 + $0x190] sm:$0xff]  ;;  %v1510_v5 = vshrl.u32 %v4359_v38, 16  ;;  %v3588_v13 = vld [vmem:[#allocation8 + $0x238] sm:$0xff]  ;;  %v1020_v33 = vrot.slane %v1018_v3, 5 }
 0x114   : > { %v706_v34 = vor.u32 %v704_v24, %v703_v23  ;;  %v707_v35 = vrot.slane %v703_v23, 4  ;;  %v580_v36 = vmax.f32 %v572_v25, 0.0  ;;  %v1067_v37 = vunpack.c.l.b16 %v1007_v30  ;;  %1998 = vmatpush.bf16.msrb.mxu3 %v3568_v21  ;;  %v3575_v11 = vld [vmem:[#allocation8 + $0x1d0] sm:$0xff]  ;;  %2414 = vmatpush.bf16.msra.mxu1 %v3588_v13  ;;  %v3553_v13 = vld [vmem:[#allocation8 + $0x140] sm:$0xff] }
 0x115   : > { %v1011_v41 = vrot.slane %v1009_v26, 4  ;;  %v1014_v42 = vrot.slane %v1012_v32, 5  ;;  %v1245_v63 = vunpack.c.l.b16 %v1228_v40  ;;  %1863 = vmatpush.bf16.msrb.mxu2 %v3556_v4  ;;  %v3555_v27 = vld [vmem:[#allocation8 + $0x150] sm:$0xff]  ;;  %v4382_v40 = vrot.slane %v1510_v5, 4 }
 0x116   : > { %v774_v45 = vsel %vm4274_vm6, %v706_v34, %v773_v28  ;;  %v777_v48 = vsel %vm4233_vm3, %v707_v35, %v776_v29  ;;  %v658_v49 = vpack.c.bf16 %v580_v36, %v580_v36  ;;  %v1073_v50 = vpack.c.b16 %v1067_v37, %v1066_v31  ;;  %v3507_v51 = vld [vmem:[#allocation2 + $0x24] sm:$0xf0]  ;;  %2244 = vmatpush.bf16.msra.mxu0 %v3576_v44  ;;  %v3574_v28 = vld [vmem:[#allocation8 + $0x1c8] sm:$0xff]  ;;  %v3565_v35 = vld [vmem:[#allocation8 + $0x180] sm:$0xff] }
 0x117   : > { %v1170_v52 = vld [vmem:[#allocation2 + $0x28] sm:$0xe]  ;;  %775 = vst [vmem:[#allocation2 + $0x30] sm:$0xf] %v774_v45  ;;  %v3041_v54 = vor.u32 %v3507_v51, %v3040_v39  ;;  %v4367_v55 = vld [vmem:[#allocation2 + $0x2c] sm:$0x1]  ;;  %v1015_v57 = vor.u32 %v1014_v42, %v1011_v41 }
 0x118   : > { %v3115_v56 = vrot.slane %v1170_v52, 9  ;;  %778 = vst [vmem:[#allocation2 + $0x34] sm:$0x1] %v777_v48  ;;  %v709_v58 = vshrl.u32 %v658_v49, 16  ;;  %1141 = vmatmul.bf16.gmra.mxu2 %v1073_v50  ;;  %v1231_v59 = vrot.slane %v4367_v55, 5  ;;  %v712_v60 = vshll.u32 %v658_v49, 16  ;;  %1999 = vmatpush.bf16.msrb.mxu3 %v3567_v53 }
 0x119   : > { %v559_v62 = vpop.f32.mrf.mxu0  ;;  %905 = vmatmul.bf16.gmra.mxu1 %v3041_v54  ;;  %v926_v2 = vld [vmem:[#allocation2 + $0x28] sm:$0xf]  ;;  %v1016_v14 = vrot.slane %v1015_v57, 4  ;;  %v1032_v15 = vshll.u32 %v4367_v55, 16  ;;  %v1513_v41 = vshll.u32 %v4359_v38, 16  ;;  %v3554_v49 = vld [vmem:[#allocation8 + $0x148] sm:$0xff]  ;;  %1864 = vmatpush.bf16.msrb.mxu2 %v3555_v27 }
 0x11a   : > { %v711_v6 = vrot.slane %v709_v58, 7  ;;  %v573_v7 = vadd.f32 %v4261_v0, %v559_v62  ;;  %v1232_v8 = vsel %vm4285_vm9, %v3115_v56, %v1231_v59  ;;  %v1023_v10 = vshrl.u32 %v926_v2, 16  ;;  %v1478_v0 = vld [vmem:[#allocation2 + $0x10] sm:$0xf]  ;;  %v3160_v25 = vld [vmem:[#allocation2 + $0x28] sm:$0xf]  ;;  %2245 = vmatpush.bf16.msra.mxu0 %v3575_v11 }
 0x11b   : > { %v1246_v1 = vunpack.c.l.b16 %v1232_v8  ;;  %v1026_v9 = vshll.u32 %v926_v2, 16  ;;  %v1021_v43 = vsel %vm4304_vm12, %v1016_v14, %v1020_v33  ;;  %v1034_v44 = vrot.slane %v1032_v15, 5  ;;  %v4387_v48 = vld [vmem:[#allocation2 + $0xc] sm:$0x1]  ;;  %v3573_v58 = vld [vmem:[#allocation8 + $0x1c0] sm:$0xff]  ;;  %v3587_v59 = vld [vmem:[#allocation8 + $0x230] sm:$0xff] }
 0x11c   : > { %v714_v16 = vor.u32 %v712_v60, %v711_v6  ;;  %v715_v17 = vrot.slane %v711_v6, 4  ;;  %v581_v21 = vmax.f32 %v573_v7, 0.0  ;;  %v1025_v23 = vrot.slane %v1023_v10, 4  ;;  %2000 = vmatpush.bf16.msrb.mxu3 %v3566_v12  ;;  %v785_v60 = vld [vmem:[#allocation2 + $0x40] sm:$0xf]  ;;  %2415 = vmatpush.bf16.msra.mxu1 %v3587_v59 }
 0x11d   : > { %v1251_v24 = vpack.c.b16 %v1246_v1, %v1245_v63  ;;  %v1028_v26 = vrot.slane %v1026_v9, 5  ;;  %v1524_v53 = vshrl.u32 %v1478_v0, 16  ;;  %v1527_v54 = vshll.u32 %v1478_v0, 16  ;;  %v4392_v8 = vld [vmem:[#allocation2 + $0x14] sm:$0x1]  ;;  %1865 = vmatpush.bf16.msrb.mxu2 %v3554_v49 }
 0x11e   : > { %v780_v29 = vsel %vm4274_vm6, %v714_v16, %v779_v61  ;;  %v783_v30 = vsel %vm4233_vm3, %v715_v17, %v782_v46  ;;  %v659_v31 = vpack.c.bf16 %v581_v21, %v581_v21  ;;  %v3535_v32 = vld [vmem:[#allocation2 + $0x2c] sm:$0xf0]  ;;  %2246 = vmatpush.bf16.msra.mxu0 %v3574_v28  ;;  %v788_v61 = vld [vmem:[#allocation2 + $0x44] sm:$0x1]  ;;  %v1068_v63 = vunpack.c.l.b16 %v1021_v43 }
 0x11f   : > { %v1171_v34 = vld [vmem:[#allocation2 + $0x30] sm:$0xe]  ;;  %781 = vst [vmem:[#allocation2 + $0x38] sm:$0xf] %v780_v29  ;;  %1323 = vmatmul.bf16.gmra.mxu3 %v1251_v24  ;;  %v3161_v36 = vor.u32 %v3535_v32, %v3160_v25  ;;  %v1029_v37 = vor.u32 %v1028_v26, %v1025_v23  ;;  %v4380_v39 = vld [vmem:[#allocation2 + $0x34] sm:$0x1] }
 0x120   : > { %784 = vst [vmem:[#allocation2 + $0x3c] sm:$0x1] %v783_v30  ;;  %v717_v42 = vshrl.u32 %v659_v31, 16  ;;  %v3116_v45 = vrot.slane %v1171_v34, 9  ;;  %v720_v50 = vshll.u32 %v659_v31, 16  ;;  %v1235_v38 = vrot.slane %v4380_v39, 5  ;;  %2001 = vmatpush.bf16.msrb.mxu3 %v3565_v35 }
 0x121   : > { %1457 = vmatmul.bf16.gmra.mxu0 %v3161_v36  ;;  %v1030_v51 = vrot.slane %v1029_v37, 4  ;;  %v928_v52 = vld [vmem:[#allocation2 + $0x30] sm:$0xf]  ;;  %v1515_v2 = vrot.slane %v1513_v41, 5  ;;  %v1526_v3 = vrot.slane %v1524_v53, 4  ;;  %v1519_v11 = vshll.u32 %v4387_v48, 16  ;;  %1866 = vmatpush.bf16.msrb.mxu2 %v3553_v13 }
 0x122   : > { %v719_v55 = vrot.slane %v717_v42, 7  ;;  %v1037_v56 = vshrl.u32 %v928_v52, 16  ;;  %v1040_v57 = vshll.u32 %v928_v52, 16  ;;  %v1529_v12 = vrot.slane %v1527_v54, 5  ;;  %v2031_v46 = vld [vmem:[#allocation2 + $0x10] sm:$0xf]  ;;  %2247 = vmatpush.bf16.msra.mxu0 %v3573_v58 }
 0x123   : > { %v1035_v62 = vsel %vm4304_vm12, %v1030_v51, %v1034_v44  ;;  %v3044_v15 = vld [vmem:[#allocation2 + $0x30] sm:$0xf]  ;;  %v1236_v21 = vsel %vm4285_vm9, %v3116_v45, %v1235_v38  ;;  %v1046_v26 = vshll.u32 %v4380_v39, 16  ;;  %v1516_v28 = vor.u32 %v1515_v2, %v4382_v40  ;;  %v3586_v41 = vld [vmem:[#allocation8 + $0x228] sm:$0xff] }
 0x124   : > { %v722_v4 = vor.u32 %v720_v50, %v719_v55  ;;  %v723_v5 = vrot.slane %v719_v55, 4  ;;  %v1069_v6 = vunpack.c.l.b16 %v1035_v62  ;;  %v1039_v7 = vrot.slane %v1037_v56, 4  ;;  %v2033_v45 = vld [vmem:[#allocation2 + $0x18] sm:$0xf]  ;;  %2416 = vmatpush.bf16.msra.mxu1 %v3586_v41  ;;  %v4408_v2 = vld [vmem:[#allocation2 + $0x1c] sm:$0x1] }
 0x125   : > { %v1042_v10 = vrot.slane %v1040_v57, 5  ;;  %v1530_v29 = vor.u32 %v1529_v12, %v1526_v3  ;;  %v1533_v30 = vshll.u32 %v4392_v8, 16  ;;  %v1247_v31 = vunpack.c.l.b16 %v1236_v21  ;;  %v3585_v13 = vld [vmem:[#allocation8 + $0x220] sm:$0xff]  ;;  %v4424_v41 = vld [vmem:[#allocation2 + $0x1c] sm:$0x1] }
 0x126   : > { %v786_v1 = vsel %vm4274_vm6, %v722_v4, %v785_v60  ;;  %v789_v14 = vsel %vm4233_vm3, %v723_v5, %v788_v61  ;;  %v1074_v9 = vpack.c.b16 %v1069_v6, %v1068_v63  ;;  %v3508_v16 = vld [vmem:[#allocation2 + $0x34] sm:$0xf0]  ;;  %v1521_v34 = vrot.slane %v1519_v11, 5  ;;  %v4412_v4 = vld [vmem:[#allocation2 + $0x14] sm:$0x1] }
 0x127   : > { %v1172_v17 = vld [vmem:[#allocation2 + $0x38] sm:$0xe]  ;;  %787 = vst [vmem:[#allocation2 + $0x40] sm:$0xf] %v786_v1  ;;  %v3045_v23 = vor.u32 %v3508_v16, %v3044_v15  ;;  %v931_v0 = vld [vmem:[#allocation2 + $0x3c] sm:$0x1]  ;;  %v1043_v25 = vor.u32 %v1042_v10, %v1039_v7 }
 0x128   : > { %v3117_v24 = vrot.slane %v1172_v17, 9  ;;  %790 = vst [vmem:[#allocation2 + $0x44] sm:$0x1] %v789_v14  ;;  %1146 = vmatmul.bf16.gmra.mxu2 %v1074_v9  ;;  %v1239_v20 = vrot.slane %v931_v0, 5  ;;  %v930_v27 = vld [vmem:[#allocation2 + $0x38] sm:$0xf]  ;;  %2417 = vmatpush.bf16.msra.mxu1 %v3585_v13 }
 0x129   : > { %910 = vmatmul.bf16.gmra.mxu1 %v3045_v23  ;;  %v1051_v32 = vshrl.u32 %v930_v27, 16  ;;  %v1054_v33 = vshll.u32 %v930_v27, 16  ;;  %v1060_v36 = vshll.u32 %v931_v0, 16  ;;  %v2065_v37 = vshrl.u32 %v2031_v46, 16  ;;  %v3164_v56 = vld [vmem:[#allocation2 + $0x38] sm:$0xf] }
 0x12a   : > { %v1240_v35 = vsel %vm4285_vm9, %v3117_v24, %v1239_v20  ;;  %v2068_v39 = vshll.u32 %v2031_v46, 16  ;;  %v1044_v43 = vrot.slane %v1043_v25, 4  ;;  %v1048_v49 = vrot.slane %v1046_v26, 5  ;;  %v1480_v7 = vld [vmem:[#allocation2 + $0x18] sm:$0xf] }
 0x12b   : > { %v1248_v42 = vunpack.c.l.b16 %v1240_v35  ;;  %v1053_v44 = vrot.slane %v1051_v32, 4  ;;  %v1056_v40 = vrot.slane %v1054_v33, 5  ;;  %v1517_v50 = vrot.slane %v1516_v28, 4  ;;  %v1482_v17 = vld [vmem:[#allocation2 + $0x20] sm:$0xf] }
 0x12c   : > { %v1531_v51 = vrot.slane %v1530_v29, 4  ;;  %v1535_v52 = vrot.slane %v1533_v30, 5  ;;  %v2067_v55 = vrot.slane %v2065_v37, 4  ;;  %v2070_v38 = vrot.slane %v2068_v39, 5  ;;  %v4420_v20 = vld [vmem:[#allocation2 + $0x24] sm:$0x1] }
 0x12d   : > { %v1252_v53 = vpack.c.b16 %v1248_v42, %v1247_v31  ;;  %v1057_v54 = vor.u32 %v1056_v40, %v1053_v44  ;;  %v2079_v58 = vshrl.u32 %v2033_v45, 16  ;;  %v2082_v59 = vshll.u32 %v2033_v45, 16  ;;  %v2035_v32 = vld [vmem:[#allocation2 + $0x20] sm:$0xf]  ;;  %v1723_v39 = vld [vmem:[#allocation2 + $0x10] sm:$0xe] }
 0x12e   : > { %v3536_v57 = vld [vmem:[#allocation2 + $0x3c] sm:$0xf0]  ;;  %v1049_v61 = vsel %vm4304_vm12, %v1044_v43, %v1048_v49  ;;  %v1062_v63 = vrot.slane %v1060_v36, 5  ;;  %v1536_v3 = vsel %vm4304_vm12, %v1531_v51, %v1535_v52  ;;  %v1522_v11 = vsel %vm4304_vm12, %v1517_v50, %v1521_v34  ;;  %v3561_v34 = vld [vmem:[#allocation2 + $0x14] sm:$0xf0]  ;;  %v3584_v51 = vld [vmem:[#allocation8 + $0x218] sm:$0xff] }
 0x12f   : > { %1328 = vmatmul.bf16.gmra.mxu3 %v1252_v53  ;;  %v3165_v60 = vor.u32 %v3536_v57, %v3164_v56  ;;  %v1058_v62 = vrot.slane %v1057_v54, 4  ;;  %v2081_v5 = vrot.slane %v2079_v58, 4  ;;  %v2084_v6 = vrot.slane %v2082_v59, 5  ;;  %v2037_v36 = vld [vmem:[#allocation2 + $0x28] sm:$0xf]  ;;  %2418 = vmatpush.bf16.msra.mxu1 %v3584_v51 }
 0x130   : > { %v2071_v12 = vor.u32 %v2070_v38, %v2067_v55  ;;  %v1070_v46 = vunpack.c.l.b16 %v1049_v61  ;;  %v2088_v9 = vshll.u32 %v4408_v2, 16  ;;  %v1622_v15 = vunpack.c.l.b16 %v1536_v3  ;;  %v1722_v40 = vld [vmem:[#allocation2 + $0x8] sm:$0xe]  ;;  %v3272_v38 = vld [vmem:[#allocation2 + $0x10] sm:$0xf] }
 0x131   : > { %1462 = vmatmul.bf16.gmra.mxu0 %v3165_v60  ;;  %v1063_v10 = vsel %vm4304_vm12, %v1058_v62, %v1062_v63  ;;  %v2085_v14 = vor.u32 %v2084_v6, %v2081_v5  ;;  %v2074_v16 = vshll.u32 %v4412_v4, 16  ;;  %v1538_v21 = vshrl.u32 %v1480_v7, 16  ;;  %v1484_v13 = vld [vmem:[#allocation2 + $0x28] sm:$0xf]  ;;  %v1725_v51 = vld [vmem:[#allocation2 + $0x20] sm:$0xe] }
 0x132   : > { %v1071_v1 = vunpack.c.l.b16 %v1063_v10  ;;  %v1541_v23 = vshll.u32 %v1480_v7, 16  ;;  %v1621_v25 = vunpack.c.l.b16 %v1522_v11  ;;  %v2072_v26 = vrot.slane %v2071_v12, 4 }
 0x133   : > { %v2086_v24 = vrot.slane %v2085_v14, 4  ;;  %v1540_v27 = vrot.slane %v1538_v21, 4  ;;  %v2090_v29 = vrot.slane %v2088_v9, 5  ;;  %v1552_v30 = vshrl.u32 %v1482_v17, 16  ;;  %v4434_v14 = vld [vmem:[#allocation2 + $0x2c] sm:$0x1] }
 0x134   : > { %v1075_v0 = vpack.c.b16 %v1071_v1, %v1070_v46  ;;  %v1543_v28 = vrot.slane %v1541_v23, 5  ;;  %v1555_v31 = vshll.u32 %v1482_v17, 16  ;;  %v1629_v33 = vpack.c.b16 %v1622_v15, %v1621_v25  ;;  %v4438_v15 = vld [vmem:[#allocation2 + $0x24] sm:$0x1] }
 0x135   : > { %v2076_v35 = vrot.slane %v2074_v16, 5  ;;  %v2091_v37 = vsel %vm4304_vm12, %v2086_v24, %v2090_v29  ;;  %v1554_v42 = vrot.slane %v1552_v30, 4  ;;  %v1561_v49 = vshll.u32 %v4420_v20, 16  ;;  %v1486_v16 = vld [vmem:[#allocation2 + $0x30] sm:$0xf]  ;;  %v3583_v24 = vld [vmem:[#allocation8 + $0x210] sm:$0xff] }
 0x136   : > { %v1557_v43 = vrot.slane %v1555_v31, 5  ;;  %v1544_v45 = vor.u32 %v1543_v28, %v1540_v27  ;;  %v2093_v50 = vshrl.u32 %v2035_v32, 16  ;;  %v2096_v53 = vshll.u32 %v2035_v32, 16  ;;  %2419 = vmatpush.bf16.msra.mxu1 %v3583_v24  ;;  %v4460_v24 = vld [vmem:[#allocation2 + $0x3c] sm:$0x1] }
 0x137   : > { %v2077_v44 = vsel %vm4304_vm12, %v2072_v26, %v2076_v35  ;;  %v2107_v54 = vshrl.u32 %v2037_v36, 16  ;;  %v2110_v55 = vshll.u32 %v2037_v36, 16  ;;  %v2177_v56 = vunpack.c.l.b16 %v2091_v37 }
 0x138   : > { %1151 = vmatmul.bf16.gmra.mxu2 %v1075_v0  ;;  %v1558_v52 = vor.u32 %v1557_v43, %v1554_v42  ;;  %v3231_v57 = vrot.slane %v1723_v39, 9  ;;  %v1769_v58 = vrot.slane %v4392_v8, 5  ;;  %v1547_v59 = vshll.u32 %v4424_v41, 16  ;;  %v2041_v42 = vld [vmem:[#allocation2 + $0x38] sm:$0xf] }
 0x139   : > { %1693 = vmatmul.bf16.vlgmr.msrb.gmra.mxu1 %v1629_v33  ;;  %v3273_v60 = vor.u32 %v3561_v34, %v3272_v38  ;;  %v3230_v61 = vrot.slane %v1722_v40, 9  ;;  %v2109_v63 = vrot.slane %v2107_v54, 4  ;;  %v2176_v3 = vunpack.c.l.b16 %v2077_v44  ;;  %v1724_v54 = vld [vmem:[#allocation2 + $0x18] sm:$0xe] }
 0x13a   : > { %v1559_v62 = vrot.slane %v1558_v52, 4  ;;  %v1765_v5 = vrot.slane %v4387_v48, 5  ;;  %v1545_v6 = vrot.slane %v1544_v45, 4  ;;  %v2112_v7 = vrot.slane %v2110_v55, 5  ;;  %v2039_v45 = vld [vmem:[#allocation2 + $0x30] sm:$0xf] }
 0x13b   : > { %v1563_v10 = vrot.slane %v1561_v49, 5  ;;  %v2095_v11 = vrot.slane %v2093_v50, 4  ;;  %v2098_v12 = vrot.slane %v2096_v53, 5  ;;  %v2184_v46 = vpack.c.b16 %v2177_v56, %v2176_v3  ;;  %v4446_v52 = vld [vmem:[#allocation2 + $0x34] sm:$0x1] }
 0x13c   : > { %v1770_v8 = vsel %vm4285_vm9, %v3231_v57, %v1769_v58  ;;  %v1549_v1 = vrot.slane %v1547_v59, 5  ;;  %v2113_v48 = vor.u32 %v2112_v7, %v2109_v63  ;;  %v1766_v17 = vsel %vm4285_vm9, %v3230_v61, %v1765_v5  ;;  %v4450_v55 = vld [vmem:[#allocation2 + $0x2c] sm:$0x1]  ;;  %v3562_v58 = vld [vmem:[#allocation2 + $0x24] sm:$0xf0] }
 0x13d   : > { %v1564_v9 = vsel %vm4304_vm12, %v1559_v62, %v1563_v10  ;;  %v1566_v23 = vshrl.u32 %v1484_v13, 16  ;;  %v1569_v0 = vshll.u32 %v1484_v13, 16  ;;  %v1796_v25 = vunpack.c.l.b16 %v1770_v8  ;;  %v3582_v62 = vld [vmem:[#allocation8 + $0x208] sm:$0xff]  ;;  %v3276_v7 = vld [vmem:[#allocation2 + $0x20] sm:$0xf] }
 0x13e   : > { %v1550_v21 = vsel %vm4304_vm12, %v1545_v6, %v1549_v1  ;;  %v2099_v26 = vor.u32 %v2098_v12, %v2095_v11  ;;  %v2116_v27 = vshll.u32 %v4434_v14, 16  ;;  %v1624_v28 = vunpack.c.l.b16 %v1564_v9  ;;  %2420 = vmatpush.bf16.msra.mxu1 %v3582_v62 }
 0x13f   : > { %2002 = vmatmul.bf16.vlgmr.msrb.gmra.mxu3 %v3273_v60  ;;  %v2102_v29 = vshll.u32 %v4438_v15, 16  ;;  %v1580_v30 = vshrl.u32 %v1486_v16, 16  ;;  %v1583_v31 = vshll.u32 %v1486_v16, 16  ;;  %v1795_v32 = vunpack.c.l.b16 %v1766_v17 }
 0x140   : > { %v1623_v33 = vunpack.c.l.b16 %v1550_v21  ;;  %v2114_v34 = vrot.slane %v2113_v48, 4  ;;  %v1568_v35 = vrot.slane %v1566_v23, 4  ;;  %v1571_v36 = vrot.slane %v1569_v0, 5  ;;  %v1490_v23 = vld [vmem:[#allocation2 + $0x40] sm:$0xf] }
 0x141   : > { %2248 = vmatmul.bf16.vlgmr.msra.gmra.mxu0 %v2184_v46  ;;  %v1582_v37 = vrot.slane %v1580_v30, 4  ;;  %v1585_v39 = vrot.slane %v1583_v31, 5  ;;  %v1803_v43 = vpack.c.b16 %v1796_v25, %v1795_v32  ;;  %v2100_v44 = vrot.slane %v2099_v26, 4  ;;  %v1488_v25 = vld [vmem:[#allocation2 + $0x38] sm:$0xf] }
 0x142   : > { %v2118_v40 = vrot.slane %v2116_v27, 5  ;;  %v1630_v49 = vpack.c.b16 %v1624_v28, %v1623_v33  ;;  %v2104_v50 = vrot.slane %v2102_v29, 5  ;;  %v2135_v56 = vshrl.u32 %v2041_v42, 16  ;;  %v617_v28 = vld [vmem:[#allocation2 + $0x48] sm:$0x1] }
 0x143   : > { %v1586_v38 = vor.u32 %v1585_v39, %v1582_v37  ;;  %v2138_v57 = vshll.u32 %v2041_v42, 16  ;;  %v1572_v59 = vor.u32 %v1571_v36, %v1568_v35  ;;  %v2121_v60 = vshrl.u32 %v2039_v45, 16  ;;  %v649_v29 = vld [vmem:[#allocation2 + $0x4c] sm:$0x1]  ;;  %v4466_v31 = vld [vmem:[#allocation2 + $0x34] sm:$0x1] }
 0x144   : > { %v2119_v53 = vsel %vm4304_vm12, %v2114_v34, %v2118_v40  ;;  %v2124_v61 = vshll.u32 %v2039_v45, 16  ;;  %v2105_v63 = vsel %vm4304_vm12, %v2100_v44, %v2104_v50  ;;  %v3233_v3 = vrot.slane %v1725_v51, 9  ;;  %v3581_v42 = vld [vmem:[#allocation8 + $0x200] sm:$0xff] }
 0x145   : > { %v1777_v5 = vrot.slane %v4420_v20, 5  ;;  %v1589_v6 = vshll.u32 %v4446_v52, 16  ;;  %v2179_v10 = vunpack.c.l.b16 %v2119_v53  ;;  %v3232_v11 = vrot.slane %v1724_v54, 9  ;;  %2421 = vmatpush.bf16.msra.mxu1 %v3581_v42 }
 0x146   : > { %v1773_v12 = vrot.slane %v4424_v41, 5  ;;  %v1575_v13 = vshll.u32 %v4450_v55, 16  ;;  %v3277_v46 = vor.u32 %v3562_v58, %v3276_v7  ;;  %v1587_v8 = vrot.slane %v1586_v38, 4  ;;  %v3563_v58 = vld [vmem:[#allocation2 + $0x34] sm:$0xf0] }
 0x147   : > { %v2137_v1 = vrot.slane %v2135_v56, 4  ;;  %v2140_v9 = vrot.slane %v2138_v57, 5  ;;  %v2178_v48 = vunpack.c.l.b16 %v2105_v63  ;;  %v1573_v16 = vrot.slane %v1572_v59, 4  ;;  %v2043_v59 = vld [vmem:[#allocation2 + $0x40] sm:$0xf] }
 0x148   : > { %1867 = vmatmul.bf16.vlgmr.msrb.gmra.mxu2 %v1803_v43  ;;  %v2123_v17 = vrot.slane %v2121_v60, 4  ;;  %v2126_v21 = vrot.slane %v2124_v61, 5  ;;  %v1778_v20 = vsel %vm4285_vm9, %v3233_v3, %v1777_v5  ;;  %v1591_v0 = vrot.slane %v1589_v6, 5  ;;  %v1727_v61 = vld [vmem:[#allocation2 + $0x30] sm:$0xe] }
 0x149   : > { %1698 = vmatmul.bf16.gmra.mxu1 %v1630_v49  ;;  %v2185_v41 = vpack.c.b16 %v2179_v10, %v2178_v48  ;;  %v1774_v26 = vsel %vm4285_vm9, %v3232_v11, %v1773_v12  ;;  %v1577_v27 = vrot.slane %v1575_v13, 5  ;;  %v2141_v32 = vor.u32 %v2140_v9, %v2137_v1  ;;  %v4476_v5 = vld [vmem:[#allocation2 + $0x44] sm:$0x1]  ;;  %v3280_v6 = vld [vmem:[#allocation2 + $0x30] sm:$0xf] }
 0x14a   : > { %v1592_v30 = vsel %vm4304_vm12, %v1587_v8, %v1591_v0  ;;  %v1608_v33 = vshrl.u32 %v1490_v23, 16  ;;  %v1611_v34 = vshll.u32 %v1490_v23, 16  ;;  %v1798_v35 = vunpack.c.l.b16 %v1778_v20  ;;  %v4480_v10 = vld [vmem:[#allocation2 + $0x3c] sm:$0x1]  ;;  %v1726_v8 = vld [vmem:[#allocation2 + $0x28] sm:$0xe] }
 0x14b   : > { %v1578_v36 = vsel %vm4304_vm12, %v1573_v16, %v1577_v27  ;;  %v2127_v37 = vor.u32 %v2126_v21, %v2123_v17  ;;  %v2144_v39 = vshll.u32 %v4460_v24, 16  ;;  %v1594_v43 = vshrl.u32 %v1488_v25, 16 }
 0x14c   : > { %v1597_v44 = vshll.u32 %v1488_v25, 16  ;;  %v618_v40 = vsel %vm4233_vm3, 0, %v617_v28  ;;  %v650_v45 = vsel %vm4240_vm4, 0, %v649_v29  ;;  %v1797_v49 = vunpack.c.l.b16 %v1774_v26 }
 0x14d   : > { %v1626_v50 = vunpack.c.l.b16 %v1592_v30  ;;  %v2130_v51 = vshll.u32 %v4466_v31, 16  ;;  %619 = vst [vmem:[#allocation2 + $0x48] sm:$0x1] %v618_v40  ;;  %v2142_v53 = vrot.slane %v2141_v32, 4  ;;  %v1610_v54 = vrot.slane %v1608_v33, 4 }
 0x14e   : > { %v1613_v38 = vrot.slane %v1611_v34, 5  ;;  %651 = vst [vmem:[#allocation2 + $0x4c] sm:$0x1] %v650_v45  ;;  %v1804_v56 = vpack.c.b16 %v1798_v35, %v1797_v49  ;;  %v1625_v57 = vunpack.c.l.b16 %v1578_v36  ;;  %v2128_v60 = vrot.slane %v2127_v37, 4 }
 0x14f   : > { %2007 = vmatmul.bf16.gmra.mxu3 %v3277_v46  ;;  %v2146_v18 = vrot.slane %v2144_v39, 5  ;;  %v1596_v62 = vrot.slane %v1594_v43, 4  ;;  %v1599_v22 = vrot.slane %v1597_v44, 5  ;;  %v2132_v3 = vrot.slane %v2130_v51, 5  ;;  %v4490_v39 = vld [vmem:[#allocation2 + $0x44] sm:$0x1] }
 0x150   : > { %v1631_v63 = vpack.c.b16 %v1626_v50, %v1625_v57  ;;  %v1614_v11 = vor.u32 %v1613_v38, %v1610_v54  ;;  %v2149_v12 = vshrl.u32 %v2043_v59, 16  ;;  %v2152_v13 = vshll.u32 %v2043_v59, 16 }
 0x151   : > { %2253 = vmatmul.bf16.gmra.mxu0 %v2185_v41  ;;  %v2147_v7 = vsel %vm4304_vm12, %v2142_v53, %v2146_v18  ;;  %v3281_v46 = vor.u32 %v3563_v58, %v3280_v6  ;;  %v3235_v1 = vrot.slane %v1727_v61, 9  ;;  %v2133_v9 = vsel %vm4304_vm12, %v2128_v60, %v2132_v3  ;;  %v3284_v3 = vld [vmem:[#allocation2 + $0x40] sm:$0xf] }
 0x152   : > { %v1785_v48 = vrot.slane %v4446_v52, 5  ;;  %v1600_v16 = vor.u32 %v1599_v22, %v1596_v62  ;;  %v1617_v17 = vshll.u32 %v4476_v5, 16  ;;  %v2181_v23 = vunpack.c.l.b16 %v2147_v7  ;;  %v1729_v22 = vld [vmem:[#allocation2 + $0x40] sm:$0xe]  ;;  %v1728_v7 = vld [vmem:[#allocation2 + $0x38] sm:$0xe] }
 0x153   : > { %v1603_v20 = vshll.u32 %v4480_v10, 16  ;;  %v3234_v41 = vrot.slane %v1726_v8, 9  ;;  %v1615_v26 = vrot.slane %v1614_v11, 4  ;;  %v2151_v27 = vrot.slane %v2149_v12, 4  ;;  %v2277_v8 = vld [vmem:[#allocation2 + $0x10] sm:$0xe] }
 0x154   : > { %v2045_v21 = vld [vmem:[#allocation2 + $0x48] sm:$0xf]  ;;  %v2154_v28 = vrot.slane %v2152_v13, 5  ;;  %v2180_v29 = vunpack.c.l.b16 %v2133_v9  ;;  %v1781_v30 = vrot.slane %v4450_v55, 5  ;;  %v1601_v34 = vrot.slane %v1600_v16, 4 }
 0x155   : > { %v2163_v0 = vshrl.u32 %v2045_v21, 16  ;;  %v2166_v25 = vshll.u32 %v2045_v21, 16  ;;  %v1619_v52 = vrot.slane %v1617_v17, 5  ;;  %v1786_v36 = vsel %vm4285_vm9, %v3235_v1, %v1785_v48  ;;  %v4492_v42 = vld [vmem:[#allocation2 + $0x4c] sm:$0x1] }
 0x156   : > { %v2186_v35 = vpack.c.b16 %v2181_v23, %v2180_v29  ;;  %v1605_v37 = vrot.slane %v1603_v20, 5  ;;  %v2155_v44 = vor.u32 %v2154_v28, %v2151_v27  ;;  %v2172_v55 = vshll.u32 %v4492_v42, 16  ;;  %v3564_v6 = vld [vmem:[#allocation2 + $0x44] sm:$0xf0] }
 0x157   : > { %v2165_v32 = vrot.slane %v2163_v0, 4  ;;  %v2168_v33 = vrot.slane %v2166_v25, 5  ;;  %v1620_v43 = vsel %vm4304_vm12, %v1615_v26, %v1619_v52  ;;  %v1782_v45 = vsel %vm4285_vm9, %v3234_v41, %v1781_v30  ;;  %v2280_v29 = vld [vmem:[#allocation2 + $0x28] sm:$0xe]  ;;  %v2279_v30 = vld [vmem:[#allocation2 + $0x20] sm:$0xe] }
 0x158   : > { %1872 = vmatmul.bf16.gmra.mxu2 %v1804_v56  ;;  %v1800_v49 = vunpack.c.l.b16 %v1786_v36  ;;  %v1606_v50 = vsel %vm4304_vm12, %v1601_v34, %v1605_v37  ;;  %v2158_v51 = vshll.u32 %v4490_v39, 16  ;;  %v1628_v53 = vunpack.c.l.b16 %v1620_v43 }
 0x159   : > { %1703 = vmatmul.bf16.gmra.mxu1 %v1631_v63  ;;  %v2169_v40 = vor.u32 %v2168_v33, %v2165_v32  ;;  %v1799_v54 = vunpack.c.l.b16 %v1782_v45  ;;  %v2156_v38 = vrot.slane %v2155_v44, 4  ;;  %v2174_v57 = vrot.slane %v2172_v55, 5  ;;  %v2278_v63 = vld [vmem:[#allocation2 + $0x18] sm:$0xe] }
 0x15a   : > { %v1627_v58 = vunpack.c.l.b16 %v1606_v50  ;;  %v2160_v60 = vrot.slane %v2158_v51, 5  ;;  %v3237_v13 = vrot.slane %v1729_v22, 9  ;;  %v3351_v1 = vrot.slane %v2278_v63, 9  ;;  %v2282_v50 = vld [vmem:[#allocation2 + $0x38] sm:$0xe] }
 0x15b   : > { %v2170_v56 = vrot.slane %v2169_v40, 4  ;;  %v1805_v59 = vpack.c.b16 %v1800_v49, %v1799_v54  ;;  %v2324_v9 = vrot.slane %v4408_v2, 5  ;;  %v3285_v48 = vor.u32 %v3564_v6, %v3284_v3 }
 0x15c   : > { %v1632_v18 = vpack.c.b16 %v1628_v53, %v1627_v58  ;;  %v2161_v61 = vsel %vm4304_vm12, %v2156_v38, %v2160_v60  ;;  %v3236_v16 = vrot.slane %v1728_v7, 9  ;;  %v1789_v19 = vrot.slane %v4480_v10, 5  ;;  %v2281_v53 = vld [vmem:[#allocation2 + $0x30] sm:$0xe] }
 0x15d   : > { %v2175_v62 = vsel %vm4304_vm12, %v2170_v56, %v2174_v57  ;;  %v2182_v11 = vunpack.c.l.b16 %v2161_v61  ;;  %v3350_v17 = vrot.slane %v2277_v8, 9  ;;  %v2320_v21 = vrot.slane %v4412_v4, 5 }
 0x15e   : > { %v2183_v12 = vunpack.c.l.b16 %v2175_v62  ;;  %v2325_v0 = vsel %vm4285_vm9, %v3351_v1, %v2324_v9  ;;  %v3353_v32 = vrot.slane %v2280_v29, 9  ;;  %v2332_v33 = vrot.slane %v4434_v14, 5 }
 0x15f   : > { %2012 = vmatmul.bf16.gmra.mxu3 %v3281_v46  ;;  %v1793_v46 = vrot.slane %v4476_v5, 5  ;;  %v1790_v5 = vsel %vm4285_vm9, %v3236_v16, %v1789_v19  ;;  %v2321_v25 = vsel %vm4285_vm9, %v3350_v17, %v2320_v21  ;;  %v2351_v10 = vunpack.c.l.b16 %v2325_v0 }
 0x160   : > { %v2187_v23 = vpack.c.b16 %v2183_v12, %v2182_v11  ;;  %v1801_v41 = vunpack.c.l.b16 %v1790_v5  ;;  %v2350_v26 = vunpack.c.l.b16 %v2321_v25  ;;  %v3352_v52 = vrot.slane %v2279_v30, 9  ;;  %v2283_v11 = vld [vmem:[#allocation2 + $0x40] sm:$0xe]  ;;  %v2284_v12 = vld [vmem:[#allocation2 + $0x48] sm:$0xe] }
 0x161   : > { %2258 = vmatmul.bf16.gmra.mxu0 %v2186_v35  ;;  %v1794_v20 = vsel %vm4285_vm9, %v3237_v13, %v1793_v46  ;;  %v2328_v35 = vrot.slane %v4438_v15, 5  ;;  %v2333_v36 = vsel %vm4285_vm9, %v3353_v32, %v2332_v33  ;;  %v3355_v15 = vrot.slane %v2282_v50, 9  ;;  %v3595_v33 = vld [vmem:[#allocation9 + $0x30] sm:$0xff] }
 0x162   : > { %v1802_v2 = vunpack.c.l.b16 %v1794_v20  ;;  %v2358_v28 = vpack.c.b16 %v2351_v10, %v2350_v26  ;;  %v2353_v44 = vunpack.c.l.b16 %v2333_v36  ;;  %v2340_v38 = vrot.slane %v4460_v24, 5 }
 0x163   : > { %v2329_v43 = vsel %vm4285_vm9, %v3352_v52, %v2328_v35  ;;  %v3354_v58 = vrot.slane %v2281_v53, 9  ;;  %v3356_v13 = vrot.slane %v2283_v11, 9  ;;  %v2344_v8 = vrot.slane %v4490_v39, 5 }
 0x164   : > { %v1806_v4 = vpack.c.b16 %v1802_v2, %v1801_v41  ;;  %v2352_v40 = vunpack.c.l.b16 %v2329_v43  ;;  %v2341_v60 = vsel %vm4285_vm9, %v3355_v15, %v2340_v38  ;;  %v3357_v1 = vrot.slane %v2284_v12, 9  ;;  %v3592_v38 = vld [vmem:[#allocation9 + $0x18] sm:$0xff] }
 0x165   : > { %v2355_v22 = vunpack.c.l.b16 %v2341_v60  ;;  %v2348_v9 = vrot.slane %v4492_v42, 5  ;;  %v2345_v21 = vsel %vm4285_vm9, %v3356_v13, %v2344_v8 }
 0x166   : > { %v2359_v45 = vpack.c.b16 %v2353_v44, %v2352_v40  ;;  %v2356_v0 = vunpack.c.l.b16 %v2345_v21 }
 0x168   : > { %1877 = vmatmul.bf16.gmra.mxu2 %v1805_v59  ;;  %v2336_v59 = vrot.slane %v4466_v31, 5 }
 0x169   : > { %1708 = vmatmul.bf16.gmra.mxu1 %v1632_v18 }
 0x16a   : > { %v2337_v18 = vsel %vm4285_vm9, %v3354_v58, %v2336_v59  ;;  %v3591_v59 = vld [vmem:[#allocation9 + $0x10] sm:$0xff] }
 0x16b   : > { %v2354_v3 = vunpack.c.l.b16 %v2337_v18 }
 0x16d   : > { %v2360_v7 = vpack.c.b16 %v2355_v22, %v2354_v3 }
 0x16f   : > { %2017 = vmatmul.bf16.gmra.mxu3 %v3285_v48 }
 0x171   : > { %2263 = vmatmul.bf16.gmra.mxu0 %v2187_v23  ;;  %v2349_v23 = vsel %vm4285_vm9, %v3357_v1, %v2348_v9 }
 0x172   : > { %v2357_v5 = vunpack.c.l.b16 %v2349_v23 }
 0x174   : > { %v2361_v42 = vpack.c.b16 %v2357_v5, %v2356_v0 }
 0x176   : > { %v896_v27 = vpop.f32.mrf.mxu1 }
 0x178   : > { %1882 = vmatmul.bf16.gmra.mxu2 %v1806_v4 }
 0x179   : > { %2422 = vmatmul.bf16.vlgmr.msra.gmra.mxu1 %v2358_v28  ;;  %v3596_v28 = vld [vmem:[#allocation9 + $0x38] sm:$0xff] }
 0x17a   : > { %2539 = vmatpush.bf16.msra.mxu2 %v3596_v28 }
 0x17e   : > { %v4519_v34 = vpop.f32.mrf.mxu1  ;;  %v1448_v49 = vpop.f32.mrf.mxu0  ;;  %2540 = vmatpush.bf16.msra.mxu2 %v3595_v33 }
 0x182   : > { %v1314_v37 = vpop.f32.mrf.mxu3 }
 0x186   : > { %v901_v55 = vpop.f32.mrf.mxu1  ;;  %v4536_v61 = vpop.f32.mrf.mxu0 }
 0x189   : > { %2427 = vmatmul.bf16.gmra.mxu1 %v2359_v45  ;;  %v3594_v45 = vld [vmem:[#allocation9 + $0x28] sm:$0xff] }
 0x18a   : > { %v4526_v51 = vpop.f32.mrf.mxu3  ;;  %2541 = vmatpush.bf16.msra.mxu2 %v3594_v45 }
 0x18b   : > { %v1137_v14 = vpop.f32.mrf.mxu2 }
 0x18c   : > { %v1157_v54 = vadd.f32 %v1137_v14, %v896_v27  ;;  %v3593_v14 = vld [vmem:[#allocation9 + $0x20] sm:$0xff] }
 0x18e   : > { %v1334_v56 = vadd.f32 %v1314_v37, %v1157_v54  ;;  %v4529_v57 = vpop.f32.mrf.mxu1  ;;  %v1453_v48 = vpop.f32.mrf.mxu0  ;;  %2542 = vmatpush.bf16.msra.mxu2 %v3593_v14 }
 0x190   : > { %v1468_v6 = vadd.f32 %v1448_v49, %v1334_v56 }
 0x192   : > { %v1319_v63 = vpop.f32.mrf.mxu3  ;;  %2543 = vmatpush.bf16.msra.mxu2 %v3592_v38 }
 0x193   : > { %v4538_v62 = vpop.f32.mrf.mxu2 }
 0x196   : > { %v906_v24 = vpop.f32.mrf.mxu1  ;;  %v4552_v25 = vpop.f32.mrf.mxu0  ;;  %2544 = vmatpush.bf16.msra.mxu2 %v3591_v59 }
 0x199   : > { %2432 = vmatmul.bf16.gmra.mxu1 %v2360_v7 }
 0x19a   : > { %v4544_v17 = vpop.f32.mrf.mxu3 }
 0x19b   : > { %v1142_v31 = vpop.f32.mrf.mxu2 }
 0x19c   : > { %v1159_v46 = vadd.f32 %v1142_v31, %v901_v55  ;;  %v3589_v31 = vld [vmem:[#allocation9] sm:$0xff] }
 0x19e   : > { %v1336_v16 = vadd.f32 %v1319_v63, %v1159_v46  ;;  %v4542_v19 = vpop.f32.mrf.mxu1  ;;  %v1458_v47 = vpop.f32.mrf.mxu0  ;;  %v1158_v46 = vadd.f32 %v4538_v62, %v4519_v34 }
 0x1a0   : > { %v1470_v2 = vadd.f32 %v1453_v48, %v1336_v16  ;;  %v1335_v1 = vadd.f32 %v4526_v51, %v1158_v46 }
 0x1a2   : > { %v1324_v10 = vpop.f32.mrf.mxu3  ;;  %v1469_v21 = vadd.f32 %v4536_v61, %v1335_v1 }
 0x1a3   : > { %v4550_v20 = vpop.f32.mrf.mxu2 }
 0x1a6   : > { %v911_v39 = vpop.f32.mrf.mxu1  ;;  %v4560_v36 = vpop.f32.mrf.mxu0 }
 0x1a9   : > { %2437 = vmatmul.bf16.gmra.mxu1 %v2361_v42 }
 0x1aa   : > { %v4556_v29 = vpop.f32.mrf.mxu3 }
 0x1ab   : > { %v1147_v41 = vpop.f32.mrf.mxu2 }
 0x1ac   : > { %v1161_v26 = vadd.f32 %v1147_v41, %v906_v24  ;;  %v3590_v24 = vld [vmem:[#allocation9 + $0x8] sm:$0xff] }
 0x1ad   : > { %2545 = vmatpush.bf16.msra.mxu2 %v3590_v24 }
 0x1ae   : > { %v1338_v4 = vadd.f32 %v1324_v10, %v1161_v26  ;;  %v4554_v27 = vpop.f32.mrf.mxu1  ;;  %v1463_v49 = vpop.f32.mrf.mxu0  ;;  %v1160_v10 = vadd.f32 %v4550_v20, %v4529_v57 }
 0x1b0   : > { %v1472_v52 = vadd.f32 %v1458_v47, %v1338_v4  ;;  %v4585_v4 = vld [vmem:[%s4687_s4] ss:$0 sm:$0xff]  ;;  %v1337_v61 = vadd.f32 %v4544_v17, %v1160_v10 }
 0x1b1   : > { %2546 = vmatpush.bf16.msra.mxu2 %v3589_v31 }
 0x1b2   : > { %v1329_v44 = vpop.f32.mrf.mxu3  ;;  %v1471_v57 = vadd.f32 %v4552_v25, %v1337_v61 }
 0x1b3   : > { %v4558_v30 = vpop.f32.mrf.mxu2 }
 0x1b4   : > { %v1162_v14 = vadd.f32 %v4558_v30, %v4542_v19 }
 0x1b6   : > { %v1694_v32 = vpop.f32.mrf.mxu1  ;;  %v4568_v22 = vpop.f32.mrf.mxu0 }
 0x1b7   : > { %v1714_v35 = vadd.f32 %v1694_v32, %v1468_v6 }
 0x1ba   : > { %v4566_v18 = vpop.f32.mrf.mxu3 }
 0x1bb   : > { %v1152_v37 = vpop.f32.mrf.mxu2 }
 0x1bc   : > { %v1163_v43 = vadd.f32 %v1152_v37, %v911_v39 }
 0x1be   : > { %v1340_v40 = vadd.f32 %v1329_v44, %v1163_v43  ;;  %v1696_v55 = vpop.f32.mrf.mxu1  ;;  %v2249_v7 = vpop.f32.mrf.mxu0 }
 0x1bf   : > { %v1715_v0 = vadd.f32 %v1696_v55, %v1469_v21 }
 0x1c0   : > { %v1474_v53 = vadd.f32 %v1463_v49, %v1340_v40 }
 0x1c2   : > { %v2003_v6 = vpop.f32.mrf.mxu3 }
 0x1c3   : > { %v4562_v56 = vpop.f32.mrf.mxu2 }
 0x1c6   : > { %v1699_v50 = vpop.f32.mrf.mxu1  ;;  %v2251_v48 = vpop.f32.mrf.mxu0 }
 0x1c7   : > { %v1716_v54 = vadd.f32 %v1699_v50, %v1470_v2 }
 0x1ca   : > { %v2005_v8 = vpop.f32.mrf.mxu3 }
 0x1cb   : > { %v1868_v63 = vpop.f32.mrf.mxu2 }
 0x1cc   : > { %v1888_v23 = vadd.f32 %v1868_v63, %v1714_v35 }
 0x1ce   : > { %v1701_v15 = vpop.f32.mrf.mxu1  ;;  %v2023_v5 = vadd.f32 %v2003_v6, %v1888_v23  ;;  %v2254_v41 = vpop.f32.mrf.mxu0 }
 0x1cf   : > { %v1717_v37 = vadd.f32 %v1701_v15, %v1471_v57 }
 0x1d0   : > { %v2269_v62 = vadd.f32 %v2249_v7, %v2023_v5 }
 0x1d2   : > { %v2008_v2 = vpop.f32.mrf.mxu3 }
 0x1d3   : > { %v1870_v11 = vpop.f32.mrf.mxu2 }
 0x1d4   : > { %v1889_v39 = vadd.f32 %v1870_v11, %v1715_v0  ;;  %v1164_v0 = vadd.f32 %v4562_v56, %v4554_v27 }
 0x1d6   : > { %v1704_v58 = vpop.f32.mrf.mxu1  ;;  %v2024_v34 = vadd.f32 %v2005_v8, %v1889_v39  ;;  %v2256_v43 = vpop.f32.mrf.mxu0  ;;  %v1341_v39 = vadd.f32 %v4566_v18, %v1164_v0  ;;  %v3610_v0 = vld [vmem:[#allocation12 + $0x28] sm:$0xff] }
 0x1d7   : > { %v4564_v60 = vadd.f32 %v1704_v58, %v1472_v52 }
 0x1d8   : > { %v2270_v28 = vadd.f32 %v2251_v48, %v2024_v34  ;;  %v1475_v34 = vadd.f32 %v4568_v22, %v1341_v39 }
 0x1da   : > { %v2010_v52 = vpop.f32.mrf.mxu3 }
 0x1db   : > { %v1873_v16 = vpop.f32.mrf.mxu2 }
 0x1dc   : > { %v1890_v20 = vadd.f32 %v1873_v16, %v1716_v54  ;;  %v1339_v54 = vadd.f32 %v4556_v29, %v1162_v14 }
 0x1de   : > { %v4570_v3 = vpop.f32.mrf.mxu1  ;;  %v2025_v45 = vadd.f32 %v2008_v2, %v1890_v20  ;;  %v2259_v59 = vpop.f32.mrf.mxu0  ;;  %v1473_v11 = vadd.f32 %v4560_v36, %v1339_v54  ;;  %v3599_v54 = vld [vmem:[#allocation11 + $0x10] sm:$0xff] }
 0x1e0   : > { %v2271_v38 = vadd.f32 %v2254_v41, %v2025_v45  ;;  %v1719_v19 = vadd.f32 %v4570_v3, %v1473_v11 }
 0x1e2   : > { %v2013_v58 = vpop.f32.mrf.mxu3 }
 0x1e3   : > { %v1875_v26 = vpop.f32.mrf.mxu2 }
 0x1e4   : > { %v1891_v49 = vadd.f32 %v1875_v26, %v1717_v37 }
 0x1e6   : > { %v1709_v12 = vpop.f32.mrf.mxu1  ;;  %v2261_v21 = vpop.f32.mrf.mxu0 }
 0x1e7   : > { %v4572_v13 = vadd.f32 %v1709_v12, %v1474_v53  ;;  %v2026_v53 = vadd.f32 %v2010_v52, %v1891_v49  ;;  %v3604_v49 = vld [vmem:[#allocation11 + $0x38] sm:$0xff] }
 0x1e8   : > { %2666 = vmatpush.bf16.msra.mxu3 %v3604_v49 }
 0x1e9   : > { %v2272_v15 = vadd.f32 %v2256_v43, %v2026_v53  ;;  %v3601_v53 = vld [vmem:[#allocation11 + $0x20] sm:$0xff] }
 0x1ea   : > { %v2015_v8 = vpop.f32.mrf.mxu3 }
 0x1eb   : > { %v1878_v55 = vpop.f32.mrf.mxu2 }
 0x1ec   : > { %v1892_v12 = vadd.f32 %v1878_v55, %v4564_v60 }
 0x1ee   : > { %v4577_v9 = vpop.f32.mrf.mxu1  ;;  %v2027_v1 = vadd.f32 %v2013_v58, %v1892_v12  ;;  %v3600_v58 = vld [vmem:[#allocation11 + $0x18] sm:$0xff] }
 0x1ef   : > { %v1721_v27 = vadd.f32 %v4577_v9, %v1475_v34 }
 0x1f0   : > { %v2273_v5 = vadd.f32 %v2259_v59, %v2027_v1 }
 0x1f2   : > { %v2018_v3 = vpop.f32.mrf.mxu3 }
 0x1f3   : > { %v1880_v63 = vpop.f32.mrf.mxu2 }
 0x1f4   : > { %v1893_v29 = vadd.f32 %v1880_v63, %v1719_v19  ;;  %v3612_v19 = vld [vmem:[#allocation12 + $0x38] sm:$0xff] }
 0x1f6   : > { %v2423_v42 = vpop.f32.mrf.mxu1  ;;  %v2028_v36 = vadd.f32 %v2015_v8, %v1893_v29  ;;  %v3611_v8 = vld [vmem:[#allocation12 + $0x30] sm:$0xff] }
 0x1f7   : > { %v2443_v51 = vadd.f32 %v2423_v42, %v2269_v62 }
 0x1f8   : > { %v2274_v2 = vadd.f32 %v2261_v21, %v2028_v36 }
 0x1f9   : > { %v2455_v32 = vadd.f32 %v4585_v4, %v2443_v51  ;;  %v2264_v51 = vpop.f32.mrf.mxu0 }
 0x1fa   : > { %v2020_v52 = vpop.f32.mrf.mxu3 }
 0x1fb   : > { %v2463_v44 = vmax.f32 %v2455_v32, 0.0  ;;  %v1883_v23 = vpop.f32.mrf.mxu2 }
 0x1fc   : > { %v1894_v62 = vadd.f32 %v1883_v23, %v4572_v13 }
 0x1fe   : > { %v2425_v47 = vpop.f32.mrf.mxu1 }
 0x1ff   : > { %v2444_v33 = vadd.f32 %v2425_v47, %v2270_v28  ;;  %v2029_v47 = vadd.f32 %v2018_v3, %v1894_v62  ;;  %v3608_v62 = vld [vmem:[#allocation12 + $0x18] sm:$0xff] }
 0x201   : > { %v2456_v35 = vadd.f32 %v4585_v4, %v2444_v33  ;;  %v2275_v20 = vadd.f32 %v2264_v51, %v2029_v47  ;;  %v2266_v22 = vpop.f32.mrf.mxu0 }
 0x203   : > { %v2464_v40 = vmax.f32 %v2456_v35, 0.0  ;;  %v1885_v61 = vpop.f32.mrf.mxu2 }
 0x204   : > { %v1895_v18 = vadd.f32 %v1885_v61, %v1721_v27  ;;  %v3607_v27 = vld [vmem:[#allocation12 + $0x10] sm:$0xff] }
 0x205   : > { %v2487_v50 = vpack.c.bf16 %v2464_v40, %v2463_v44 }
 0x206   : > { %v2428_v17 = vpop.f32.mrf.mxu1  ;;  %v2030_v57 = vadd.f32 %v2020_v52, %v1895_v18  ;;  %v3606_v18 = vld [vmem:[#allocation12 + $0x8] sm:$0xff] }
 0x207   : > { %2547 = vmatmul.bf16.vlgmr.msra.gmra.mxu2 %v2487_v50  ;;  %v2445_v25 = vadd.f32 %v2428_v17, %v2271_v38  ;;  %v3603_v50 = vld [vmem:[#allocation11 + $0x30] sm:$0xff]  ;;  %v3602_v17 = vld [vmem:[#allocation11 + $0x28] sm:$0xff] }
 0x208   : > { %v2276_v37 = vadd.f32 %v2266_v22, %v2030_v57  ;;  %2667 = vmatpush.bf16.msra.mxu3 %v3603_v50 }
 0x209   : > { %v2457_v6 = vadd.f32 %v4585_v4, %v2445_v25 }
 0x20b   : > { %v2465_v30 = vmax.f32 %v2457_v6, 0.0  ;;  %v3597_v6 = vld [vmem:[#allocation11] sm:$0xff] }
 0x20c   : > { %2668 = vmatpush.bf16.msra.mxu3 %v3602_v17 }
 0x20e   : > { %v2430_v24 = vpop.f32.mrf.mxu1 }
 0x20f   : > { %v2446_v7 = vadd.f32 %v2430_v24, %v2272_v15  ;;  %v3598_v15 = vld [vmem:[#allocation11 + $0x8] sm:$0xff]  ;;  %v3742_v24 = vld [vmem:[%s4689_s6] ss:$0 sm:$0xff] }
 0x210   : > { %2669 = vmatpush.bf16.msra.mxu3 %v3601_v53 }
 0x211   : > { %v2458_v31 = vadd.f32 %v4585_v4, %v2446_v7 }
 0x213   : > { %v2466_v46 = vmax.f32 %v2458_v31, 0.0  ;;  %v4017_v31 = vmov 64.0  }
 0x214   : > { %2670 = vmatpush.bf16.msra.mxu3 %v3600_v58  ;;  %3743 = vrcp.f32 %v4017_v31 }
 0x215   : > { %v2488_v48 = vpack.c.bf16 %v2466_v46, %v2465_v30 }
 0x216   : > { %v2433_v16 = vpop.f32.mrf.mxu1 }
 0x217   : > { %2552 = vmatmul.bf16.gmra.mxu2 %v2488_v48  ;;  %v2447_v60 = vadd.f32 %v2433_v16, %v2273_v5 }
 0x218   : > { %2671 = vmatpush.bf16.msra.mxu3 %v3599_v54 }
 0x219   : > { %v2459_v10 = vadd.f32 %v4585_v4, %v2447_v60 }
 0x21a   : > { %v3744_v16 = vpop.eup %3743 }
 0x21b   : > { %v2467_v56 = vmax.f32 %v2459_v10, 0.0  ;;  %v2594_v60 = vmul.f32 64.0, %v3744_v16  ;;  %vm2598_vm13 = vweird.f32 %v3744_v16 }
 0x21c   : > { %2672 = vmatpush.bf16.msra.mxu3 %v3598_v15  ;;  %v441_v15 = vld [vmem:[%s4211_s26 + $0x10] sm:$0xff]  }
 0x21e   : > { %v2435_v42 = vpop.f32.mrf.mxu1 }
 0x21f   : > { %v2448_v41 = vadd.f32 %v2435_v42, %v2274_v2  ;;  %v3609_v2 = vld [vmem:[#allocation12 + $0x20] sm:$0xff] }
 0x220   : > { %2673 = vmatpush.bf16.msra.mxu3 %v3597_v6 }
 0x221   : > { %v2460_v26 = vadd.f32 %v4585_v4, %v2448_v41  ;;  %v2595_v41 = vsub.f32 1.0, %v2594_v60 }
 0x223   : > { %v2468_v28 = vmax.f32 %v2460_v26, 0.0  ;;  %v2596_v51 = vmul.f32 %v3744_v16, %v2595_v41 }
 0x224   : > { %2745 = vmatpush.bf16.msrb.mxu3 %v3612_v19 }
 0x225   : > { %v2489_v32 = vpack.c.bf16 %v2468_v28, %v2467_v56  ;;  %v2597_v28 = vadd.f32 %v3744_v16, %v2596_v51 }
 0x226   : > { %v2438_v33 = vpop.f32.mrf.mxu1 }
 0x227   : > { %2557 = vmatmul.bf16.gmra.mxu2 %v2489_v32  ;;  %v2449_v35 = vadd.f32 %v2438_v33, %v2275_v20  ;;  %v2599_v33 = vsel %vm2598_vm13, %v3744_v16, %v2597_v28 }
 0x228   : > { %2746 = vmatpush.bf16.msrb.mxu3 %v3611_v8 }
 0x229   : > { %v2461_v43 = vadd.f32 %v4585_v4, %v2449_v35  ;;  %v3605_v35 = vld [vmem:[#allocation12] sm:$0xff] }
 0x22b   : > { %v2469_v9 = vmax.f32 %v2461_v43, 0.0 }
 0x22c   : > { %2747 = vmatpush.bf16.msrb.mxu3 %v3610_v0 }
 0x22e   : > { %v2440_v13 = vpop.f32.mrf.mxu1 }
 0x22f   : > { %v2450_v44 = vadd.f32 %v2440_v13, %v2276_v37 }
 0x230   : > { %2748 = vmatpush.bf16.msrb.mxu3 %v3609_v2 }
 0x231   : > { %v2462_v40 = vadd.f32 %v4585_v4, %v2450_v44 }
 0x233   : > { %v2470_v55 = vmax.f32 %v2462_v40, 0.0 }
 0x234   : > { %2749 = vmatpush.bf16.msrb.mxu3 %v3608_v62 }
 0x235   : > { %v2490_v45 = vpack.c.bf16 %v2470_v55, %v2469_v9 }
 0x237   : > { %2562 = vmatmul.bf16.gmra.mxu2 %v2490_v45 }
 0x238   : > { %2750 = vmatpush.bf16.msrb.mxu3 %v3607_v27 }
 0x23c   : > { %2751 = vmatpush.bf16.msrb.mxu3 %v3606_v18 }
 0x240   : > { %2752 = vmatpush.bf16.msrb.mxu3 %v3605_v35 }
 0x28a   : > { %v2548_v14 = vpop.f32.mrf.mxu2 }
 0x28b   : > { %v4614_v11 = vadd.f32 %v3742_v24, %v2548_v14 }
 0x292   : > { %v2550_v38 = vpop.f32.mrf.mxu2 }
 0x293   : > { %v4612_v7 = vadd.f32 %v3742_v24, %v2550_v38 }
 0x295   : > { %v2580_v30 = vadd.f32 %v4612_v7, %v4614_v11 }
 0x29a   : > { %v2553_v25 = vpop.f32.mrf.mxu2 }
 0x29b   : > { %v4616_v12 = vadd.f32 %v3742_v24, %v2553_v25  ;;  %v437_v25 = vld [vmem:[%s4211_s26] sm:$0xff]  }
 0x29c   : > { %v2786_v6 = vunpack.c.l.bf16 %v437_v25  ;;  %v2787_v19 = vunpack.c.h.bf16 %v437_v25 }
 0x29d   : > { %v2581_v29 = vadd.f32 %v2580_v30, %v4616_v12 }
 0x2a2   : > { %v2555_v4 = vpop.f32.mrf.mxu2 }
 0x2a3   : > { %v4620_v46 = vadd.f32 %v3742_v24, %v2555_v4  ;;  %v439_v4 = vld [vmem:[%s4211_s26 + $0x8] sm:$0xff]  }
 0x2a4   : > { %v2788_v30 = vunpack.c.l.bf16 %v439_v4  ;;  %v2789_v8 = vunpack.c.h.bf16 %v439_v4 }
 0x2a5   : > { %v2582_v21 = vadd.f32 %v2581_v29, %v4620_v46  ;;  %v2791_v29 = vunpack.c.h.bf16 %v441_v15 }
 0x2aa   : > { %v2558_v59 = vpop.f32.mrf.mxu2 }
 0x2ab   : > { %v4623_v48 = vadd.f32 %v3742_v24, %v2558_v59 }
 0x2ad   : > { %v2583_v36 = vadd.f32 %v2582_v21, %v4623_v48 }
 0x2b2   : > { %v2560_v63 = vpop.f32.mrf.mxu2 }
 0x2b3   : > { %v4626_v23 = vadd.f32 %v3742_v24, %v2560_v63  ;;  %v443_v63 = vld [vmem:[%s4211_s26 + $0x18] sm:$0xff]   ;;  %s2827_s26 = scalar_lea.sflag [#allocation5], %s4205_s27 }
 0x2b4   : > { %v2792_v16 = vunpack.c.l.bf16 %v443_v63  ;;  %v2793_v21 = vunpack.c.h.bf16 %v443_v63 }
 0x2b5   : > { %v2584_v39 = vadd.f32 %v2583_v36, %v4626_v23 }
 0x2ba   : > { %v2563_v1 = vpop.f32.mrf.mxu2 }
 0x2bb   : > { %v4629_v5 = vadd.f32 %v3742_v24, %v2563_v1  ;;  %v2790_v1 = vunpack.c.l.bf16 %v441_v15 }
 0x2bd   : > { %v2585_v42 = vadd.f32 %v2584_v39, %v4629_v5 }
 0x2c2   : > { %v2565_v3 = vpop.f32.mrf.mxu2 }
 0x2c3   : > { %v4633_v10 = vadd.f32 %v3742_v24, %v2565_v3 }
 0x2c5   : > { %v2586_v34 = vadd.f32 %v2585_v42, %v4633_v10 }
 0x2c7   : > { %v2587_v26 = vrot.slane %v2586_v34, 4 }
 0x2c9   : > { %v2588_v61 = vadd.f32 %v2587_v26, %v2586_v34 }
 0x2cb   : > { %v2589_v56 = vrot.slane %v2588_v61, 2 }
 0x2cd   : > { %v2590_v47 = vadd.f32 %v2589_v56, %v2588_v61 }
 0x2cf   : > { %v2591_v32 = vrot.slane %v2590_v47, 1 }
 0x2d1   : > { %v2592_v52 = vadd.f32 %v2591_v32, %v2590_v47 }
 0x2d3   : > { %v2600_v57 = vmul.f32 %v2599_v33, %v2592_v52 }
 0x2d5   : > { %v2601_v20 = vpack.c.bf16 %v2600_v57, %v2600_v57 }
 0x2d7   : > { %2674 = vmatmul.bf16.vlgmr.msra.gmra.mxu3 %v2601_v20 }
 0x35a   : > { %v2675_v22 = vpop.f32.mrf.mxu3 }
 0x35b   : > { %v2679_v37 = vmax.f32 %v2675_v22, 0.0 }
 0x35d   : > { %v2680_v13 = vpack.c.bf16 %v2679_v37, %v2679_v37 }
 0x35f   : > { %2753 = vmatmul.bf16.vlgmr.msrb.gmra.mxu3 %v2680_v13 }
 0x362   : > { %v2677_v43 = vpop.f32.mrf.mxu3 }
 0x3e2   : > { %v2754_v44 = vpop.f32.mrf.mxu3 }
 0x3e3   : > { %v3486_v40 = vmul.f32 -1.442695, %v2754_v44 }
 0x3e5   : > { %3745 = vpow2.f32 %v3486_v40 }
 0x3ea   : > { %v2756_v9 = vpop.f32.mrf.mxu3 }
 0x3eb   : > { %v3746_v55 = vpop.eup %3745 }
 0x3ec   : > { %v2761_v45 = vadd.f32 1.0, %v3746_v55 }
 0x3ee   : > { %3747 = vrcp.f32 %v2761_v45  ;;  %v2773_v14 = vand.u32 2147483648, %v2761_v45  ;;  %v2771_v38 = vand.u32 2147483647, %v2761_v45  ;;  %vm2767_vm15 = vweird.f32 %v2761_v45 }
 0x3f0   : > { %v2774_v54 = vor.u32 1.1754944e-38, %v2773_v14  ;;  %vm2772_vm1 = vcmp.eq.f32.partialorder %v2771_v38, 8.507059e+37 }
 0x3f4   : > { %v3748_v49 = vpop.eup %3747 }
 0x3f5   : > { %v2763_v50 = vmul.f32 %v3748_v49, %v2761_v45  ;;  %vm2768_vm14 = vweird.f32 %v3748_v49 }
 0x3f6   : > { %vm2769_vm0 = vmor %vm2767_vm15, %vm2768_vm14 }
 0x3f7   : > { %v2764_v17 = vsub.f32 1.0, %v2763_v50 }
 0x3f9   : > { %v2765_v53 = vmul.f32 %v3748_v49, %v2764_v17 }
 0x3fb   : > { %v2766_v58 = vadd.f32 %v3748_v49, %v2765_v53 }
 0x3fd   : > { %v2770_v59 = vsel %vm2769_vm0, %v3748_v49, %v2766_v58 }
 0x3fe   : > { %v2775_v24 = vsel %vm2772_vm1, %v2774_v54, %v2770_v59 }
 0x3ff   : > { %v2777_v31 = vperm.slane %v2775_v24, 0 }
 0x401   : > { %v2778_v0 = vmul.f32 %v2777_v31, %v4614_v11  ;;  %v2779_v36 = vmul.f32 %v2777_v31, %v4612_v7  ;;  %v2780_v60 = vmul.f32 %v2777_v31, %v4616_v12  ;;  %v2781_v39 = vmul.f32 %v2777_v31, %v4620_v46 }
 0x402   : > { %v2782_v2 = vmul.f32 %v2777_v31, %v4623_v48  ;;  %v2783_v3 = vmul.f32 %v2777_v31, %v4626_v23  ;;  %v2784_v42 = vmul.f32 %v2777_v31, %v4629_v5  ;;  %v2785_v41 = vmul.f32 %v2777_v31, %v4633_v10 }
 0x403   : > { %v2794_v34 = vadd.f32 %v2786_v6, %v2778_v0  ;;  %v2795_v62 = vadd.f32 %v2787_v19, %v2779_v36  ;;  %v2796_v26 = vadd.f32 %v2788_v30, %v2780_v60  ;;  %v2797_v51 = vadd.f32 %v2789_v8, %v2781_v39 }
 0x404   : > { %v2798_v7 = vadd.f32 %v2790_v1, %v2782_v2  ;;  %v2799_v11 = vadd.f32 %v2791_v29, %v2783_v3  ;;  %v2800_v12 = vadd.f32 %v2792_v16, %v2784_v42  ;;  %v2801_v46 = vadd.f32 %v2793_v21, %v2785_v41 }
 0x405   : > { %v2802_v48 = vmax.f32 %v2794_v34, 0.0  ;;  %v2803_v61 = vmax.f32 %v2795_v62, 0.0  ;;  %v2804_v23 = vmax.f32 %v2796_v26, 0.0  ;;  %v2805_v27 = vmax.f32 %v2797_v51, 0.0 }
 0x406   : > { %v2806_v5 = vmax.f32 %v2798_v7, 0.0  ;;  %v2807_v56 = vmax.f32 %v2799_v11, 0.0  ;;  %v2808_v10 = vmax.f32 %v2800_v12, 0.0  ;;  %v2809_v28 = vmax.f32 %v2801_v46, 0.0 }
 0x407   : > { %v3617_v47 = vpack.c.bf16 %v2803_v61, %v2802_v48  ;;  %v3622_v18 = vpack.c.bf16 %v2805_v27, %v2804_v23 }
 0x408   : > { %v3627_v32 = vpack.c.bf16 %v2807_v56, %v2806_v5  ;;  %v3632_v33 = vpack.c.bf16 %v2809_v28, %v2808_v10 }
 0x409   : > { %3618 = vst [vmem:[%s435_s19] sm:$0xff] %v3617_v47  }
 0x40a   : > { %3634 = vst [vmem:[%s435_s19 + $0x8] sm:$0xff] %v3622_v18  }
 0x40b   : > { %3635 = vst [vmem:[%s435_s19 + $0x10] sm:$0xff] %v3627_v32  }
 0x40c   : > { %3636 = vst [vmem:[%s435_s19 + $0x18] sm:$0xff] %v3632_v33  }
 0x40d   : > { %3956 = shalt.err (!%p3953_p9)
}
 0x40e   : > { %s4018_s27 = smov 64   ;;  %s4019_s29 = smov 4  }
 0x40f   : > { %3659 = dma.vmem_to_hbm [thread:$0]  (%p4171_p13), %s2840_s21, 512, %s2842_s5, %s2827_s26, %s4018_s27, %s4018_s27, %s4019_s29  }
 0x410 PF: > { %s2856_s16 = sand.u32 1, %s3995_s30   ;;  %p4719_p10 = scmp.ge.s32.totalorder %s4007_s12, 2 }
 0x411   : > { %s2857_s25 = scalar_lea.sflag [#allocation5], %s2856_s16 }
 0x412   : > { %p3682_p11 = pnand %p4719_p10, %p4176_p4 }
 0x414   : > { %p3683_p0 = pneg %p3682_p11 }
 0x416   : > { %3990 = dma.done.wait (%p3683_p0), %s2857_s25, 512  }
 0x417   : > { %3992 = vsyncadd (%p3683_p0), %s2857_s25, 4294966784  ;;  %p25_p2 = scmp.ge.s32.totalorder %s4151_s18, 4   ;;  %s4720_s30 = smov %s3999_s10 }
 0x418   : > { %s4721_s10 = smov %s4003_s11  ;;  %s4722_s11 = smov %s4163_s20 }
 0x419   : > { %s4723_s12 = smov %s4151_s18  ;;  %27 = sbr.rel (!%p25_p2) target bundleno = 12 (0xc), region = 132 }
 0x41e   :  { %2863 = vsyncpa [#allocation4], 1 }
 0x41f   :  { %2865 = vsyncpa [#allocation4 + $0x1], 1 }
 0x420   :  { %2866 = vsyncpa [#allocation7], 1 }
 0x421   :  { %2867 = vsyncpa [#allocation10], 1 }
 0x422   :  { %2868 = vsyncpa [#allocation13], 1 }
 0x423   :  { %2869 = vsyncpa [#allocation5], 1 }
 0x424   :  { %2871 = vsyncpa [#allocation5 + $0x1], 1 }

</bundles_post_ra>
